<compile_context>
chip_gen: v7x
topology: tpu7x:2x2x1
jax: 0.10.0
libtpu: 0.0.40
codegen_flags: <defaults>
</compile_context>

<pallas_src>
import functools
import math

import jax
import jax.numpy as jnp
from jax.experimental import pallas as pl
from jax.experimental.pallas import tpu as pltpu


# ---------------------------------------------------------------------------
# In-kernel helpers (f32 VPU math)
# ---------------------------------------------------------------------------
def _layer_norm(x, gamma, beta, eps=1e-5):
    mu = jnp.mean(x, axis=-1, keepdims=True)
    var = jnp.mean((x - mu) ** 2, axis=-1, keepdims=True)
    return (x - mu) * jax.lax.rsqrt(var + eps) * gamma + beta


# ---------------------------------------------------------------------------
# Fully fused transformer kernel: all encoder layers + output head.
# Post-norm, ReLU FFN, additive causal mask; dropout is identity (eval mode).
# ---------------------------------------------------------------------------
def fused_transformer_kernel(x_ref,
                             wqkv_ref, bqkv_ref, wo_ref, bo_ref,
                             ln1w_ref, ln1b_ref,
                             w1_ref, b1_ref, w2_ref, b2_ref,
                             ln2w_ref, ln2b_ref,
                             wout_ref, bout_ref,
                             out_ref, *, num_layers, nhead):
    bt, S, D = x_ref.shape                     # batch tile, seq, d_model
    H = nhead
    dh = D // H
    M = bt * S
    Vp = wout_ref.shape[1]
    scale = 1.0 / math.sqrt(dh)

    # Flatten (batch_tile, S) into the matmul M dimension; residual stream in f32.
    x = x_ref[...].astype(jnp.float32).reshape(M, D)

    # Additive causal mask [1, S, S], built once and reused every layer
    # (one VPU add per layer instead of a compare + select).
    row = jax.lax.broadcasted_iota(jnp.int32, (S, S), 0)
    col = jax.lax.broadcasted_iota(jnp.int32, (S, S), 1)
    mask_add = jnp.where(col <= row, 0.0, -1e30).astype(jnp.float32)[None, :, :]

    def split_heads(t):                        # [M, D] -> [bt*H, S, dh]  (one relayout)
        return jnp.transpose(t.reshape(bt, S, H, dh), (0, 2, 1, 3)).reshape(bt * H, S, dh)

    def merge_heads(t):                        # [bt*H, S, dh] -> [M, D]  (one relayout)
        return jnp.transpose(t.reshape(bt, H, S, dh), (0, 2, 1, 3)).reshape(M, D)

    # Static (unrolled) loop over layers: weights indexed on their leading L axis.
    # TODO(synk): for non-toy num_layers/d_model, stream layer weights over an
    # 'arbitrary' grid axis (x carried in VMEM scratch) instead of unrolling so only
    # ~2 layers of weights are VMEM-resident at once.
    for l in range(num_layers):
        # ---- self-attention: one fused QKV matmul, heads batched in 2 einsums ----
        qkv = jnp.dot(x.astype(jnp.bfloat16), wqkv_ref[l],
                      preferred_element_type=jnp.float32) + bqkv_ref[l]   # [M, 3D]
        q = qkv[:, :D] * scale                 # fold softmax scale into q (cheap: [M,D])
        k = qkv[:, D:2 * D]
        v = qkv[:, 2 * D:]
        qh = split_heads(q).astype(jnp.bfloat16)                          # [bt*H, S, dh]
        kh = split_heads(k).astype(jnp.bfloat16)
        vh = split_heads(v).astype(jnp.bfloat16)

        # TODO(synk): for long sequences, tile over KV (online/flash softmax) so the
        # [bt*H, S, S] scores never materialize; also pad dh toward 128 for MXU
        # utilization. Fine as-is for the toy S / dh here.
        s = jnp.einsum('bqd,bkd->bqk', qh, kh,
                       preferred_element_type=jnp.float32) + mask_add     # [bt*H, S, S]
        s = s - jnp.max(s, axis=-1, keepdims=True)
        p = jnp.exp(s)
        p = p / jnp.sum(p, axis=-1, keepdims=True)     # exact softmax (matches reference)

        ctx = jnp.einsum('bqk,bkd->bqd', p.astype(jnp.bfloat16), vh,
                         preferred_element_type=jnp.float32)              # [bt*H, S, dh]
        attn = merge_heads(ctx)                                           # [M, D]
        attn = jnp.dot(attn.astype(jnp.bfloat16), wo_ref[l],
                       preferred_element_type=jnp.float32) + bo_ref[l]

        # ---- residual + LayerNorm 1 (f32) ----
        x = _layer_norm(x + attn, ln1w_ref[l], ln1b_ref[l])

        # ---- feed-forward: Linear -> ReLU -> Linear ----
        h1 = jnp.dot(x.astype(jnp.bfloat16), w1_ref[l],
                     preferred_element_type=jnp.float32) + b1_ref[l]
        h1 = jnp.maximum(h1, 0.0)
        ff = jnp.dot(h1.astype(jnp.bfloat16), w2_ref[l],
                     preferred_element_type=jnp.float32) + b2_ref[l]

        # ---- residual + LayerNorm 2 (f32) ----
        x = _layer_norm(x + ff, ln2w_ref[l], ln2b_ref[l])

    # ---- output head: lane-dense (vocab padded to a multiple of 128), bf16 store ----
    logits = jnp.dot(x.astype(jnp.bfloat16), wout_ref[...],
                     preferred_element_type=jnp.float32) + bout_ref[...]  # [M, Vp]
    out_ref[...] = logits.reshape(bt, S, Vp).astype(out_ref.dtype)


# ---------------------------------------------------------------------------
# Wrapper: single pallas_call for the whole stack, batch tiled on a "parallel" grid.
# ---------------------------------------------------------------------------
def _default_batch_tile(B):
    # Aim for >= 2 grid steps (DMA/compute pipelining; v7x megacore gets both TCs)
    # while keeping equal-size tiles.
    target = min(B, 4)
    bt = max(1, B // target)
    while B % bt:
        bt -= 1
    return bt


def _vmem_limit_bytes():
    cap = 128 * 1024 * 1024
    try:
        cap = int(pltpu.get_tpu_info().vmem_capacity_bytes)   # 128 MiB v5e/v6e, 64 MiB v7x
    except Exception:
        pass
    # ~80% of physical VMEM: leaves headroom for the compiler's own double-buffering.
    return max(32 * 1024 * 1024, int(cap * 0.8))


def fused_forward(x, params, *, nhead, batch_tile=None):
    B, S, D = x.shape
    L = params["wqkv"].shape[0]
    Vp = params["wout"].shape[1]
    if batch_tile is None:
        batch_tile = _default_batch_tile(B)
    assert B % batch_tile == 0
    n_tiles = pl.cdiv(B, batch_tile)

    weight_names = ("wqkv", "bqkv", "wo", "bo", "ln1_w", "ln1_b",
                    "w1", "b1", "w2", "b2", "ln2_w", "ln2_b", "wout", "bout")
    weights = [params[name] for name in weight_names]

    kernel = functools.partial(fused_transformer_kernel, num_layers=L, nhead=nhead)

    def call(single_buffer_weights):
        def wspec(w):
            idx = lambda i, n=w.ndim: (0,) * n            # grid-invariant, stays in VMEM
            if single_buffer_weights:
                return pl.BlockSpec(w.shape, idx, pipeline_mode=pl.Buffered(1))
            return pl.BlockSpec(w.shape, idx)

        in_specs = [pl.BlockSpec((batch_tile, S, D), lambda i: (i, 0, 0))]
        in_specs += [wspec(w) for w in weights]

        return pl.pallas_call(
            kernel,
            out_shape=jax.ShapeDtypeStruct((B, S, Vp), jnp.bfloat16),
            grid=(n_tiles,),
            in_specs=in_specs,
            out_specs=pl.BlockSpec((batch_tile, S, Vp), lambda i: (i, 0, 0)),
            compiler_params=pltpu.CompilerParams(
                dimension_semantics=("parallel",),
                vmem_limit_bytes=_vmem_limit_bytes(),
            ),
        )(x, *weights)

    try:
        return call(True)
    except Exception:
        # Fallback for jax versions where BlockSpec pipeline_mode / Buffered(1)
        # is unsupported: default double-buffered weight blocks.
        return call(False)


# ---------------------------------------------------------------------------
# Parameter init (xavier-uniform matrices, zeros/ones otherwise), stacked per layer.
# Matmul weights stored in bf16 (halves DMA bytes / VMEM, MXU-native); biases and
# LayerNorm params stay f32.
# ---------------------------------------------------------------------------
def make_positional_encoding(max_len, d_model):
    pos = jnp.arange(max_len, dtype=jnp.float32)[:, None]
    div = jnp.exp(jnp.arange(0, d_model, 2, dtype=jnp.float32)
                  * (-math.log(10000.0) / d_model))
    pe = jnp.zeros((max_len, d_model), jnp.float32)
    pe = pe.at[:, 0::2].set(jnp.sin(pos * div))
    pe = pe.at[:, 1::2].set(jnp.cos(pos * div))
    return pe


def init_params(key, vocab_size, d_model, nhead, num_layers, seq_len):
    d_ff = d_model * 2
    v_pad = ((vocab_size + 127) // 128) * 128
    keys = list(jax.random.split(key, 2 + 4 * num_layers))
    ki = iter(keys)

    def xavier(k, shape):
        limit = math.sqrt(6.0 / (shape[0] + shape[1]))
        return jax.random.uniform(k, shape, jnp.float32, -limit, limit)

    wqkv, wo, w1, w2 = [], [], [], []
    for _ in range(num_layers):
        wqkv.append(xavier(next(ki), (d_model, 3 * d_model)))   # fused Q|K|V, [in, out]
        wo.append(xavier(next(ki), (d_model, d_model)))
        w1.append(xavier(next(ki), (d_model, d_ff)))
        w2.append(xavier(next(ki), (d_ff, d_model)))

    wout = jnp.zeros((d_model, v_pad), jnp.float32)
    wout = wout.at[:, :vocab_size].set(xavier(next(ki), (d_model, vocab_size)))

    L = num_layers
    params = {
        "embedding": xavier(next(ki), (vocab_size, d_model)),
        "pe": make_positional_encoding(seq_len, d_model),
        "wqkv": jnp.stack(wqkv).astype(jnp.bfloat16),           # [L, D, 3D]
        "bqkv": jnp.zeros((L, 1, 3 * d_model), jnp.float32),
        "wo": jnp.stack(wo).astype(jnp.bfloat16),               # [L, D, D]
        "bo": jnp.zeros((L, 1, d_model), jnp.float32),
        "ln1_w": jnp.ones((L, 1, d_model), jnp.float32),
        "ln1_b": jnp.zeros((L, 1, d_model), jnp.float32),
        "w1": jnp.stack(w1).astype(jnp.bfloat16),               # [L, D, dff]
        "b1": jnp.zeros((L, 1, d_ff), jnp.float32),
        "w2": jnp.stack(w2).astype(jnp.bfloat16),               # [L, dff, D]
        "b2": jnp.zeros((L, 1, d_model), jnp.float32),
        "ln2_w": jnp.ones((L, 1, d_model), jnp.float32),
        "ln2_b": jnp.zeros((L, 1, d_model), jnp.float32),
        "wout": wout.astype(jnp.bfloat16),                      # [D, Vp] (vocab padded to 128)
        "bout": jnp.zeros((1, v_pad), jnp.float32),
    }
    return params


# ---------------------------------------------------------------------------
# Full forward pass
# ---------------------------------------------------------------------------
def bare_bones_transformer(params, src, d_model, nhead, vocab_size, batch_tile=None):
    B, S = src.shape
    # Embedding gather + scale + positional encoding: JAX glue (int gather).
    # TODO(synk): embedding gather could be a manual DMA-gather kernel for large vocabs.
    x = params["embedding"][src] * math.sqrt(d_model)            # [B, S, D] f32
    x = (x + params["pe"][None, :S, :]).astype(jnp.bfloat16)     # bf16 into the kernel
    logits_pad = fused_forward(x, params, nhead=nhead, batch_tile=batch_tile)  # [B,S,Vp] bf16
    return logits_pad[:, :, :vocab_size]                         # drop lane padding


if __name__ == "__main__":
    vocab_size, d_model, nhead, num_layers, seq_len = 64, 32, 4, 2, 8
    batch = 2

    key = jax.random.PRNGKey(0)
    params = init_params(key, vocab_size, d_model, nhead, num_layers, seq_len)
    src = jax.random.randint(jax.random.fold_in(key, 1234), (batch, seq_len),
                             0, vocab_size, dtype=jnp.int32)

    logits = bare_bones_transformer(params, src, d_model, nhead, vocab_size)
    jax.block_until_ready(logits)
    assert logits.shape == (batch, seq_len, vocab_size)
    assert bool(jnp.all(jnp.isfinite(logits.astype(jnp.float32))))
    print("KERNEL_OK")
</pallas_src>

<mosaic_0001>
module attributes {stable_mosaic.version = 11 : i64} {
  func.func @fused_transformer_kernel(%arg0: i32, %arg1: memref<1x8x32xbf16, #tpu.memory_space<vmem>>, %arg2: memref<2x32x96xbf16, #tpu.memory_space<vmem>>, %arg3: memref<2x1x96xf32, #tpu.memory_space<vmem>>, %arg4: memref<2x32x32xbf16, #tpu.memory_space<vmem>>, %arg5: memref<2x1x32xf32, #tpu.memory_space<vmem>>, %arg6: memref<2x1x32xf32, #tpu.memory_space<vmem>>, %arg7: memref<2x1x32xf32, #tpu.memory_space<vmem>>, %arg8: memref<2x32x64xbf16, #tpu.memory_space<vmem>>, %arg9: memref<2x1x64xf32, #tpu.memory_space<vmem>>, %arg10: memref<2x64x32xbf16, #tpu.memory_space<vmem>>, %arg11: memref<2x1x32xf32, #tpu.memory_space<vmem>>, %arg12: memref<2x1x32xf32, #tpu.memory_space<vmem>>, %arg13: memref<2x1x32xf32, #tpu.memory_space<vmem>>, %arg14: memref<32x128xbf16, #tpu.memory_space<vmem>>, %arg15: memref<1x128xf32, #tpu.memory_space<vmem>>, %arg16: memref<1x8x128xbf16, #tpu.memory_space<vmem>>) attributes {dimension_semantics = [#tpu.dimension_semantics<parallel>], iteration_bounds = array<i64: 2>, scalar_prefetch = 0 : i64, scratch_operands = 0 : i64, tpu.core_type = #tpu.core_type<tc>, window_params = [{transform_indices = @transform_0, window_bounds = array<i64: 1, 8, 32>}, {pipeline_mode = #tpu.pipeline_mode<synchronous>, transform_indices = @transform_1, window_bounds = array<i64: 2, 32, 96>}, {pipeline_mode = #tpu.pipeline_mode<synchronous>, transform_indices = @transform_2, window_bounds = array<i64: 2, 1, 96>}, {pipeline_mode = #tpu.pipeline_mode<synchronous>, transform_indices = @transform_3, window_bounds = array<i64: 2, 32, 32>}, {pipeline_mode = #tpu.pipeline_mode<synchronous>, transform_indices = @transform_4, window_bounds = array<i64: 2, 1, 32>}, {pipeline_mode = #tpu.pipeline_mode<synchronous>, transform_indices = @transform_5, window_bounds = array<i64: 2, 1, 32>}, {pipeline_mode = #tpu.pipeline_mode<synchronous>, transform_indices = @transform_6, window_bounds = array<i64: 2, 1, 32>}, {pipeline_mode = #tpu.pipeline_mode<synchronous>, transform_indices = @transform_7, window_bounds = array<i64: 2, 32, 64>}, {pipeline_mode = #tpu.pipeline_mode<synchronous>, transform_indices = @transform_8, window_bounds = array<i64: 2, 1, 64>}, {pipeline_mode = #tpu.pipeline_mode<synchronous>, transform_indices = @transform_9, window_bounds = array<i64: 2, 64, 32>}, {pipeline_mode = #tpu.pipeline_mode<synchronous>, transform_indices = @transform_10, window_bounds = array<i64: 2, 1, 32>}, {pipeline_mode = #tpu.pipeline_mode<synchronous>, transform_indices = @transform_11, window_bounds = array<i64: 2, 1, 32>}, {pipeline_mode = #tpu.pipeline_mode<synchronous>, transform_indices = @transform_12, window_bounds = array<i64: 2, 1, 32>}, {pipeline_mode = #tpu.pipeline_mode<synchronous>, transform_indices = @transform_13, window_bounds = array<i64: 32, 128>}, {pipeline_mode = #tpu.pipeline_mode<synchronous>, transform_indices = @transform_14, window_bounds = array<i64: 1, 128>}, {transform_indices = @transform_15, window_bounds = array<i64: 1, 8, 128>}]} {
    %c0 = arith.constant 0 : index
    %c0_0 = arith.constant 0 : index
    %c0_1 = arith.constant 0 : index
    %0 = vector.load %arg1[%c0, %c0_0, %c0_1] : memref<1x8x32xbf16, #tpu.memory_space<vmem>>, vector<1x8x32xbf16>
    %1 = arith.extf %0 : vector<1x8x32xbf16> to vector<1x8x32xf32>
    %2 = vector.shape_cast %1 : vector<1x8x32xf32> to vector<8x32xf32>
    %3 = tpu.iota {dimensions = array<i32: 0>} : vector<8x8xi32>
    %4 = tpu.iota {dimensions = array<i32: 1>} : vector<8x8xi32>
    %5 = arith.cmpi sle, %4, %3 : vector<8x8xi32>
    %cst = arith.constant 0.000000e+00 : f32
    %cst_2 = arith.constant -1.000000e+30 : f32
    %6 = vector.broadcast %cst : f32 to vector<8x8xf32>
    %7 = vector.broadcast %cst_2 : f32 to vector<8x8xf32>
    %8 = arith.select %5, %6, %7 : vector<8x8xi1>, vector<8x8xf32>
    %9 = vector.shape_cast %8 : vector<8x8xf32> to vector<1x8x8xf32>
    %10 = arith.truncf %2 : vector<8x32xf32> to vector<8x32xbf16>
    %c0_3 = arith.constant 0 : index
    %c0_4 = arith.constant 0 : index
    %c0_5 = arith.constant 0 : index
    %11 = vector.load %arg2[%c0_3, %c0_4, %c0_5] : memref<2x32x96xbf16, #tpu.memory_space<vmem>>, vector<1x32x96xbf16>
    %12 = vector.shape_cast %11 : vector<1x32x96xbf16> to vector<32x96xbf16>
    %cst_6 = arith.constant dense<0.000000e+00> : vector<8x96xf32>
    %13 = tpu.matmul %10, %12, %cst_6 {dimension_numbers = #tpu.dot_dimension_numbers<[1], [0], [0], [1], [0, 0, 1, 1], [], []>} : vector<8x32xbf16>, vector<32x96xbf16>, vector<8x96xf32> -> vector<8x96xf32>
    %c0_7 = arith.constant 0 : index
    %c0_8 = arith.constant 0 : index
    %c0_9 = arith.constant 0 : index
    %14 = vector.load %arg3[%c0_7, %c0_8, %c0_9] : memref<2x1x96xf32, #tpu.memory_space<vmem>>, vector<1x1x96xf32>
    %15 = vector.shape_cast %14 : vector<1x1x96xf32> to vector<1x96xf32>
    %16 = vector.broadcast %15 : vector<1x96xf32> to vector<8x96xf32>
    %17 = arith.addf %13, %16 : vector<8x96xf32>
    %18 = vector.extract_strided_slice %17 {offsets = [0, 0], sizes = [8, 32], strides = [1, 1]} : vector<8x96xf32> to vector<8x32xf32>
    %cst_10 = arith.constant 0.353553385 : f32
    %19 = vector.broadcast %cst_10 : f32 to vector<8x32xf32>
    %20 = arith.mulf %18, %19 : vector<8x32xf32>
    %21 = vector.extract_strided_slice %17 {offsets = [0, 32], sizes = [8, 32], strides = [1, 1]} : vector<8x96xf32> to vector<8x32xf32>
    %22 = vector.extract_strided_slice %17 {offsets = [0, 64], sizes = [8, 32], strides = [1, 1]} : vector<8x96xf32> to vector<8x32xf32>
    %23 = vector.shape_cast %20 : vector<8x32xf32> to vector<1x8x4x8xf32>
    %24 = tpu.transpose %23, [0, 2, 1, 3] : vector<1x8x4x8xf32> -> vector<1x4x8x8xf32>
    %25 = vector.shape_cast %24 : vector<1x4x8x8xf32> to vector<4x8x8xf32>
    %26 = arith.truncf %25 : vector<4x8x8xf32> to vector<4x8x8xbf16>
    %27 = vector.shape_cast %21 : vector<8x32xf32> to vector<1x8x4x8xf32>
    %28 = tpu.transpose %27, [0, 2, 1, 3] : vector<1x8x4x8xf32> -> vector<1x4x8x8xf32>
    %29 = vector.shape_cast %28 : vector<1x4x8x8xf32> to vector<4x8x8xf32>
    %30 = arith.truncf %29 : vector<4x8x8xf32> to vector<4x8x8xbf16>
    %31 = vector.shape_cast %22 : vector<8x32xf32> to vector<1x8x4x8xf32>
    %32 = tpu.transpose %31, [0, 2, 1, 3] : vector<1x8x4x8xf32> -> vector<1x4x8x8xf32>
    %33 = vector.shape_cast %32 : vector<1x4x8x8xf32> to vector<4x8x8xf32>
    %34 = arith.truncf %33 : vector<4x8x8xf32> to vector<4x8x8xbf16>
    "tpu.trace_start"() <{level = 10 : i32, message = "bqd,bkd->bqk"}> : () -> ()
    %cst_11 = arith.constant dense<0.000000e+00> : vector<4x8x8xf32>
    %35 = tpu.matmul %26, %30, %cst_11 {dimension_numbers = #tpu.dot_dimension_numbers<[2], [2], [1], [1], [0, 0, 0, 1, 1, 1], [0], [0]>} : vector<4x8x8xbf16>, vector<4x8x8xbf16>, vector<4x8x8xf32> -> vector<4x8x8xf32>
    "tpu.trace_stop"() : () -> ()
    %36 = vector.broadcast %9 : vector<1x8x8xf32> to vector<4x8x8xf32>
    %37 = arith.addf %35, %36 : vector<4x8x8xf32>
    %cst_12 = arith.constant dense<0xFF800000> : vector<4x8xf32>
    %38 = vector.multi_reduction <maximumf>, %37, %cst_12 [2] : vector<4x8x8xf32> to vector<4x8xf32>
    %39 = vector.shape_cast %38 : vector<4x8xf32> to vector<4x8x1xf32>
    %40 = vector.broadcast %39 : vector<4x8x1xf32> to vector<4x8x8xf32>
    %41 = arith.subf %37, %40 : vector<4x8x8xf32>
    %42 = math.exp %41 : vector<4x8x8xf32>
    %cst_13 = arith.constant dense<0.000000e+00> : vector<4x8xf32>
    %43 = vector.multi_reduction <add>, %42, %cst_13 [2] : vector<4x8x8xf32> to vector<4x8xf32>
    %44 = vector.shape_cast %43 : vector<4x8xf32> to vector<4x8x1xf32>
    %45 = vector.broadcast %44 : vector<4x8x1xf32> to vector<4x8x8xf32>
    %46 = arith.divf %42, %45 : vector<4x8x8xf32>
    %47 = arith.truncf %46 : vector<4x8x8xf32> to vector<4x8x8xbf16>
    "tpu.trace_start"() <{level = 10 : i32, message = "bqk,bkd->bqd"}> : () -> ()
    %cst_14 = arith.constant dense<0.000000e+00> : vector<4x8x8xf32>
    %48 = tpu.matmul %47, %34, %cst_14 {dimension_numbers = #tpu.dot_dimension_numbers<[2], [1], [1], [2], [0, 0, 0, 1, 1, 2], [0], [0]>} : vector<4x8x8xbf16>, vector<4x8x8xbf16>, vector<4x8x8xf32> -> vector<4x8x8xf32>
    "tpu.trace_stop"() : () -> ()
    %49 = vector.shape_cast %48 : vector<4x8x8xf32> to vector<1x4x8x8xf32>
    %50 = tpu.transpose %49, [0, 2, 1, 3] : vector<1x4x8x8xf32> -> vector<1x8x4x8xf32>
    %51 = vector.shape_cast %50 : vector<1x8x4x8xf32> to vector<8x32xf32>
    %52 = arith.truncf %51 : vector<8x32xf32> to vector<8x32xbf16>
    %c0_15 = arith.constant 0 : index
    %c0_16 = arith.constant 0 : index
    %c0_17 = arith.constant 0 : index
    %53 = vector.load %arg4[%c0_15, %c0_16, %c0_17] : memref<2x32x32xbf16, #tpu.memory_space<vmem>>, vector<1x32x32xbf16>
    %54 = vector.shape_cast %53 : vector<1x32x32xbf16> to vector<32x32xbf16>
    %cst_18 = arith.constant dense<0.000000e+00> : vector<8x32xf32>
    %55 = tpu.matmul %52, %54, %cst_18 {dimension_numbers = #tpu.dot_dimension_numbers<[1], [0], [0], [1], [0, 0, 1, 1], [], []>} : vector<8x32xbf16>, vector<32x32xbf16>, vector<8x32xf32> -> vector<8x32xf32>
    %c0_19 = arith.constant 0 : index
    %c0_20 = arith.constant 0 : index
    %c0_21 = arith.constant 0 : index
    %56 = vector.load %arg5[%c0_19, %c0_20, %c0_21] : memref<2x1x32xf32, #tpu.memory_space<vmem>>, vector<1x1x32xf32>
    %57 = vector.shape_cast %56 : vector<1x1x32xf32> to vector<1x32xf32>
    %58 = vector.broadcast %57 : vector<1x32xf32> to vector<8x32xf32>
    %59 = arith.addf %55, %58 : vector<8x32xf32>
    %60 = arith.addf %2, %59 : vector<8x32xf32>
    %c0_22 = arith.constant 0 : index
    %c0_23 = arith.constant 0 : index
    %c0_24 = arith.constant 0 : index
    %61 = vector.load %arg6[%c0_22, %c0_23, %c0_24] : memref<2x1x32xf32, #tpu.memory_space<vmem>>, vector<1x1x32xf32>
    %62 = vector.shape_cast %61 : vector<1x1x32xf32> to vector<1x32xf32>
    %c0_25 = arith.constant 0 : index
    %c0_26 = arith.constant 0 : index
    %c0_27 = arith.constant 0 : index
    %63 = vector.load %arg7[%c0_25, %c0_26, %c0_27] : memref<2x1x32xf32, #tpu.memory_space<vmem>>, vector<1x1x32xf32>
    %64 = vector.shape_cast %63 : vector<1x1x32xf32> to vector<1x32xf32>
    %cst_28 = arith.constant dense<0.000000e+00> : vector<8xf32>
    %65 = vector.multi_reduction <add>, %60, %cst_28 [1] : vector<8x32xf32> to vector<8xf32>
    %66 = vector.shape_cast %65 : vector<8xf32> to vector<8x1xf32>
    %cst_29 = arith.constant 3.200000e+01 : f32
    %67 = vector.broadcast %cst_29 : f32 to vector<8x1xf32>
    %68 = arith.divf %66, %67 : vector<8x1xf32>
    %69 = vector.broadcast %68 : vector<8x1xf32> to vector<8x32xf32>
    %70 = arith.subf %60, %69 : vector<8x32xf32>
    %71 = arith.mulf %70, %70 : vector<8x32xf32>
    %cst_30 = arith.constant dense<0.000000e+00> : vector<8xf32>
    %72 = vector.multi_reduction <add>, %71, %cst_30 [1] : vector<8x32xf32> to vector<8xf32>
    %73 = vector.shape_cast %72 : vector<8xf32> to vector<8x1xf32>
    %cst_31 = arith.constant 3.200000e+01 : f32
    %74 = vector.broadcast %cst_31 : f32 to vector<8x1xf32>
    %75 = arith.divf %73, %74 : vector<8x1xf32>
    %76 = vector.broadcast %68 : vector<8x1xf32> to vector<8x32xf32>
    %77 = arith.subf %60, %76 : vector<8x32xf32>
    %cst_32 = arith.constant 9.99999974E-6 : f32
    %78 = vector.broadcast %cst_32 : f32 to vector<8x1xf32>
    %79 = arith.addf %75, %78 : vector<8x1xf32>
    %80 = math.rsqrt %79 : vector<8x1xf32>
    %81 = vector.broadcast %80 : vector<8x1xf32> to vector<8x32xf32>
    %82 = arith.mulf %77, %81 : vector<8x32xf32>
    %83 = vector.broadcast %62 : vector<1x32xf32> to vector<8x32xf32>
    %84 = arith.mulf %82, %83 : vector<8x32xf32>
    %85 = vector.broadcast %64 : vector<1x32xf32> to vector<8x32xf32>
    %86 = arith.addf %84, %85 : vector<8x32xf32>
    %87 = arith.truncf %86 : vector<8x32xf32> to vector<8x32xbf16>
    %c0_33 = arith.constant 0 : index
    %c0_34 = arith.constant 0 : index
    %c0_35 = arith.constant 0 : index
    %88 = vector.load %arg8[%c0_33, %c0_34, %c0_35] : memref<2x32x64xbf16, #tpu.memory_space<vmem>>, vector<1x32x64xbf16>
    %89 = vector.shape_cast %88 : vector<1x32x64xbf16> to vector<32x64xbf16>
    %cst_36 = arith.constant dense<0.000000e+00> : vector<8x64xf32>
    %90 = tpu.matmul %87, %89, %cst_36 {dimension_numbers = #tpu.dot_dimension_numbers<[1], [0], [0], [1], [0, 0, 1, 1], [], []>} : vector<8x32xbf16>, vector<32x64xbf16>, vector<8x64xf32> -> vector<8x64xf32>
    %c0_37 = arith.constant 0 : index
    %c0_38 = arith.constant 0 : index
    %c0_39 = arith.constant 0 : index
    %91 = vector.load %arg9[%c0_37, %c0_38, %c0_39] : memref<2x1x64xf32, #tpu.memory_space<vmem>>, vector<1x1x64xf32>
    %92 = vector.shape_cast %91 : vector<1x1x64xf32> to vector<1x64xf32>
    %93 = vector.broadcast %92 : vector<1x64xf32> to vector<8x64xf32>
    %94 = arith.addf %90, %93 : vector<8x64xf32>
    %cst_40 = arith.constant 0.000000e+00 : f32
    %95 = vector.broadcast %cst_40 : f32 to vector<8x64xf32>
    %96 = arith.maximumf %94, %95 : vector<8x64xf32>
    %97 = arith.truncf %96 : vector<8x64xf32> to vector<8x64xbf16>
    %c0_41 = arith.constant 0 : index
    %c0_42 = arith.constant 0 : index
    %c0_43 = arith.constant 0 : index
    %98 = vector.load %arg10[%c0_41, %c0_42, %c0_43] : memref<2x64x32xbf16, #tpu.memory_space<vmem>>, vector<1x64x32xbf16>
    %99 = vector.shape_cast %98 : vector<1x64x32xbf16> to vector<64x32xbf16>
    %cst_44 = arith.constant dense<0.000000e+00> : vector<8x32xf32>
    %100 = tpu.matmul %97, %99, %cst_44 {dimension_numbers = #tpu.dot_dimension_numbers<[1], [0], [0], [1], [0, 0, 1, 1], [], []>} : vector<8x64xbf16>, vector<64x32xbf16>, vector<8x32xf32> -> vector<8x32xf32>
    %c0_45 = arith.constant 0 : index
    %c0_46 = arith.constant 0 : index
    %c0_47 = arith.constant 0 : index
    %101 = vector.load %arg11[%c0_45, %c0_46, %c0_47] : memref<2x1x32xf32, #tpu.memory_space<vmem>>, vector<1x1x32xf32>
    %102 = vector.shape_cast %101 : vector<1x1x32xf32> to vector<1x32xf32>
    %103 = vector.broadcast %102 : vector<1x32xf32> to vector<8x32xf32>
    %104 = arith.addf %100, %103 : vector<8x32xf32>
    %105 = arith.addf %86, %104 : vector<8x32xf32>
    %c0_48 = arith.constant 0 : index
    %c0_49 = arith.constant 0 : index
    %c0_50 = arith.constant 0 : index
    %106 = vector.load %arg12[%c0_48, %c0_49, %c0_50] : memref<2x1x32xf32, #tpu.memory_space<vmem>>, vector<1x1x32xf32>
    %107 = vector.shape_cast %106 : vector<1x1x32xf32> to vector<1x32xf32>
    %c0_51 = arith.constant 0 : index
    %c0_52 = arith.constant 0 : index
    %c0_53 = arith.constant 0 : index
    %108 = vector.load %arg13[%c0_51, %c0_52, %c0_53] : memref<2x1x32xf32, #tpu.memory_space<vmem>>, vector<1x1x32xf32>
    %109 = vector.shape_cast %108 : vector<1x1x32xf32> to vector<1x32xf32>
    %cst_54 = arith.constant dense<0.000000e+00> : vector<8xf32>
    %110 = vector.multi_reduction <add>, %105, %cst_54 [1] : vector<8x32xf32> to vector<8xf32>
    %111 = vector.shape_cast %110 : vector<8xf32> to vector<8x1xf32>
    %cst_55 = arith.constant 3.200000e+01 : f32
    %112 = vector.broadcast %cst_55 : f32 to vector<8x1xf32>
    %113 = arith.divf %111, %112 : vector<8x1xf32>
    %114 = vector.broadcast %113 : vector<8x1xf32> to vector<8x32xf32>
    %115 = arith.subf %105, %114 : vector<8x32xf32>
    %116 = arith.mulf %115, %115 : vector<8x32xf32>
    %cst_56 = arith.constant dense<0.000000e+00> : vector<8xf32>
    %117 = vector.multi_reduction <add>, %116, %cst_56 [1] : vector<8x32xf32> to vector<8xf32>
    %118 = vector.shape_cast %117 : vector<8xf32> to vector<8x1xf32>
    %cst_57 = arith.constant 3.200000e+01 : f32
    %119 = vector.broadcast %cst_57 : f32 to vector<8x1xf32>
    %120 = arith.divf %118, %119 : vector<8x1xf32>
    %121 = vector.broadcast %113 : vector<8x1xf32> to vector<8x32xf32>
    %122 = arith.subf %105, %121 : vector<8x32xf32>
    %cst_58 = arith.constant 9.99999974E-6 : f32
    %123 = vector.broadcast %cst_58 : f32 to vector<8x1xf32>
    %124 = arith.addf %120, %123 : vector<8x1xf32>
    %125 = math.rsqrt %124 : vector<8x1xf32>
    %126 = vector.broadcast %125 : vector<8x1xf32> to vector<8x32xf32>
    %127 = arith.mulf %122, %126 : vector<8x32xf32>
    %128 = vector.broadcast %107 : vector<1x32xf32> to vector<8x32xf32>
    %129 = arith.mulf %127, %128 : vector<8x32xf32>
    %130 = vector.broadcast %109 : vector<1x32xf32> to vector<8x32xf32>
    %131 = arith.addf %129, %130 : vector<8x32xf32>
    %132 = arith.truncf %131 : vector<8x32xf32> to vector<8x32xbf16>
    %c1 = arith.constant 1 : index
    %c0_59 = arith.constant 0 : index
    %c0_60 = arith.constant 0 : index
    %133 = vector.load %arg2[%c1, %c0_59, %c0_60] : memref<2x32x96xbf16, #tpu.memory_space<vmem>>, vector<1x32x96xbf16>
    %134 = vector.shape_cast %133 : vector<1x32x96xbf16> to vector<32x96xbf16>
    %cst_61 = arith.constant dense<0.000000e+00> : vector<8x96xf32>
    %135 = tpu.matmul %132, %134, %cst_61 {dimension_numbers = #tpu.dot_dimension_numbers<[1], [0], [0], [1], [0, 0, 1, 1], [], []>} : vector<8x32xbf16>, vector<32x96xbf16>, vector<8x96xf32> -> vector<8x96xf32>
    %c1_62 = arith.constant 1 : index
    %c0_63 = arith.constant 0 : index
    %c0_64 = arith.constant 0 : index
    %136 = vector.load %arg3[%c1_62, %c0_63, %c0_64] : memref<2x1x96xf32, #tpu.memory_space<vmem>>, vector<1x1x96xf32>
    %137 = vector.shape_cast %136 : vector<1x1x96xf32> to vector<1x96xf32>
    %138 = vector.broadcast %137 : vector<1x96xf32> to vector<8x96xf32>
    %139 = arith.addf %135, %138 : vector<8x96xf32>
    %140 = vector.extract_strided_slice %139 {offsets = [0, 0], sizes = [8, 32], strides = [1, 1]} : vector<8x96xf32> to vector<8x32xf32>
    %cst_65 = arith.constant 0.353553385 : f32
    %141 = vector.broadcast %cst_65 : f32 to vector<8x32xf32>
    %142 = arith.mulf %140, %141 : vector<8x32xf32>
    %143 = vector.extract_strided_slice %139 {offsets = [0, 32], sizes = [8, 32], strides = [1, 1]} : vector<8x96xf32> to vector<8x32xf32>
    %144 = vector.extract_strided_slice %139 {offsets = [0, 64], sizes = [8, 32], strides = [1, 1]} : vector<8x96xf32> to vector<8x32xf32>
    %145 = vector.shape_cast %142 : vector<8x32xf32> to vector<1x8x4x8xf32>
    %146 = tpu.transpose %145, [0, 2, 1, 3] : vector<1x8x4x8xf32> -> vector<1x4x8x8xf32>
    %147 = vector.shape_cast %146 : vector<1x4x8x8xf32> to vector<4x8x8xf32>
    %148 = arith.truncf %147 : vector<4x8x8xf32> to vector<4x8x8xbf16>
    %149 = vector.shape_cast %143 : vector<8x32xf32> to vector<1x8x4x8xf32>
    %150 = tpu.transpose %149, [0, 2, 1, 3] : vector<1x8x4x8xf32> -> vector<1x4x8x8xf32>
    %151 = vector.shape_cast %150 : vector<1x4x8x8xf32> to vector<4x8x8xf32>
    %152 = arith.truncf %151 : vector<4x8x8xf32> to vector<4x8x8xbf16>
    %153 = vector.shape_cast %144 : vector<8x32xf32> to vector<1x8x4x8xf32>
    %154 = tpu.transpose %153, [0, 2, 1, 3] : vector<1x8x4x8xf32> -> vector<1x4x8x8xf32>
    %155 = vector.shape_cast %154 : vector<1x4x8x8xf32> to vector<4x8x8xf32>
    %156 = arith.truncf %155 : vector<4x8x8xf32> to vector<4x8x8xbf16>
    "tpu.trace_start"() <{level = 10 : i32, message = "bqd,bkd->bqk"}> : () -> ()
    %cst_66 = arith.constant dense<0.000000e+00> : vector<4x8x8xf32>
    %157 = tpu.matmul %148, %152, %cst_66 {dimension_numbers = #tpu.dot_dimension_numbers<[2], [2], [1], [1], [0, 0, 0, 1, 1, 1], [0], [0]>} : vector<4x8x8xbf16>, vector<4x8x8xbf16>, vector<4x8x8xf32> -> vector<4x8x8xf32>
    "tpu.trace_stop"() : () -> ()
    %158 = vector.broadcast %9 : vector<1x8x8xf32> to vector<4x8x8xf32>
    %159 = arith.addf %157, %158 : vector<4x8x8xf32>
    %cst_67 = arith.constant dense<0xFF800000> : vector<4x8xf32>
    %160 = vector.multi_reduction <maximumf>, %159, %cst_67 [2] : vector<4x8x8xf32> to vector<4x8xf32>
    %161 = vector.shape_cast %160 : vector<4x8xf32> to vector<4x8x1xf32>
    %162 = vector.broadcast %161 : vector<4x8x1xf32> to vector<4x8x8xf32>
    %163 = arith.subf %159, %162 : vector<4x8x8xf32>
    %164 = math.exp %163 : vector<4x8x8xf32>
    %cst_68 = arith.constant dense<0.000000e+00> : vector<4x8xf32>
    %165 = vector.multi_reduction <add>, %164, %cst_68 [2] : vector<4x8x8xf32> to vector<4x8xf32>
    %166 = vector.shape_cast %165 : vector<4x8xf32> to vector<4x8x1xf32>
    %167 = vector.broadcast %166 : vector<4x8x1xf32> to vector<4x8x8xf32>
    %168 = arith.divf %164, %167 : vector<4x8x8xf32>
    %169 = arith.truncf %168 : vector<4x8x8xf32> to vector<4x8x8xbf16>
    "tpu.trace_start"() <{level = 10 : i32, message = "bqk,bkd->bqd"}> : () -> ()
    %cst_69 = arith.constant dense<0.000000e+00> : vector<4x8x8xf32>
    %170 = tpu.matmul %169, %156, %cst_69 {dimension_numbers = #tpu.dot_dimension_numbers<[2], [1], [1], [2], [0, 0, 0, 1, 1, 2], [0], [0]>} : vector<4x8x8xbf16>, vector<4x8x8xbf16>, vector<4x8x8xf32> -> vector<4x8x8xf32>
    "tpu.trace_stop"() : () -> ()
    %171 = vector.shape_cast %170 : vector<4x8x8xf32> to vector<1x4x8x8xf32>
    %172 = tpu.transpose %171, [0, 2, 1, 3] : vector<1x4x8x8xf32> -> vector<1x8x4x8xf32>
    %173 = vector.shape_cast %172 : vector<1x8x4x8xf32> to vector<8x32xf32>
    %174 = arith.truncf %173 : vector<8x32xf32> to vector<8x32xbf16>
    %c1_70 = arith.constant 1 : index
    %c0_71 = arith.constant 0 : index
    %c0_72 = arith.constant 0 : index
    %175 = vector.load %arg4[%c1_70, %c0_71, %c0_72] : memref<2x32x32xbf16, #tpu.memory_space<vmem>>, vector<1x32x32xbf16>
    %176 = vector.shape_cast %175 : vector<1x32x32xbf16> to vector<32x32xbf16>
    %cst_73 = arith.constant dense<0.000000e+00> : vector<8x32xf32>
    %177 = tpu.matmul %174, %176, %cst_73 {dimension_numbers = #tpu.dot_dimension_numbers<[1], [0], [0], [1], [0, 0, 1, 1], [], []>} : vector<8x32xbf16>, vector<32x32xbf16>, vector<8x32xf32> -> vector<8x32xf32>
    %c1_74 = arith.constant 1 : index
    %c0_75 = arith.constant 0 : index
    %c0_76 = arith.constant 0 : index
    %178 = vector.load %arg5[%c1_74, %c0_75, %c0_76] : memref<2x1x32xf32, #tpu.memory_space<vmem>>, vector<1x1x32xf32>
    %179 = vector.shape_cast %178 : vector<1x1x32xf32> to vector<1x32xf32>
    %180 = vector.broadcast %179 : vector<1x32xf32> to vector<8x32xf32>
    %181 = arith.addf %177, %180 : vector<8x32xf32>
    %182 = arith.addf %131, %181 : vector<8x32xf32>
    %c1_77 = arith.constant 1 : index
    %c0_78 = arith.constant 0 : index
    %c0_79 = arith.constant 0 : index
    %183 = vector.load %arg6[%c1_77, %c0_78, %c0_79] : memref<2x1x32xf32, #tpu.memory_space<vmem>>, vector<1x1x32xf32>
    %184 = vector.shape_cast %183 : vector<1x1x32xf32> to vector<1x32xf32>
    %c1_80 = arith.constant 1 : index
    %c0_81 = arith.constant 0 : index
    %c0_82 = arith.constant 0 : index
    %185 = vector.load %arg7[%c1_80, %c0_81, %c0_82] : memref<2x1x32xf32, #tpu.memory_space<vmem>>, vector<1x1x32xf32>
    %186 = vector.shape_cast %185 : vector<1x1x32xf32> to vector<1x32xf32>
    %cst_83 = arith.constant dense<0.000000e+00> : vector<8xf32>
    %187 = vector.multi_reduction <add>, %182, %cst_83 [1] : vector<8x32xf32> to vector<8xf32>
    %188 = vector.shape_cast %187 : vector<8xf32> to vector<8x1xf32>
    %cst_84 = arith.constant 3.200000e+01 : f32
    %189 = vector.broadcast %cst_84 : f32 to vector<8x1xf32>
    %190 = arith.divf %188, %189 : vector<8x1xf32>
    %191 = vector.broadcast %190 : vector<8x1xf32> to vector<8x32xf32>
    %192 = arith.subf %182, %191 : vector<8x32xf32>
    %193 = arith.mulf %192, %192 : vector<8x32xf32>
    %cst_85 = arith.constant dense<0.000000e+00> : vector<8xf32>
    %194 = vector.multi_reduction <add>, %193, %cst_85 [1] : vector<8x32xf32> to vector<8xf32>
    %195 = vector.shape_cast %194 : vector<8xf32> to vector<8x1xf32>
    %cst_86 = arith.constant 3.200000e+01 : f32
    %196 = vector.broadcast %cst_86 : f32 to vector<8x1xf32>
    %197 = arith.divf %195, %196 : vector<8x1xf32>
    %198 = vector.broadcast %190 : vector<8x1xf32> to vector<8x32xf32>
    %199 = arith.subf %182, %198 : vector<8x32xf32>
    %cst_87 = arith.constant 9.99999974E-6 : f32
    %200 = vector.broadcast %cst_87 : f32 to vector<8x1xf32>
    %201 = arith.addf %197, %200 : vector<8x1xf32>
    %202 = math.rsqrt %201 : vector<8x1xf32>
    %203 = vector.broadcast %202 : vector<8x1xf32> to vector<8x32xf32>
    %204 = arith.mulf %199, %203 : vector<8x32xf32>
    %205 = vector.broadcast %184 : vector<1x32xf32> to vector<8x32xf32>
    %206 = arith.mulf %204, %205 : vector<8x32xf32>
    %207 = vector.broadcast %186 : vector<1x32xf32> to vector<8x32xf32>
    %208 = arith.addf %206, %207 : vector<8x32xf32>
    %209 = arith.truncf %208 : vector<8x32xf32> to vector<8x32xbf16>
    %c1_88 = arith.constant 1 : index
    %c0_89 = arith.constant 0 : index
    %c0_90 = arith.constant 0 : index
    %210 = vector.load %arg8[%c1_88, %c0_89, %c0_90] : memref<2x32x64xbf16, #tpu.memory_space<vmem>>, vector<1x32x64xbf16>
    %211 = vector.shape_cast %210 : vector<1x32x64xbf16> to vector<32x64xbf16>
    %cst_91 = arith.constant dense<0.000000e+00> : vector<8x64xf32>
    %212 = tpu.matmul %209, %211, %cst_91 {dimension_numbers = #tpu.dot_dimension_numbers<[1], [0], [0], [1], [0, 0, 1, 1], [], []>} : vector<8x32xbf16>, vector<32x64xbf16>, vector<8x64xf32> -> vector<8x64xf32>
    %c1_92 = arith.constant 1 : index
    %c0_93 = arith.constant 0 : index
    %c0_94 = arith.constant 0 : index
    %213 = vector.load %arg9[%c1_92, %c0_93, %c0_94] : memref<2x1x64xf32, #tpu.memory_space<vmem>>, vector<1x1x64xf32>
    %214 = vector.shape_cast %213 : vector<1x1x64xf32> to vector<1x64xf32>
    %215 = vector.broadcast %214 : vector<1x64xf32> to vector<8x64xf32>
    %216 = arith.addf %212, %215 : vector<8x64xf32>
    %cst_95 = arith.constant 0.000000e+00 : f32
    %217 = vector.broadcast %cst_95 : f32 to vector<8x64xf32>
    %218 = arith.maximumf %216, %217 : vector<8x64xf32>
    %219 = arith.truncf %218 : vector<8x64xf32> to vector<8x64xbf16>
    %c1_96 = arith.constant 1 : index
    %c0_97 = arith.constant 0 : index
    %c0_98 = arith.constant 0 : index
    %220 = vector.load %arg10[%c1_96, %c0_97, %c0_98] : memref<2x64x32xbf16, #tpu.memory_space<vmem>>, vector<1x64x32xbf16>
    %221 = vector.shape_cast %220 : vector<1x64x32xbf16> to vector<64x32xbf16>
    %cst_99 = arith.constant dense<0.000000e+00> : vector<8x32xf32>
    %222 = tpu.matmul %219, %221, %cst_99 {dimension_numbers = #tpu.dot_dimension_numbers<[1], [0], [0], [1], [0, 0, 1, 1], [], []>} : vector<8x64xbf16>, vector<64x32xbf16>, vector<8x32xf32> -> vector<8x32xf32>
    %c1_100 = arith.constant 1 : index
    %c0_101 = arith.constant 0 : index
    %c0_102 = arith.constant 0 : index
    %223 = vector.load %arg11[%c1_100, %c0_101, %c0_102] : memref<2x1x32xf32, #tpu.memory_space<vmem>>, vector<1x1x32xf32>
    %224 = vector.shape_cast %223 : vector<1x1x32xf32> to vector<1x32xf32>
    %225 = vector.broadcast %224 : vector<1x32xf32> to vector<8x32xf32>
    %226 = arith.addf %222, %225 : vector<8x32xf32>
    %227 = arith.addf %208, %226 : vector<8x32xf32>
    %c1_103 = arith.constant 1 : index
    %c0_104 = arith.constant 0 : index
    %c0_105 = arith.constant 0 : index
    %228 = vector.load %arg12[%c1_103, %c0_104, %c0_105] : memref<2x1x32xf32, #tpu.memory_space<vmem>>, vector<1x1x32xf32>
    %229 = vector.shape_cast %228 : vector<1x1x32xf32> to vector<1x32xf32>
    %c1_106 = arith.constant 1 : index
    %c0_107 = arith.constant 0 : index
    %c0_108 = arith.constant 0 : index
    %230 = vector.load %arg13[%c1_106, %c0_107, %c0_108] : memref<2x1x32xf32, #tpu.memory_space<vmem>>, vector<1x1x32xf32>
    %231 = vector.shape_cast %230 : vector<1x1x32xf32> to vector<1x32xf32>
    %cst_109 = arith.constant dense<0.000000e+00> : vector<8xf32>
    %232 = vector.multi_reduction <add>, %227, %cst_109 [1] : vector<8x32xf32> to vector<8xf32>
    %233 = vector.shape_cast %232 : vector<8xf32> to vector<8x1xf32>
    %cst_110 = arith.constant 3.200000e+01 : f32
    %234 = vector.broadcast %cst_110 : f32 to vector<8x1xf32>
    %235 = arith.divf %233, %234 : vector<8x1xf32>
    %236 = vector.broadcast %235 : vector<8x1xf32> to vector<8x32xf32>
    %237 = arith.subf %227, %236 : vector<8x32xf32>
    %238 = arith.mulf %237, %237 : vector<8x32xf32>
    %cst_111 = arith.constant dense<0.000000e+00> : vector<8xf32>
    %239 = vector.multi_reduction <add>, %238, %cst_111 [1] : vector<8x32xf32> to vector<8xf32>
    %240 = vector.shape_cast %239 : vector<8xf32> to vector<8x1xf32>
    %cst_112 = arith.constant 3.200000e+01 : f32
    %241 = vector.broadcast %cst_112 : f32 to vector<8x1xf32>
    %242 = arith.divf %240, %241 : vector<8x1xf32>
    %243 = vector.broadcast %235 : vector<8x1xf32> to vector<8x32xf32>
    %244 = arith.subf %227, %243 : vector<8x32xf32>
    %cst_113 = arith.constant 9.99999974E-6 : f32
    %245 = vector.broadcast %cst_113 : f32 to vector<8x1xf32>
    %246 = arith.addf %242, %245 : vector<8x1xf32>
    %247 = math.rsqrt %246 : vector<8x1xf32>
    %248 = vector.broadcast %247 : vector<8x1xf32> to vector<8x32xf32>
    %249 = arith.mulf %244, %248 : vector<8x32xf32>
    %250 = vector.broadcast %229 : vector<1x32xf32> to vector<8x32xf32>
    %251 = arith.mulf %249, %250 : vector<8x32xf32>
    %252 = vector.broadcast %231 : vector<1x32xf32> to vector<8x32xf32>
    %253 = arith.addf %251, %252 : vector<8x32xf32>
    %254 = arith.truncf %253 : vector<8x32xf32> to vector<8x32xbf16>
    %c0_114 = arith.constant 0 : index
    %c0_115 = arith.constant 0 : index
    %255 = vector.load %arg14[%c0_114, %c0_115] : memref<32x128xbf16, #tpu.memory_space<vmem>>, vector<32x128xbf16>
    %cst_116 = arith.constant dense<0.000000e+00> : vector<8x128xf32>
    %256 = tpu.matmul %254, %255, %cst_116 {dimension_numbers = #tpu.dot_dimension_numbers<[1], [0], [0], [1], [0, 0, 1, 1], [], []>} : vector<8x32xbf16>, vector<32x128xbf16>, vector<8x128xf32> -> vector<8x128xf32>
    %c0_117 = arith.constant 0 : index
    %c0_118 = arith.constant 0 : index
    %257 = vector.load %arg15[%c0_117, %c0_118] : memref<1x128xf32, #tpu.memory_space<vmem>>, vector<1x128xf32>
    %258 = vector.broadcast %257 : vector<1x128xf32> to vector<8x128xf32>
    %259 = arith.addf %256, %258 : vector<8x128xf32>
    %260 = vector.shape_cast %259 : vector<8x128xf32> to vector<1x8x128xf32>
    %261 = arith.truncf %260 : vector<1x8x128xf32> to vector<1x8x128xbf16>
    %c0_119 = arith.constant 0 : index
    %c0_120 = arith.constant 0 : index
    %c0_121 = arith.constant 0 : index
    %262 = vector.load %arg16[%c0_119, %c0_120, %c0_121] : memref<1x8x128xbf16, #tpu.memory_space<vmem>>, vector<1x8x128xbf16>
    tpu.vector_store %arg16[%c0_119, %c0_120, %c0_121], %261 {strides = array<i32>} : memref<1x8x128xbf16, #tpu.memory_space<vmem>>, vector<1x8x128xbf16>,
    return
  }
  func.func @transform_0(%arg0: i32) -> (i32, i32, i32) {
    %c0_i32 = arith.constant 0 : i32
    %c0_i32_0 = arith.constant 0 : i32
    %c0_i32_1 = arith.constant 0 : i32
    return %arg0, %c0_i32, %c0_i32_0 : i32, i32, i32
  }
  func.func @transform_1(%arg0: i32) -> (i32, i32, i32) {
    %c0_i32 = arith.constant 0 : i32
    %c0_i32_0 = arith.constant 0 : i32
    %c0_i32_1 = arith.constant 0 : i32
    %c0_i32_2 = arith.constant 0 : i32
    return %c0_i32, %c0_i32_0, %c0_i32_1 : i32, i32, i32
  }
  func.func @transform_2(%arg0: i32) -> (i32, i32, i32) {
    %c0_i32 = arith.constant 0 : i32
    %c0_i32_0 = arith.constant 0 : i32
    %c0_i32_1 = arith.constant 0 : i32
    %c0_i32_2 = arith.constant 0 : i32
    return %c0_i32, %c0_i32_0, %c0_i32_1 : i32, i32, i32
  }
  func.func @transform_3(%arg0: i32) -> (i32, i32, i32) {
    %c0_i32 = arith.constant 0 : i32
    %c0_i32_0 = arith.constant 0 : i32
    %c0_i32_1 = arith.constant 0 : i32
    %c0_i32_2 = arith.constant 0 : i32
    return %c0_i32, %c0_i32_0, %c0_i32_1 : i32, i32, i32
  }
  func.func @transform_4(%arg0: i32) -> (i32, i32, i32) {
    %c0_i32 = arith.constant 0 : i32
    %c0_i32_0 = arith.constant 0 : i32
    %c0_i32_1 = arith.constant 0 : i32
    %c0_i32_2 = arith.constant 0 : i32
    return %c0_i32, %c0_i32_0, %c0_i32_1 : i32, i32, i32
  }
  func.func @transform_5(%arg0: i32) -> (i32, i32, i32) {
    %c0_i32 = arith.constant 0 : i32
    %c0_i32_0 = arith.constant 0 : i32
    %c0_i32_1 = arith.constant 0 : i32
    %c0_i32_2 = arith.constant 0 : i32
    return %c0_i32, %c0_i32_0, %c0_i32_1 : i32, i32, i32
  }
  func.func @transform_6(%arg0: i32) -> (i32, i32, i32) {
    %c0_i32 = arith.constant 0 : i32
    %c0_i32_0 = arith.constant 0 : i32
    %c0_i32_1 = arith.constant 0 : i32
    %c0_i32_2 = arith.constant 0 : i32
    return %c0_i32, %c0_i32_0, %c0_i32_1 : i32, i32, i32
  }
  func.func @transform_7(%arg0: i32) -> (i32, i32, i32) {
    %c0_i32 = arith.constant 0 : i32
    %c0_i32_0 = arith.constant 0 : i32
    %c0_i32_1 = arith.constant 0 : i32
    %c0_i32_2 = arith.constant 0 : i32
    return %c0_i32, %c0_i32_0, %c0_i32_1 : i32, i32, i32
  }
  func.func @transform_8(%arg0: i32) -> (i32, i32, i32) {
    %c0_i32 = arith.constant 0 : i32
    %c0_i32_0 = arith.constant 0 : i32
    %c0_i32_1 = arith.constant 0 : i32
    %c0_i32_2 = arith.constant 0 : i32
    return %c0_i32, %c0_i32_0, %c0_i32_1 : i32, i32, i32
  }
  func.func @transform_9(%arg0: i32) -> (i32, i32, i32) {
    %c0_i32 = arith.constant 0 : i32
    %c0_i32_0 = arith.constant 0 : i32
    %c0_i32_1 = arith.constant 0 : i32
    %c0_i32_2 = arith.constant 0 : i32
    return %c0_i32, %c0_i32_0, %c0_i32_1 : i32, i32, i32
  }
  func.func @transform_10(%arg0: i32) -> (i32, i32, i32) {
    %c0_i32 = arith.constant 0 : i32
    %c0_i32_0 = arith.constant 0 : i32
    %c0_i32_1 = arith.constant 0 : i32
    %c0_i32_2 = arith.constant 0 : i32
    return %c0_i32, %c0_i32_0, %c0_i32_1 : i32, i32, i32
  }
  func.func @transform_11(%arg0: i32) -> (i32, i32, i32) {
    %c0_i32 = arith.constant 0 : i32
    %c0_i32_0 = arith.constant 0 : i32
    %c0_i32_1 = arith.constant 0 : i32
    %c0_i32_2 = arith.constant 0 : i32
    return %c0_i32, %c0_i32_0, %c0_i32_1 : i32, i32, i32
  }
  func.func @transform_12(%arg0: i32) -> (i32, i32, i32) {
    %c0_i32 = arith.constant 0 : i32
    %c0_i32_0 = arith.constant 0 : i32
    %c0_i32_1 = arith.constant 0 : i32
    %c0_i32_2 = arith.constant 0 : i32
    return %c0_i32, %c0_i32_0, %c0_i32_1 : i32, i32, i32
  }
  func.func @transform_13(%arg0: i32) -> (i32, i32) {
    %c0_i32 = arith.constant 0 : i32
    %c0_i32_0 = arith.constant 0 : i32
    %c0_i32_1 = arith.constant 0 : i32
    return %c0_i32, %c0_i32_0 : i32, i32
  }
  func.func @transform_14(%arg0: i32) -> (i32, i32) {
    %c0_i32 = arith.constant 0 : i32
    %c0_i32_0 = arith.constant 0 : i32
    %c0_i32_1 = arith.constant 0 : i32
    return %c0_i32, %c0_i32_0 : i32, i32
  }
  func.func @transform_15(%arg0: i32) -> (i32, i32, i32) {
    %c0_i32 = arith.constant 0 : i32
    %c0_i32_0 = arith.constant 0 : i32
    %c0_i32_1 = arith.constant 0 : i32
    return %arg0, %c0_i32, %c0_i32_0 : i32, i32, i32
  }
}

module attributes {stable_mosaic.version = 11 : i64} {
  func.func @fused_transformer_kernel(%arg0: i32, %arg1: memref<1x8x32xbf16, #tpu.memory_space<vmem>>, %arg2: memref<2x32x96xbf16, #tpu.memory_space<vmem>>, %arg3: memref<2x1x96xf32, #tpu.memory_space<vmem>>, %arg4: memref<2x32x32xbf16, #tpu.memory_space<vmem>>, %arg5: memref<2x1x32xf32, #tpu.memory_space<vmem>>, %arg6: memref<2x1x32xf32, #tpu.memory_space<vmem>>, %arg7: memref<2x1x32xf32, #tpu.memory_space<vmem>>, %arg8: memref<2x32x64xbf16, #tpu.memory_space<vmem>>, %arg9: memref<2x1x64xf32, #tpu.memory_space<vmem>>, %arg10: memref<2x64x32xbf16, #tpu.memory_space<vmem>>, %arg11: memref<2x1x32xf32, #tpu.memory_space<vmem>>, %arg12: memref<2x1x32xf32, #tpu.memory_space<vmem>>, %arg13: memref<2x1x32xf32, #tpu.memory_space<vmem>>, %arg14: memref<32x128xbf16, #tpu.memory_space<vmem>>, %arg15: memref<1x128xf32, #tpu.memory_space<vmem>>, %arg16: memref<1x8x128xbf16, #tpu.memory_space<vmem>>) attributes {dimension_semantics = [#tpu.dimension_semantics<parallel>], iteration_bounds = array<i64: 2>, scalar_prefetch = 0 : i64, scratch_operands = 0 : i64, tpu.core_type = #tpu.core_type<tc>, window_params = [{transform_indices = @transform_0, window_bounds = array<i64: 1, 8, 32>}, {pipeline_mode = #tpu.pipeline_mode<synchronous>, transform_indices = @transform_1, window_bounds = array<i64: 2, 32, 96>}, {pipeline_mode = #tpu.pipeline_mode<synchronous>, transform_indices = @transform_2, window_bounds = array<i64: 2, 1, 96>}, {pipeline_mode = #tpu.pipeline_mode<synchronous>, transform_indices = @transform_3, window_bounds = array<i64: 2, 32, 32>}, {pipeline_mode = #tpu.pipeline_mode<synchronous>, transform_indices = @transform_4, window_bounds = array<i64: 2, 1, 32>}, {pipeline_mode = #tpu.pipeline_mode<synchronous>, transform_indices = @transform_5, window_bounds = array<i64: 2, 1, 32>}, {pipeline_mode = #tpu.pipeline_mode<synchronous>, transform_indices = @transform_6, window_bounds = array<i64: 2, 1, 32>}, {pipeline_mode = #tpu.pipeline_mode<synchronous>, transform_indices = @transform_7, window_bounds = array<i64: 2, 32, 64>}, {pipeline_mode = #tpu.pipeline_mode<synchronous>, transform_indices = @transform_8, window_bounds = array<i64: 2, 1, 64>}, {pipeline_mode = #tpu.pipeline_mode<synchronous>, transform_indices = @transform_9, window_bounds = array<i64: 2, 64, 32>}, {pipeline_mode = #tpu.pipeline_mode<synchronous>, transform_indices = @transform_10, window_bounds = array<i64: 2, 1, 32>}, {pipeline_mode = #tpu.pipeline_mode<synchronous>, transform_indices = @transform_11, window_bounds = array<i64: 2, 1, 32>}, {pipeline_mode = #tpu.pipeline_mode<synchronous>, transform_indices = @transform_12, window_bounds = array<i64: 2, 1, 32>}, {pipeline_mode = #tpu.pipeline_mode<synchronous>, transform_indices = @transform_13, window_bounds = array<i64: 32, 128>}, {pipeline_mode = #tpu.pipeline_mode<synchronous>, transform_indices = @transform_14, window_bounds = array<i64: 1, 128>}, {transform_indices = @transform_15, window_bounds = array<i64: 1, 8, 128>}]} {
    %c0 = arith.constant 0 : index
    %c0_0 = arith.constant 0 : index
    %c0_1 = arith.constant 0 : index
    %0 = vector.load %arg1[%c0, %c0_0, %c0_1] : memref<1x8x32xbf16, #tpu.memory_space<vmem>>, vector<1x8x32xbf16>
    %1 = arith.extf %0 : vector<1x8x32xbf16> to vector<1x8x32xf32>
    %2 = vector.shape_cast %1 : vector<1x8x32xf32> to vector<8x32xf32>
    %3 = tpu.iota {dimensions = array<i32: 0>} : vector<8x8xi32>
    %4 = tpu.iota {dimensions = array<i32: 1>} : vector<8x8xi32>
    %5 = arith.cmpi sle, %4, %3 : vector<8x8xi32>
    %cst = arith.constant 0.000000e+00 : f32
    %cst_2 = arith.constant -1.000000e+30 : f32
    %6 = vector.broadcast %cst : f32 to vector<8x8xf32>
    %7 = vector.broadcast %cst_2 : f32 to vector<8x8xf32>
    %8 = arith.select %5, %6, %7 : vector<8x8xi1>, vector<8x8xf32>
    %9 = vector.shape_cast %8 : vector<8x8xf32> to vector<1x8x8xf32>
    %10 = arith.truncf %2 : vector<8x32xf32> to vector<8x32xbf16>
    %c0_3 = arith.constant 0 : index
    %c0_4 = arith.constant 0 : index
    %c0_5 = arith.constant 0 : index
    %11 = vector.load %arg2[%c0_3, %c0_4, %c0_5] : memref<2x32x96xbf16, #tpu.memory_space<vmem>>, vector<1x32x96xbf16>
    %12 = vector.shape_cast %11 : vector<1x32x96xbf16> to vector<32x96xbf16>
    %cst_6 = arith.constant dense<0.000000e+00> : vector<8x96xf32>
    %13 = tpu.matmul %10, %12, %cst_6 {dimension_numbers = #tpu.dot_dimension_numbers<[1], [0], [0], [1], [0, 0, 1, 1], [], []>} : vector<8x32xbf16>, vector<32x96xbf16>, vector<8x96xf32> -> vector<8x96xf32>
    %c0_7 = arith.constant 0 : index
    %c0_8 = arith.constant 0 : index
    %c0_9 = arith.constant 0 : index
    %14 = vector.load %arg3[%c0_7, %c0_8, %c0_9] : memref<2x1x96xf32, #tpu.memory_space<vmem>>, vector<1x1x96xf32>
    %15 = vector.shape_cast %14 : vector<1x1x96xf32> to vector<1x96xf32>
    %16 = vector.broadcast %15 : vector<1x96xf32> to vector<8x96xf32>
    %17 = arith.addf %13, %16 : vector<8x96xf32>
    %18 = vector.extract_strided_slice %17 {offsets = [0, 0], sizes = [8, 32], strides = [1, 1]} : vector<8x96xf32> to vector<8x32xf32>
    %cst_10 = arith.constant 0.353553385 : f32
    %19 = vector.broadcast %cst_10 : f32 to vector<8x32xf32>
    %20 = arith.mulf %18, %19 : vector<8x32xf32>
    %21 = vector.extract_strided_slice %17 {offsets = [0, 32], sizes = [8, 32], strides = [1, 1]} : vector<8x96xf32> to vector<8x32xf32>
    %22 = vector.extract_strided_slice %17 {offsets = [0, 64], sizes = [8, 32], strides = [1, 1]} : vector<8x96xf32> to vector<8x32xf32>
    %23 = vector.shape_cast %20 : vector<8x32xf32> to vector<1x8x4x8xf32>
    %24 = tpu.transpose %23, [0, 2, 1, 3] : vector<1x8x4x8xf32> -> vector<1x4x8x8xf32>
    %25 = vector.shape_cast %24 : vector<1x4x8x8xf32> to vector<4x8x8xf32>
    %26 = arith.truncf %25 : vector<4x8x8xf32> to vector<4x8x8xbf16>
    %27 = vector.shape_cast %21 : vector<8x32xf32> to vector<1x8x4x8xf32>
    %28 = tpu.transpose %27, [0, 2, 1, 3] : vector<1x8x4x8xf32> -> vector<1x4x8x8xf32>
    %29 = vector.shape_cast %28 : vector<1x4x8x8xf32> to vector<4x8x8xf32>
    %30 = arith.truncf %29 : vector<4x8x8xf32> to vector<4x8x8xbf16>
    %31 = vector.shape_cast %22 : vector<8x32xf32> to vector<1x8x4x8xf32>
    %32 = tpu.transpose %31, [0, 2, 1, 3] : vector<1x8x4x8xf32> -> vector<1x4x8x8xf32>
    %33 = vector.shape_cast %32 : vector<1x4x8x8xf32> to vector<4x8x8xf32>
    %34 = arith.truncf %33 : vector<4x8x8xf32> to vector<4x8x8xbf16>
    "tpu.trace_start"() <{level = 10 : i32, message = "bqd,bkd->bqk"}> : () -> ()
    %cst_11 = arith.constant dense<0.000000e+00> : vector<4x8x8xf32>
    %35 = tpu.matmul %26, %30, %cst_11 {dimension_numbers = #tpu.dot_dimension_numbers<[2], [2], [1], [1], [0, 0, 0, 1, 1, 1], [0], [0]>} : vector<4x8x8xbf16>, vector<4x8x8xbf16>, vector<4x8x8xf32> -> vector<4x8x8xf32>
    "tpu.trace_stop"() : () -> ()
    %36 = vector.broadcast %9 : vector<1x8x8xf32> to vector<4x8x8xf32>
    %37 = arith.addf %35, %36 : vector<4x8x8xf32>
    %cst_12 = arith.constant dense<0xFF800000> : vector<4x8xf32>
    %38 = vector.multi_reduction <maximumf>, %37, %cst_12 [2] : vector<4x8x8xf32> to vector<4x8xf32>
    %39 = vector.shape_cast %38 : vector<4x8xf32> to vector<4x8x1xf32>
    %40 = vector.broadcast %39 : vector<4x8x1xf32> to vector<4x8x8xf32>
    %41 = arith.subf %37, %40 : vector<4x8x8xf32>
    %42 = math.exp %41 : vector<4x8x8xf32>
    %cst_13 = arith.constant dense<0.000000e+00> : vector<4x8xf32>
    %43 = vector.multi_reduction <add>, %42, %cst_13 [2] : vector<4x8x8xf32> to vector<4x8xf32>
    %44 = vector.shape_cast %43 : vector<4x8xf32> to vector<4x8x1xf32>
    %45 = vector.broadcast %44 : vector<4x8x1xf32> to vector<4x8x8xf32>
    %46 = arith.divf %42, %45 : vector<4x8x8xf32>
    %47 = arith.truncf %46 : vector<4x8x8xf32> to vector<4x8x8xbf16>
    "tpu.trace_start"() <{level = 10 : i32, message = "bqk,bkd->bqd"}> : () -> ()
    %cst_14 = arith.constant dense<0.000000e+00> : vector<4x8x8xf32>
    %48 = tpu.matmul %47, %34, %cst_14 {dimension_numbers = #tpu.dot_dimension_numbers<[2], [1], [1], [2], [0, 0, 0, 1, 1, 2], [0], [0]>} : vector<4x8x8xbf16>, vector<4x8x8xbf16>, vector<4x8x8xf32> -> vector<4x8x8xf32>
    "tpu.trace_stop"() : () -> ()
    %49 = vector.shape_cast %48 : vector<4x8x8xf32> to vector<1x4x8x8xf32>
    %50 = tpu.transpose %49, [0, 2, 1, 3] : vector<1x4x8x8xf32> -> vector<1x8x4x8xf32>
    %51 = vector.shape_cast %50 : vector<1x8x4x8xf32> to vector<8x32xf32>
    %52 = arith.truncf %51 : vector<8x32xf32> to vector<8x32xbf16>
    %c0_15 = arith.constant 0 : index
    %c0_16 = arith.constant 0 : index
    %c0_17 = arith.constant 0 : index
    %53 = vector.load %arg4[%c0_15, %c0_16, %c0_17] : memref<2x32x32xbf16, #tpu.memory_space<vmem>>, vector<1x32x32xbf16>
    %54 = vector.shape_cast %53 : vector<1x32x32xbf16> to vector<32x32xbf16>
    %cst_18 = arith.constant dense<0.000000e+00> : vector<8x32xf32>
    %55 = tpu.matmul %52, %54, %cst_18 {dimension_numbers = #tpu.dot_dimension_numbers<[1], [0], [0], [1], [0, 0, 1, 1], [], []>} : vector<8x32xbf16>, vector<32x32xbf16>, vector<8x32xf32> -> vector<8x32xf32>
    %c0_19 = arith.constant 0 : index
    %c0_20 = arith.constant 0 : index
    %c0_21 = arith.constant 0 : index
    %56 = vector.load %arg5[%c0_19, %c0_20, %c0_21] : memref<2x1x32xf32, #tpu.memory_space<vmem>>, vector<1x1x32xf32>
    %57 = vector.shape_cast %56 : vector<1x1x32xf32> to vector<1x32xf32>
    %58 = vector.broadcast %57 : vector<1x32xf32> to vector<8x32xf32>
    %59 = arith.addf %55, %58 : vector<8x32xf32>
    %60 = arith.addf %2, %59 : vector<8x32xf32>
    %c0_22 = arith.constant 0 : index
    %c0_23 = arith.constant 0 : index
    %c0_24 = arith.constant 0 : index
    %61 = vector.load %arg6[%c0_22, %c0_23, %c0_24] : memref<2x1x32xf32, #tpu.memory_space<vmem>>, vector<1x1x32xf32>
    %62 = vector.shape_cast %61 : vector<1x1x32xf32> to vector<1x32xf32>
    %c0_25 = arith.constant 0 : index
    %c0_26 = arith.constant 0 : index
    %c0_27 = arith.constant 0 : index
    %63 = vector.load %arg7[%c0_25, %c0_26, %c0_27] : memref<2x1x32xf32, #tpu.memory_space<vmem>>, vector<1x1x32xf32>
    %64 = vector.shape_cast %63 : vector<1x1x32xf32> to vector<1x32xf32>
    %cst_28 = arith.constant dense<0.000000e+00> : vector<8xf32>
    %65 = vector.multi_reduction <add>, %60, %cst_28 [1] : vector<8x32xf32> to vector<8xf32>
    %66 = vector.shape_cast %65 : vector<8xf32> to vector<8x1xf32>
    %cst_29 = arith.constant 3.200000e+01 : f32
    %67 = vector.broadcast %cst_29 : f32 to vector<8x1xf32>
    %68 = arith.divf %66, %67 : vector<8x1xf32>
    %69 = vector.broadcast %68 : vector<8x1xf32> to vector<8x32xf32>
    %70 = arith.subf %60, %69 : vector<8x32xf32>
    %71 = arith.mulf %70, %70 : vector<8x32xf32>
    %cst_30 = arith.constant dense<0.000000e+00> : vector<8xf32>
    %72 = vector.multi_reduction <add>, %71, %cst_30 [1] : vector<8x32xf32> to vector<8xf32>
    %73 = vector.shape_cast %72 : vector<8xf32> to vector<8x1xf32>
    %cst_31 = arith.constant 3.200000e+01 : f32
    %74 = vector.broadcast %cst_31 : f32 to vector<8x1xf32>
    %75 = arith.divf %73, %74 : vector<8x1xf32>
    %76 = vector.broadcast %68 : vector<8x1xf32> to vector<8x32xf32>
    %77 = arith.subf %60, %76 : vector<8x32xf32>
    %cst_32 = arith.constant 9.99999974E-6 : f32
    %78 = vector.broadcast %cst_32 : f32 to vector<8x1xf32>
    %79 = arith.addf %75, %78 : vector<8x1xf32>
    %80 = math.rsqrt %79 : vector<8x1xf32>
    %81 = vector.broadcast %80 : vector<8x1xf32> to vector<8x32xf32>
    %82 = arith.mulf %77, %81 : vector<8x32xf32>
    %83 = vector.broadcast %62 : vector<1x32xf32> to vector<8x32xf32>
    %84 = arith.mulf %82, %83 : vector<8x32xf32>
    %85 = vector.broadcast %64 : vector<1x32xf32> to vector<8x32xf32>
    %86 = arith.addf %84, %85 : vector<8x32xf32>
    %87 = arith.truncf %86 : vector<8x32xf32> to vector<8x32xbf16>
    %c0_33 = arith.constant 0 : index
    %c0_34 = arith.constant 0 : index
    %c0_35 = arith.constant 0 : index
    %88 = vector.load %arg8[%c0_33, %c0_34, %c0_35] : memref<2x32x64xbf16, #tpu.memory_space<vmem>>, vector<1x32x64xbf16>
    %89 = vector.shape_cast %88 : vector<1x32x64xbf16> to vector<32x64xbf16>
    %cst_36 = arith.constant dense<0.000000e+00> : vector<8x64xf32>
    %90 = tpu.matmul %87, %89, %cst_36 {dimension_numbers = #tpu.dot_dimension_numbers<[1], [0], [0], [1], [0, 0, 1, 1], [], []>} : vector<8x32xbf16>, vector<32x64xbf16>, vector<8x64xf32> -> vector<8x64xf32>
    %c0_37 = arith.constant 0 : index
    %c0_38 = arith.constant 0 : index
    %c0_39 = arith.constant 0 : index
    %91 = vector.load %arg9[%c0_37, %c0_38, %c0_39] : memref<2x1x64xf32, #tpu.memory_space<vmem>>, vector<1x1x64xf32>
    %92 = vector.shape_cast %91 : vector<1x1x64xf32> to vector<1x64xf32>
    %93 = vector.broadcast %92 : vector<1x64xf32> to vector<8x64xf32>
    %94 = arith.addf %90, %93 : vector<8x64xf32>
    %cst_40 = arith.constant 0.000000e+00 : f32
    %95 = vector.broadcast %cst_40 : f32 to vector<8x64xf32>
    %96 = arith.maximumf %94, %95 : vector<8x64xf32>
    %97 = arith.truncf %96 : vector<8x64xf32> to vector<8x64xbf16>
    %c0_41 = arith.constant 0 : index
    %c0_42 = arith.constant 0 : index
    %c0_43 = arith.constant 0 : index
    %98 = vector.load %arg10[%c0_41, %c0_42, %c0_43] : memref<2x64x32xbf16, #tpu.memory_space<vmem>>, vector<1x64x32xbf16>
    %99 = vector.shape_cast %98 : vector<1x64x32xbf16> to vector<64x32xbf16>
    %cst_44 = arith.constant dense<0.000000e+00> : vector<8x32xf32>
    %100 = tpu.matmul %97, %99, %cst_44 {dimension_numbers = #tpu.dot_dimension_numbers<[1], [0], [0], [1], [0, 0, 1, 1], [], []>} : vector<8x64xbf16>, vector<64x32xbf16>, vector<8x32xf32> -> vector<8x32xf32>
    %c0_45 = arith.constant 0 : index
    %c0_46 = arith.constant 0 : index
    %c0_47 = arith.constant 0 : index
    %101 = vector.load %arg11[%c0_45, %c0_46, %c0_47] : memref<2x1x32xf32, #tpu.memory_space<vmem>>, vector<1x1x32xf32>
    %102 = vector.shape_cast %101 : vector<1x1x32xf32> to vector<1x32xf32>
    %103 = vector.broadcast %102 : vector<1x32xf32> to vector<8x32xf32>
    %104 = arith.addf %100, %103 : vector<8x32xf32>
    %105 = arith.addf %86, %104 : vector<8x32xf32>
    %c0_48 = arith.constant 0 : index
    %c0_49 = arith.constant 0 : index
    %c0_50 = arith.constant 0 : index
    %106 = vector.load %arg12[%c0_48, %c0_49, %c0_50] : memref<2x1x32xf32, #tpu.memory_space<vmem>>, vector<1x1x32xf32>
    %107 = vector.shape_cast %106 : vector<1x1x32xf32> to vector<1x32xf32>
    %c0_51 = arith.constant 0 : index
    %c0_52 = arith.constant 0 : index
    %c0_53 = arith.constant 0 : index
    %108 = vector.load %arg13[%c0_51, %c0_52, %c0_53] : memref<2x1x32xf32, #tpu.memory_space<vmem>>, vector<1x1x32xf32>
    %109 = vector.shape_cast %108 : vector<1x1x32xf32> to vector<1x32xf32>
    %cst_54 = arith.constant dense<0.000000e+00> : vector<8xf32>
    %110 = vector.multi_reduction <add>, %105, %cst_54 [1] : vector<8x32xf32> to vector<8xf32>
    %111 = vector.shape_cast %110 : vector<8xf32> to vector<8x1xf32>
    %cst_55 = arith.constant 3.200000e+01 : f32
    %112 = vector.broadcast %cst_55 : f32 to vector<8x1xf32>
    %113 = arith.divf %111, %112 : vector<8x1xf32>
    %114 = vector.broadcast %113 : vector<8x1xf32> to vector<8x32xf32>
    %115 = arith.subf %105, %114 : vector<8x32xf32>
    %116 = arith.mulf %115, %115 : vector<8x32xf32>
    %cst_56 = arith.constant dense<0.000000e+00> : vector<8xf32>
    %117 = vector.multi_reduction <add>, %116, %cst_56 [1] : vector<8x32xf32> to vector<8xf32>
    %118 = vector.shape_cast %117 : vector<8xf32> to vector<8x1xf32>
    %cst_57 = arith.constant 3.200000e+01 : f32
    %119 = vector.broadcast %cst_57 : f32 to vector<8x1xf32>
    %120 = arith.divf %118, %119 : vector<8x1xf32>
    %121 = vector.broadcast %113 : vector<8x1xf32> to vector<8x32xf32>
    %122 = arith.subf %105, %121 : vector<8x32xf32>
    %cst_58 = arith.constant 9.99999974E-6 : f32
    %123 = vector.broadcast %cst_58 : f32 to vector<8x1xf32>
    %124 = arith.addf %120, %123 : vector<8x1xf32>
    %125 = math.rsqrt %124 : vector<8x1xf32>
    %126 = vector.broadcast %125 : vector<8x1xf32> to vector<8x32xf32>
    %127 = arith.mulf %122, %126 : vector<8x32xf32>
    %128 = vector.broadcast %107 : vector<1x32xf32> to vector<8x32xf32>
    %129 = arith.mulf %127, %128 : vector<8x32xf32>
    %130 = vector.broadcast %109 : vector<1x32xf32> to vector<8x32xf32>
    %131 = arith.addf %129, %130 : vector<8x32xf32>
    %132 = arith.truncf %131 : vector<8x32xf32> to vector<8x32xbf16>
    %c1 = arith.constant 1 : index
    %c0_59 = arith.constant 0 : index
    %c0_60 = arith.constant 0 : index
    %133 = vector.load %arg2[%c1, %c0_59, %c0_60] : memref<2x32x96xbf16, #tpu.memory_space<vmem>>, vector<1x32x96xbf16>
    %134 = vector.shape_cast %133 : vector<1x32x96xbf16> to vector<32x96xbf16>
    %cst_61 = arith.constant dense<0.000000e+00> : vector<8x96xf32>
    %135 = tpu.matmul %132, %134, %cst_61 {dimension_numbers = #tpu.dot_dimension_numbers<[1], [0], [0], [1], [0, 0, 1, 1], [], []>} : vector<8x32xbf16>, vector<32x96xbf16>, vector<8x96xf32> -> vector<8x96xf32>
    %c1_62 = arith.constant 1 : index
    %c0_63 = arith.constant 0 : index
    %c0_64 = arith.constant 0 : index
    %136 = vector.load %arg3[%c1_62, %c0_63, %c0_64] : memref<2x1x96xf32, #tpu.memory_space<vmem>>, vector<1x1x96xf32>
    %137 = vector.shape_cast %136 : vector<1x1x96xf32> to vector<1x96xf32>
    %138 = vector.broadcast %137 : vector<1x96xf32> to vector<8x96xf32>
    %139 = arith.addf %135, %138 : vector<8x96xf32>
    %140 = vector.extract_strided_slice %139 {offsets = [0, 0], sizes = [8, 32], strides = [1, 1]} : vector<8x96xf32> to vector<8x32xf32>
    %cst_65 = arith.constant 0.353553385 : f32
    %141 = vector.broadcast %cst_65 : f32 to vector<8x32xf32>
    %142 = arith.mulf %140, %141 : vector<8x32xf32>
    %143 = vector.extract_strided_slice %139 {offsets = [0, 32], sizes = [8, 32], strides = [1, 1]} : vector<8x96xf32> to vector<8x32xf32>
    %144 = vector.extract_strided_slice %139 {offsets = [0, 64], sizes = [8, 32], strides = [1, 1]} : vector<8x96xf32> to vector<8x32xf32>
    %145 = vector.shape_cast %142 : vector<8x32xf32> to vector<1x8x4x8xf32>
    %146 = tpu.transpose %145, [0, 2, 1, 3] : vector<1x8x4x8xf32> -> vector<1x4x8x8xf32>
    %147 = vector.shape_cast %146 : vector<1x4x8x8xf32> to vector<4x8x8xf32>
    %148 = arith.truncf %147 : vector<4x8x8xf32> to vector<4x8x8xbf16>
    %149 = vector.shape_cast %143 : vector<8x32xf32> to vector<1x8x4x8xf32>
    %150 = tpu.transpose %149, [0, 2, 1, 3] : vector<1x8x4x8xf32> -> vector<1x4x8x8xf32>
    %151 = vector.shape_cast %150 : vector<1x4x8x8xf32> to vector<4x8x8xf32>
    %152 = arith.truncf %151 : vector<4x8x8xf32> to vector<4x8x8xbf16>
    %153 = vector.shape_cast %144 : vector<8x32xf32> to vector<1x8x4x8xf32>
    %154 = tpu.transpose %153, [0, 2, 1, 3] : vector<1x8x4x8xf32> -> vector<1x4x8x8xf32>
    %155 = vector.shape_cast %154 : vector<1x4x8x8xf32> to vector<4x8x8xf32>
    %156 = arith.truncf %155 : vector<4x8x8xf32> to vector<4x8x8xbf16>
    "tpu.trace_start"() <{level = 10 : i32, message = "bqd,bkd->bqk"}> : () -> ()
    %cst_66 = arith.constant dense<0.000000e+00> : vector<4x8x8xf32>
    %157 = tpu.matmul %148, %152, %cst_66 {dimension_numbers = #tpu.dot_dimension_numbers<[2], [2], [1], [1], [0, 0, 0, 1, 1, 1], [0], [0]>} : vector<4x8x8xbf16>, vector<4x8x8xbf16>, vector<4x8x8xf32> -> vector<4x8x8xf32>
    "tpu.trace_stop"() : () -> ()
    %158 = vector.broadcast %9 : vector<1x8x8xf32> to vector<4x8x8xf32>
    %159 = arith.addf %157, %158 : vector<4x8x8xf32>
    %cst_67 = arith.constant dense<0xFF800000> : vector<4x8xf32>
    %160 = vector.multi_reduction <maximumf>, %159, %cst_67 [2] : vector<4x8x8xf32> to vector<4x8xf32>
    %161 = vector.shape_cast %160 : vector<4x8xf32> to vector<4x8x1xf32>
    %162 = vector.broadcast %161 : vector<4x8x1xf32> to vector<4x8x8xf32>
    %163 = arith.subf %159, %162 : vector<4x8x8xf32>
    %164 = math.exp %163 : vector<4x8x8xf32>
    %cst_68 = arith.constant dense<0.000000e+00> : vector<4x8xf32>
    %165 = vector.multi_reduction <add>, %164, %cst_68 [2] : vector<4x8x8xf32> to vector<4x8xf32>
    %166 = vector.shape_cast %165 : vector<4x8xf32> to vector<4x8x1xf32>
    %167 = vector.broadcast %166 : vector<4x8x1xf32> to vector<4x8x8xf32>
    %168 = arith.divf %164, %167 : vector<4x8x8xf32>
    %169 = arith.truncf %168 : vector<4x8x8xf32> to vector<4x8x8xbf16>
    "tpu.trace_start"() <{level = 10 : i32, message = "bqk,bkd->bqd"}> : () -> ()
    %cst_69 = arith.constant dense<0.000000e+00> : vector<4x8x8xf32>
    %170 = tpu.matmul %169, %156, %cst_69 {dimension_numbers = #tpu.dot_dimension_numbers<[2], [1], [1], [2], [0, 0, 0, 1, 1, 2], [0], [0]>} : vector<4x8x8xbf16>, vector<4x8x8xbf16>, vector<4x8x8xf32> -> vector<4x8x8xf32>
    "tpu.trace_stop"() : () -> ()
    %171 = vector.shape_cast %170 : vector<4x8x8xf32> to vector<1x4x8x8xf32>
    %172 = tpu.transpose %171, [0, 2, 1, 3] : vector<1x4x8x8xf32> -> vector<1x8x4x8xf32>
    %173 = vector.shape_cast %172 : vector<1x8x4x8xf32> to vector<8x32xf32>
    %174 = arith.truncf %173 : vector<8x32xf32> to vector<8x32xbf16>
    %c1_70 = arith.constant 1 : index
    %c0_71 = arith.constant 0 : index
    %c0_72 = arith.constant 0 : index
    %175 = vector.load %arg4[%c1_70, %c0_71, %c0_72] : memref<2x32x32xbf16, #tpu.memory_space<vmem>>, vector<1x32x32xbf16>
    %176 = vector.shape_cast %175 : vector<1x32x32xbf16> to vector<32x32xbf16>
    %cst_73 = arith.constant dense<0.000000e+00> : vector<8x32xf32>
    %177 = tpu.matmul %174, %176, %cst_73 {dimension_numbers = #tpu.dot_dimension_numbers<[1], [0], [0], [1], [0, 0, 1, 1], [], []>} : vector<8x32xbf16>, vector<32x32xbf16>, vector<8x32xf32> -> vector<8x32xf32>
    %c1_74 = arith.constant 1 : index
    %c0_75 = arith.constant 0 : index
    %c0_76 = arith.constant 0 : index
    %178 = vector.load %arg5[%c1_74, %c0_75, %c0_76] : memref<2x1x32xf32, #tpu.memory_space<vmem>>, vector<1x1x32xf32>
    %179 = vector.shape_cast %178 : vector<1x1x32xf32> to vector<1x32xf32>
    %180 = vector.broadcast %179 : vector<1x32xf32> to vector<8x32xf32>
    %181 = arith.addf %177, %180 : vector<8x32xf32>
    %182 = arith.addf %131, %181 : vector<8x32xf32>
    %c1_77 = arith.constant 1 : index
    %c0_78 = arith.constant 0 : index
    %c0_79 = arith.constant 0 : index
    %183 = vector.load %arg6[%c1_77, %c0_78, %c0_79] : memref<2x1x32xf32, #tpu.memory_space<vmem>>, vector<1x1x32xf32>
    %184 = vector.shape_cast %183 : vector<1x1x32xf32> to vector<1x32xf32>
    %c1_80 = arith.constant 1 : index
    %c0_81 = arith.constant 0 : index
    %c0_82 = arith.constant 0 : index
    %185 = vector.load %arg7[%c1_80, %c0_81, %c0_82] : memref<2x1x32xf32, #tpu.memory_space<vmem>>, vector<1x1x32xf32>
    %186 = vector.shape_cast %185 : vector<1x1x32xf32> to vector<1x32xf32>
    %cst_83 = arith.constant dense<0.000000e+00> : vector<8xf32>
    %187 = vector.multi_reduction <add>, %182, %cst_83 [1] : vector<8x32xf32> to vector<8xf32>
    %188 = vector.shape_cast %187 : vector<8xf32> to vector<8x1xf32>
    %cst_84 = arith.constant 3.200000e+01 : f32
    %189 = vector.broadcast %cst_84 : f32 to vector<8x1xf32>
    %190 = arith.divf %188, %189 : vector<8x1xf32>
    %191 = vector.broadcast %190 : vector<8x1xf32> to vector<8x32xf32>
    %192 = arith.subf %182, %191 : vector<8x32xf32>
    %193 = arith.mulf %192, %192 : vector<8x32xf32>
    %cst_85 = arith.constant dense<0.000000e+00> : vector<8xf32>
    %194 = vector.multi_reduction <add>, %193, %cst_85 [1] : vector<8x32xf32> to vector<8xf32>
    %195 = vector.shape_cast %194 : vector<8xf32> to vector<8x1xf32>
    %cst_86 = arith.constant 3.200000e+01 : f32
    %196 = vector.broadcast %cst_86 : f32 to vector<8x1xf32>
    %197 = arith.divf %195, %196 : vector<8x1xf32>
    %198 = vector.broadcast %190 : vector<8x1xf32> to vector<8x32xf32>
    %199 = arith.subf %182, %198 : vector<8x32xf32>
    %cst_87 = arith.constant 9.99999974E-6 : f32
    %200 = vector.broadcast %cst_87 : f32 to vector<8x1xf32>
    %201 = arith.addf %197, %200 : vector<8x1xf32>
    %202 = math.rsqrt %201 : vector<8x1xf32>
    %203 = vector.broadcast %202 : vector<8x1xf32> to vector<8x32xf32>
    %204 = arith.mulf %199, %203 : vector<8x32xf32>
    %205 = vector.broadcast %184 : vector<1x32xf32> to vector<8x32xf32>
    %206 = arith.mulf %204, %205 : vector<8x32xf32>
    %207 = vector.broadcast %186 : vector<1x32xf32> to vector<8x32xf32>
    %208 = arith.addf %206, %207 : vector<8x32xf32>
    %209 = arith.truncf %208 : vector<8x32xf32> to vector<8x32xbf16>
    %c1_88 = arith.constant 1 : index
    %c0_89 = arith.constant 0 : index
    %c0_90 = arith.constant 0 : index
    %210 = vector.load %arg8[%c1_88, %c0_89, %c0_90] : memref<2x32x64xbf16, #tpu.memory_space<vmem>>, vector<1x32x64xbf16>
    %211 = vector.shape_cast %210 : vector<1x32x64xbf16> to vector<32x64xbf16>
    %cst_91 = arith.constant dense<0.000000e+00> : vector<8x64xf32>
    %212 = tpu.matmul %209, %211, %cst_91 {dimension_numbers = #tpu.dot_dimension_numbers<[1], [0], [0], [1], [0, 0, 1, 1], [], []>} : vector<8x32xbf16>, vector<32x64xbf16>, vector<8x64xf32> -> vector<8x64xf32>
    %c1_92 = arith.constant 1 : index
    %c0_93 = arith.constant 0 : index
    %c0_94 = arith.constant 0 : index
    %213 = vector.load %arg9[%c1_92, %c0_93, %c0_94] : memref<2x1x64xf32, #tpu.memory_space<vmem>>, vector<1x1x64xf32>
    %214 = vector.shape_cast %213 : vector<1x1x64xf32> to vector<1x64xf32>
    %215 = vector.broadcast %214 : vector<1x64xf32> to vector<8x64xf32>
    %216 = arith.addf %212, %215 : vector<8x64xf32>
    %cst_95 = arith.constant 0.000000e+00 : f32
    %217 = vector.broadcast %cst_95 : f32 to vector<8x64xf32>
    %218 = arith.maximumf %216, %217 : vector<8x64xf32>
    %219 = arith.truncf %218 : vector<8x64xf32> to vector<8x64xbf16>
    %c1_96 = arith.constant 1 : index
    %c0_97 = arith.constant 0 : index
    %c0_98 = arith.constant 0 : index
    %220 = vector.load %arg10[%c1_96, %c0_97, %c0_98] : memref<2x64x32xbf16, #tpu.memory_space<vmem>>, vector<1x64x32xbf16>
    %221 = vector.shape_cast %220 : vector<1x64x32xbf16> to vector<64x32xbf16>
    %cst_99 = arith.constant dense<0.000000e+00> : vector<8x32xf32>
    %222 = tpu.matmul %219, %221, %cst_99 {dimension_numbers = #tpu.dot_dimension_numbers<[1], [0], [0], [1], [0, 0, 1, 1], [], []>} : vector<8x64xbf16>, vector<64x32xbf16>, vector<8x32xf32> -> vector<8x32xf32>
    %c1_100 = arith.constant 1 : index
    %c0_101 = arith.constant 0 : index
    %c0_102 = arith.constant 0 : index
    %223 = vector.load %arg11[%c1_100, %c0_101, %c0_102] : memref<2x1x32xf32, #tpu.memory_space<vmem>>, vector<1x1x32xf32>
    %224 = vector.shape_cast %223 : vector<1x1x32xf32> to vector<1x32xf32>
    %225 = vector.broadcast %224 : vector<1x32xf32> to vector<8x32xf32>
    %226 = arith.addf %222, %225 : vector<8x32xf32>
    %227 = arith.addf %208, %226 : vector<8x32xf32>
    %c1_103 = arith.constant 1 : index
    %c0_104 = arith.constant 0 : index
    %c0_105 = arith.constant 0 : index
    %228 = vector.load %arg12[%c1_103, %c0_104, %c0_105] : memref<2x1x32xf32, #tpu.memory_space<vmem>>, vector<1x1x32xf32>
    %229 = vector.shape_cast %228 : vector<1x1x32xf32> to vector<1x32xf32>
    %c1_106 = arith.constant 1 : index
    %c0_107 = arith.constant 0 : index
    %c0_108 = arith.constant 0 : index
    %230 = vector.load %arg13[%c1_106, %c0_107, %c0_108] : memref<2x1x32xf32, #tpu.memory_space<vmem>>, vector<1x1x32xf32>
    %231 = vector.shape_cast %230 : vector<1x1x32xf32> to vector<1x32xf32>
    %cst_109 = arith.constant dense<0.000000e+00> : vector<8xf32>
    %232 = vector.multi_reduction <add>, %227, %cst_109 [1] : vector<8x32xf32> to vector<8xf32>
    %233 = vector.shape_cast %232 : vector<8xf32> to vector<8x1xf32>
    %cst_110 = arith.constant 3.200000e+01 : f32
    %234 = vector.broadcast %cst_110 : f32 to vector<8x1xf32>
    %235 = arith.divf %233, %234 : vector<8x1xf32>
    %236 = vector.broadcast %235 : vector<8x1xf32> to vector<8x32xf32>
    %237 = arith.subf %227, %236 : vector<8x32xf32>
    %238 = arith.mulf %237, %237 : vector<8x32xf32>
    %cst_111 = arith.constant dense<0.000000e+00> : vector<8xf32>
    %239 = vector.multi_reduction <add>, %238, %cst_111 [1] : vector<8x32xf32> to vector<8xf32>
    %240 = vector.shape_cast %239 : vector<8xf32> to vector<8x1xf32>
    %cst_112 = arith.constant 3.200000e+01 : f32
    %241 = vector.broadcast %cst_112 : f32 to vector<8x1xf32>
    %242 = arith.divf %240, %241 : vector<8x1xf32>
    %243 = vector.broadcast %235 : vector<8x1xf32> to vector<8x32xf32>
    %244 = arith.subf %227, %243 : vector<8x32xf32>
    %cst_113 = arith.constant 9.99999974E-6 : f32
    %245 = vector.broadcast %cst_113 : f32 to vector<8x1xf32>
    %246 = arith.addf %242, %245 : vector<8x1xf32>
    %247 = math.rsqrt %246 : vector<8x1xf32>
    %248 = vector.broadcast %247 : vector<8x1xf32> to vector<8x32xf32>
    %249 = arith.mulf %244, %248 : vector<8x32xf32>
    %250 = vector.broadcast %229 : vector<1x32xf32> to vector<8x32xf32>
    %251 = arith.mulf %249, %250 : vector<8x32xf32>
    %252 = vector.broadcast %231 : vector<1x32xf32> to vector<8x32xf32>
    %253 = arith.addf %251, %252 : vector<8x32xf32>
    %254 = arith.truncf %253 : vector<8x32xf32> to vector<8x32xbf16>
    %c0_114 = arith.constant 0 : index
    %c0_115 = arith.constant 0 : index
    %255 = vector.load %arg14[%c0_114, %c0_115] : memref<32x128xbf16, #tpu.memory_space<vmem>>, vector<32x128xbf16>
    %cst_116 = arith.constant dense<0.000000e+00> : vector<8x128xf32>
    %256 = tpu.matmul %254, %255, %cst_116 {dimension_numbers = #tpu.dot_dimension_numbers<[1], [0], [0], [1], [0, 0, 1, 1], [], []>} : vector<8x32xbf16>, vector<32x128xbf16>, vector<8x128xf32> -> vector<8x128xf32>
    %c0_117 = arith.constant 0 : index
    %c0_118 = arith.constant 0 : index
    %257 = vector.load %arg15[%c0_117, %c0_118] : memref<1x128xf32, #tpu.memory_space<vmem>>, vector<1x128xf32>
    %258 = vector.broadcast %257 : vector<1x128xf32> to vector<8x128xf32>
    %259 = arith.addf %256, %258 : vector<8x128xf32>
    %260 = vector.shape_cast %259 : vector<8x128xf32> to vector<1x8x128xf32>
    %261 = arith.truncf %260 : vector<1x8x128xf32> to vector<1x8x128xbf16>
    %c0_119 = arith.constant 0 : index
    %c0_120 = arith.constant 0 : index
    %c0_121 = arith.constant 0 : index
    %262 = vector.load %arg16[%c0_119, %c0_120, %c0_121] : memref<1x8x128xbf16, #tpu.memory_space<vmem>>, vector<1x8x128xbf16>
    tpu.vector_store %arg16[%c0_119, %c0_120, %c0_121], %261 {strides = array<i32>} : memref<1x8x128xbf16, #tpu.memory_space<vmem>>, vector<1x8x128xbf16>,
    return
  }
  func.func @transform_0(%arg0: i32) -> (i32, i32, i32) {
    %c0_i32 = arith.constant 0 : i32
    %c0_i32_0 = arith.constant 0 : i32
    %c0_i32_1 = arith.constant 0 : i32
    return %arg0, %c0_i32, %c0_i32_0 : i32, i32, i32
  }
  func.func @transform_1(%arg0: i32) -> (i32, i32, i32) {
    %c0_i32 = arith.constant 0 : i32
    %c0_i32_0 = arith.constant 0 : i32
    %c0_i32_1 = arith.constant 0 : i32
    %c0_i32_2 = arith.constant 0 : i32
    return %c0_i32, %c0_i32_0, %c0_i32_1 : i32, i32, i32
  }
  func.func @transform_2(%arg0: i32) -> (i32, i32, i32) {
    %c0_i32 = arith.constant 0 : i32
    %c0_i32_0 = arith.constant 0 : i32
    %c0_i32_1 = arith.constant 0 : i32
    %c0_i32_2 = arith.constant 0 : i32
    return %c0_i32, %c0_i32_0, %c0_i32_1 : i32, i32, i32
  }
  func.func @transform_3(%arg0: i32) -> (i32, i32, i32) {
    %c0_i32 = arith.constant 0 : i32
    %c0_i32_0 = arith.constant 0 : i32
    %c0_i32_1 = arith.constant 0 : i32
    %c0_i32_2 = arith.constant 0 : i32
    return %c0_i32, %c0_i32_0, %c0_i32_1 : i32, i32, i32
  }
  func.func @transform_4(%arg0: i32) -> (i32, i32, i32) {
    %c0_i32 = arith.constant 0 : i32
    %c0_i32_0 = arith.constant 0 : i32
    %c0_i32_1 = arith.constant 0 : i32
    %c0_i32_2 = arith.constant 0 : i32
    return %c0_i32, %c0_i32_0, %c0_i32_1 : i32, i32, i32
  }
  func.func @transform_5(%arg0: i32) -> (i32, i32, i32) {
    %c0_i32 = arith.constant 0 : i32
    %c0_i32_0 = arith.constant 0 : i32
    %c0_i32_1 = arith.constant 0 : i32
    %c0_i32_2 = arith.constant 0 : i32
    return %c0_i32, %c0_i32_0, %c0_i32_1 : i32, i32, i32
  }
  func.func @transform_6(%arg0: i32) -> (i32, i32, i32) {
    %c0_i32 = arith.constant 0 : i32
    %c0_i32_0 = arith.constant 0 : i32
    %c0_i32_1 = arith.constant 0 : i32
    %c0_i32_2 = arith.constant 0 : i32
    return %c0_i32, %c0_i32_0, %c0_i32_1 : i32, i32, i32
  }
  func.func @transform_7(%arg0: i32) -> (i32, i32, i32) {
    %c0_i32 = arith.constant 0 : i32
    %c0_i32_0 = arith.constant 0 : i32
    %c0_i32_1 = arith.constant 0 : i32
    %c0_i32_2 = arith.constant 0 : i32
    return %c0_i32, %c0_i32_0, %c0_i32_1 : i32, i32, i32
  }
  func.func @transform_8(%arg0: i32) -> (i32, i32, i32) {
    %c0_i32 = arith.constant 0 : i32
    %c0_i32_0 = arith.constant 0 : i32
    %c0_i32_1 = arith.constant 0 : i32
    %c0_i32_2 = arith.constant 0 : i32
    return %c0_i32, %c0_i32_0, %c0_i32_1 : i32, i32, i32
  }
  func.func @transform_9(%arg0: i32) -> (i32, i32, i32) {
    %c0_i32 = arith.constant 0 : i32
    %c0_i32_0 = arith.constant 0 : i32
    %c0_i32_1 = arith.constant 0 : i32
    %c0_i32_2 = arith.constant 0 : i32
    return %c0_i32, %c0_i32_0, %c0_i32_1 : i32, i32, i32
  }
  func.func @transform_10(%arg0: i32) -> (i32, i32, i32) {
    %c0_i32 = arith.constant 0 : i32
    %c0_i32_0 = arith.constant 0 : i32
    %c0_i32_1 = arith.constant 0 : i32
    %c0_i32_2 = arith.constant 0 : i32
    return %c0_i32, %c0_i32_0, %c0_i32_1 : i32, i32, i32
  }
  func.func @transform_11(%arg0: i32) -> (i32, i32, i32) {
    %c0_i32 = arith.constant 0 : i32
    %c0_i32_0 = arith.constant 0 : i32
    %c0_i32_1 = arith.constant 0 : i32
    %c0_i32_2 = arith.constant 0 : i32
    return %c0_i32, %c0_i32_0, %c0_i32_1 : i32, i32, i32
  }
  func.func @transform_12(%arg0: i32) -> (i32, i32, i32) {
    %c0_i32 = arith.constant 0 : i32
    %c0_i32_0 = arith.constant 0 : i32
    %c0_i32_1 = arith.constant 0 : i32
    %c0_i32_2 = arith.constant 0 : i32
    return %c0_i32, %c0_i32_0, %c0_i32_1 : i32, i32, i32
  }
  func.func @transform_13(%arg0: i32) -> (i32, i32) {
    %c0_i32 = arith.constant 0 : i32
    %c0_i32_0 = arith.constant 0 : i32
    %c0_i32_1 = arith.constant 0 : i32
    return %c0_i32, %c0_i32_0 : i32, i32
  }
  func.func @transform_14(%arg0: i32) -> (i32, i32) {
    %c0_i32 = arith.constant 0 : i32
    %c0_i32_0 = arith.constant 0 : i32
    %c0_i32_1 = arith.constant 0 : i32
    return %c0_i32, %c0_i32_0 : i32, i32
  }
  func.func @transform_15(%arg0: i32) -> (i32, i32, i32) {
    %c0_i32 = arith.constant 0 : i32
    %c0_i32_0 = arith.constant 0 : i32
    %c0_i32_1 = arith.constant 0 : i32
    return %arg0, %c0_i32, %c0_i32_0 : i32, i32, i32
  }
}

</mosaic_0001>

<bundles_post_ra>
// kernel: tpu_custom_call.1
= control target key start
LH: loop header
LB: loop body
LE: loop exit
PB: predicated region body
PF: predicated region fallthrough
CT: control target
= control target key end

     0   :  { %s5978_s0 = inlined_call_operand.hbm [shape: bf16[2,8,32], index: 0, kind: input, shape index: {}]   ;;  %s5979_s1 = inlined_call_operand.hbm [shape: bf16[2,32,96], index: 1, kind: input, shape index: {}]   ;;  %s5980_s2 = inlined_call_operand.hbm [shape: f32[2,1,96], index: 2, kind: input, shape index: {}]   ;;  %s5981_s3 = inlined_call_operand.hbm [shape: bf16[2,32,32], index: 3, kind: input, shape index: {}]   ;;  %s5982_s4 = inlined_call_operand.hbm [shape: f32[2,1,32], index: 4, kind: input, shape index: {}]   ;;  %s5983_s5 = inlined_call_operand.hbm [shape: f32[2,1,32], index: 5, kind: input, shape index: {}]   ;;  %s5984_s6 = inlined_call_operand.hbm [shape: f32[2,1,32], index: 6, kind: input, shape index: {}]   ;;  %s5985_s7 = inlined_call_operand.hbm [shape: bf16[2,32,64], index: 7, kind: input, shape index: {}]   ;;  %s5986_s8 = inlined_call_operand.hbm [shape: f32[2,1,64], index: 8, kind: input, shape index: {}]   ;;  %s5987_s9 = inlined_call_operand.hbm [shape: bf16[2,64,32], index: 9, kind: input, shape index: {}]   ;;  %s5988_s10 = inlined_call_operand.hbm [shape: f32[2,1,32], index: 10, kind: input, shape index: {}]   ;;  %s5989_s11 = inlined_call_operand.hbm [shape: f32[2,1,32], index: 11, kind: input, shape index: {}]   ;;  %s5990_s12 = inlined_call_operand.hbm [shape: f32[2,1,32], index: 12, kind: input, shape index: {}]   ;;  %s5991_s13 = inlined_call_operand.hbm [shape: bf16[32,128], index: 13, kind: input, shape index: {}]   ;;  %s5992_s14 = inlined_call_operand.hbm [shape: f32[1,128], index: 14, kind: input, shape index: {}]   ;;  %s5993_s15 = inlined_call_operand.hbm [shape: bf16[2,8,128], index: 15, kind: output, shape index: {}]  }
   0x1   :  { %6013 = sst [smem:[#allocation41_spill]] %s5978_s0 }
   0x2   :  { %6014 = sst [smem:[#allocation42_spill]] %s5979_s1 }
   0x3   :  { %6015 = sst [smem:[#allocation43_spill]] %s5980_s2 }
   0x4   :  { %6016 = sst [smem:[#allocation44_spill]] %s5981_s3 }
   0x5   :  { %6017 = sst [smem:[#allocation45_spill]] %s5993_s15 }
   0x6   :  { %20 = vsyncpa [#allocation3], 0 }
   0x7   :  { %22 = vsyncpa [#allocation3 + $0x1], 0 }
   0x8   :  { %23 = vsyncpa [#allocation6], 0 }
   0x9   :  { %24 = vsyncpa [#allocation9], 0 }
   0xa   :  { %25 = vsyncpa [#allocation12], 0 }
   0xb   :  { %26 = vsyncpa [#allocation15], 0 }
   0xc   :  { %27 = vsyncpa [#allocation18], 0 }
   0xd   :  { %28 = vsyncpa [#allocation21], 0 }
   0xe   :  { %29 = vsyncpa [#allocation24], 0 }
   0xf   :  { %30 = vsyncpa [#allocation4], 0 }
  0x10   :  { %32 = vsyncpa [#allocation4 + $0x1], 0  ;;  %s5031_s18 = smov 0   ;;  %s5033_s19 = smov 0  }
  0x11   :  { %s5035_s20 = smov 0   ;;  %s5037_s21 = smov 0  }
  0x12 LB: > { %6018 = sst [smem:[#allocation36_spill]] %s4904_s18  ;;  %s4918_s22 = smov [#allocation5]   ;;  %s4916_s21 = sphi %s5037_s21, %s6073_s21   ;;  %s4912_s20 = sphi %s5035_s20, %s6072_s20   ;;  %s4908_s19 = sphi %s5033_s19, %s6071_s19   ;;  %s4904_s18 = sphi %s5031_s18, %s6068_s18  }
  0x13   : > { %6019 = sst [smem:[#allocation37_spill]] %s4908_s19  ;;  %s401_s23 = sshll.u32 %s4918_s22, 4  ;;  %s5057_s23 = int_to_ptr.vmem [resolvable:$true] %s401_s23 }
  0x14   : > { %6020 = sst [smem:[#allocation38_spill]] %s4912_s20  ;;  %s5052_s24 = sadd.s32 4294967295, %s4916_s21  }
  0x15   : > { %6021 = sst [smem:[#allocation39_spill]] %s5052_s24  ;;  %p3774_p0 = scmp.ge.s32.totalorder %s4916_s21, 1 }
  0x16   : > { %p6002_p1 = scmp.eq.s32.totalorder %s5052_s24, 0  ;;  %p389_p2 = scmp.lt.s32.totalorder %s4916_s21, 3 }
  0x17   : > { %s4919_s26 = smov [#allocation8]   ;;  %s4920_s29 = smov [#allocation11]  }
  0x18   : > { %p5059_p3 = pnand %p3774_p0, %p389_p2  ;;  %s427_s27 = sshll.u32 %s4919_s26, 4  ;;  %s5072_s27 = int_to_ptr.vmem [resolvable:$true] %s427_s27 }
  0x19   : > { %s5074_s30 = sshll.u32 %s4920_s29, 4  ;;  %s6025_s1 = sld [smem:[#allocation42_spill]]  ;;  %s454_s30 = int_to_ptr.vmem [resolvable:$true] %s5074_s30 }
  0x1a   : > { %s6022_s25 = scalar_select %p5059_p3, 1, 0 }
  0x1b   : > { %p4193_p5 = pneg %p5059_p3 }
  0x1c   : > { %6023 = sst [smem:[#allocation40_spill]] %s6022_s25 }
  0x1d   : > { %p5068_p6 = pnand %p4193_p5, %p6002_p1 }
  0x1f   : > { %s4400_s22 = scalar_lea.hbm %s6025_s1, 512  ;;  %p5084_p8 = pneg %p5068_p6 }
  0x20   : > { %p4401_p7 = scmp.ne.s32.totalorder %s6025_s1, %s4400_s22  ;;  %p4407_p11 = scmp.lt.u32.totalorder %s4400_s22, %s6025_s1 }
  0x22   : > { %p4403_p9 = pnand %p5084_p8, %p4401_p7 }
  0x24   : > { %p4404_p10 = pneg %p4403_p9 }
  0x26   : > { %p4409_p12 = pnand %p4407_p11, %p4404_p10 }
  0x28   : > { %4412 = shalt.err (!%p4409_p12)
}
  0x29   : > { %s4413_s15 = scalar_lea.vmem %s5057_s23, 512  ;;  %p4421_p5 = scmp.lt.s32.totalorder %s5057_s23, %s5057_s23 }
  0x2a   : > { %p4414_p13 = scmp.ne.s32.totalorder %s5057_s23, %s4413_s15  ;;  %p4422_p4 = scmp.lt.s32.totalorder %s4413_s15, %s4413_s15 }
  0x2c   : > { %p4416_p0 = pnand %p4414_p13, %p5084_p8  ;;  %p4423_p7 = por %p4422_p4, %p4421_p5 }
  0x2e   : > { %p4417_p2 = pneg %p4416_p0 }
  0x30   : > { %p4424_p9 = pnand %p4423_p7, %p4417_p2 }
  0x32   : > { %4427 = shalt.err (!%p4424_p9)
}
  0x33   : > { %s6004_s25 = smov 64   ;;  %s6006_s0 = smov 4  }
  0x34   : > { %4196 = dma.hbm_to_vmem [thread:$0]  (!%p5068_p6), %s6025_s1, 512, %s5057_s23, [#allocation6], %s6004_s25, %s6004_s25, %s6006_s0  }
  0x35   : > { %s6027_s3 = sld [smem:[#allocation44_spill]] }
  0x3b   : > { %s4428_s15 = scalar_lea.hbm %s6027_s3, 512 }
  0x3c   : > { %p4429_p4 = scmp.ne.s32.totalorder %s6027_s3, %s4428_s15  ;;  %p4435_p12 = scmp.lt.u32.totalorder %s4428_s15, %s6027_s3 }
  0x3e   : > { %p4431_p10 = pnand %p4429_p4, %p5084_p8 }
  0x40   : > { %p4432_p11 = pneg %p4431_p10 }
  0x42   : > { %p4437_p13 = pnand %p4435_p12, %p4432_p11 }
  0x44   : > { %4440 = shalt.err (!%p4437_p13)
}
  0x45   : > { %s4441_s23 = scalar_lea.vmem %s5072_s27, 512  ;;  %p4449_p7 = scmp.lt.s32.totalorder %s5072_s27, %s5072_s27 }
  0x46   : > { %p4442_p0 = scmp.ne.s32.totalorder %s5072_s27, %s4441_s23  ;;  %p4450_p9 = scmp.lt.s32.totalorder %s4441_s23, %s4441_s23 }
  0x48   : > { %p4444_p2 = pnand %p4442_p0, %p5084_p8  ;;  %p4451_p4 = por %p4450_p9, %p4449_p7 }
  0x4a   : > { %p4445_p5 = pneg %p4444_p2 }
  0x4c   : > { %p4452_p10 = pnand %p4451_p4, %p4445_p5 }
  0x4e   : > { %4455 = shalt.err (!%p4452_p10)
}
  0x4f   : > { %4202 = dma.hbm_to_vmem [thread:$0]  (!%p5068_p6), %s6027_s3, 512, %s5072_s27, [#allocation9], %s6004_s25, %s6004_s25, %s6006_s0  }
  0x50   : > { %s4456_s16 = scalar_lea.hbm %s5983_s5, 32 }
  0x51   : > { %p4457_p11 = scmp.ne.s32.totalorder %s5983_s5, %s4456_s16  ;;  %p4463_p0 = scmp.lt.u32.totalorder %s4456_s16, %s5983_s5 }
  0x53   : > { %p4459_p12 = pnand %p4457_p11, %p5084_p8 }
  0x55   : > { %p4460_p13 = pneg %p4459_p12 }
  0x57   : > { %p4465_p2 = pnand %p4463_p0, %p4460_p13 }
  0x59   : > { %4468 = shalt.err (!%p4465_p2)
}
  0x5a   : > { %s4469_s23 = scalar_lea.vmem %s454_s30, 32  ;;  %p4477_p4 = scmp.lt.s32.totalorder %s454_s30, %s454_s30 }
  0x5b   : > { %p4470_p5 = scmp.ne.s32.totalorder %s454_s30, %s4469_s23  ;;  %p4478_p10 = scmp.lt.s32.totalorder %s4469_s23, %s4469_s23 }
  0x5d   : > { %p4472_p7 = pnand %p4470_p5, %p5084_p8  ;;  %p4479_p1 = por %p4478_p10, %p4477_p4 }
  0x5f   : > { %p4473_p9 = pneg %p4472_p7 }
  0x61   : > { %p4480_p3 = pnand %p4479_p1, %p4473_p9 }
  0x63   : > { %4483 = shalt.err (!%p4480_p3)
}
  0x64   : > { %s6008_s27 = smov 16   ;;  %s6010_s18 = smov 1  }
  0x65   : > { %4208 = dma.hbm_to_vmem [thread:$0]  (!%p5068_p6), %s5983_s5, 32, %s454_s30, [#allocation12], %s6008_s27, %s6008_s27, %s6010_s18  }
  0x66   : > { %s4925_s24 = smov [#allocation14]   ;;  %s4926_s17 = smov [#allocation17]  }
  0x67   : > { %s479_s16 = sshll.u32 %s4925_s24, 4  ;;  %s505_s22 = sshll.u32 %s4926_s17, 4  ;;  %s480_s16 = int_to_ptr.vmem [resolvable:$true] %s479_s16  ;;  %s506_s22 = int_to_ptr.vmem [resolvable:$true] %s505_s22 }
  0x68   : > { %s4484_s23 = scalar_lea.hbm %s5985_s7, 512 }
  0x69   : > { %p4485_p1 = scmp.ne.s32.totalorder %s5985_s7, %s4484_s23  ;;  %p4491_p12 = scmp.lt.u32.totalorder %s4484_s23, %s5985_s7 }
  0x6b   : > { %p4487_p3 = pnand %p4485_p1, %p5084_p8 }
  0x6d   : > { %p4488_p11 = pneg %p4487_p3 }
  0x6f   : > { %p4493_p13 = pnand %p4491_p12, %p4488_p11 }
  0x71   : > { %4496 = shalt.err (!%p4493_p13)
}
  0x72   : > { %s4497_s30 = scalar_lea.vmem %s480_s16, 512  ;;  %p4505_p7 = scmp.lt.s32.totalorder %s480_s16, %s480_s16 }
  0x73   : > { %p4498_p0 = scmp.ne.s32.totalorder %s480_s16, %s4497_s30  ;;  %p4506_p9 = scmp.lt.s32.totalorder %s4497_s30, %s4497_s30 }
  0x75   : > { %p4500_p2 = pnand %p4498_p0, %p5084_p8  ;;  %p4507_p4 = por %p4506_p9, %p4505_p7 }
  0x77   : > { %p4501_p5 = pneg %p4500_p2 }
  0x79   : > { %p4508_p10 = pnand %p4507_p4, %p4501_p5 }
  0x7b   : > { %4511 = shalt.err (!%p4508_p10)
}
  0x7c   : > { %s6028_s25 = smov 4   ;;  %s6029_s0 = smov 64  }
  0x7d   : > { %4214 = dma.hbm_to_vmem [thread:$0]  (!%p5068_p6), %s5985_s7, 512, %s480_s16, [#allocation15], %s6029_s0, %s6029_s0, %s6028_s25  }
  0x7e   : > { %s4512_s24 = scalar_lea.hbm %s5987_s9, 1024 }
  0x7f   : > { %p4513_p1 = scmp.ne.s32.totalorder %s5987_s9, %s4512_s24  ;;  %p4519_p12 = scmp.lt.u32.totalorder %s4512_s24, %s5987_s9 }
  0x81   : > { %p4515_p3 = pnand %p4513_p1, %p5084_p8 }
  0x83   : > { %p4516_p11 = pneg %p4515_p3 }
  0x85   : > { %p4521_p13 = pnand %p4519_p12, %p4516_p11 }
  0x87   : > { %4524 = shalt.err (!%p4521_p13)
}
  0x88   : > { %s4525_s30 = scalar_lea.vmem %s506_s22, 1024  ;;  %p4533_p7 = scmp.lt.s32.totalorder %s506_s22, %s506_s22 }
  0x89   : > { %p4526_p0 = scmp.ne.s32.totalorder %s506_s22, %s4525_s30  ;;  %p4534_p9 = scmp.lt.s32.totalorder %s4525_s30, %s4525_s30 }
  0x8b   : > { %p4528_p2 = pnand %p4526_p0, %p5084_p8  ;;  %p4535_p4 = por %p4534_p9, %p4533_p7 }
  0x8d   : > { %p4529_p5 = pneg %p4528_p2 }
  0x8f   : > { %p4536_p10 = pnand %p4535_p4, %p4529_p5 }
  0x91   : > { %4539 = shalt.err (!%p4536_p10)
}
  0x92   : > { %4220 = dma.hbm_to_vmem [thread:$0]  (!%p5068_p6), %s5987_s9, 1024, %s506_s22, [#allocation18], %s6029_s0, %s6029_s0, %s6028_s25  }
  0x93   : > { %s4927_s3 = smov [#allocation20]   ;;  %s4928_s20 = smov [#allocation23]  }
  0x94   : > { %s531_s19 = sshll.u32 %s4927_s3, 4  ;;  %s557_s24 = sshll.u32 %s4928_s20, 4  ;;  %s532_s19 = int_to_ptr.vmem [resolvable:$true] %s531_s19  ;;  %s558_s24 = int_to_ptr.vmem [resolvable:$true] %s557_s24 }
  0x95   : > { %s4540_s15 = scalar_lea.hbm %s5989_s11, 32 }
  0x96   : > { %p4541_p1 = scmp.ne.s32.totalorder %s5989_s11, %s4540_s15  ;;  %p4547_p12 = scmp.lt.u32.totalorder %s4540_s15, %s5989_s11 }
  0x98   : > { %p4543_p3 = pnand %p4541_p1, %p5084_p8 }
  0x9a   : > { %p4544_p11 = pneg %p4543_p3 }
  0x9c   : > { %p4549_p13 = pnand %p4547_p12, %p4544_p11 }
  0x9e   : > { %4552 = shalt.err (!%p4549_p13)
}
  0x9f   : > { %s4553_s22 = scalar_lea.vmem %s532_s19, 32  ;;  %p4561_p7 = scmp.lt.s32.totalorder %s532_s19, %s532_s19 }
  0xa0   : > { %p4554_p0 = scmp.ne.s32.totalorder %s532_s19, %s4553_s22  ;;  %p4562_p9 = scmp.lt.s32.totalorder %s4553_s22, %s4553_s22 }
  0xa2   : > { %p4556_p2 = pnand %p4554_p0, %p5084_p8  ;;  %p4563_p4 = por %p4562_p9, %p4561_p7 }
  0xa4   : > { %p4557_p5 = pneg %p4556_p2 }
  0xa6   : > { %p4564_p10 = pnand %p4563_p4, %p4557_p5 }
  0xa8   : > { %4567 = shalt.err (!%p4564_p10)
}
  0xa9   : > { %s6030_s1 = smov 16   ;;  %s4568_s29 = scalar_lea.hbm %s5991_s13, 256 }
  0xaa   : > { %4226 = dma.hbm_to_vmem [thread:$0]  (!%p5068_p6), %s5989_s11, 32, %s532_s19, [#allocation21], %s6030_s1, %s6030_s1, %s6010_s18  }
  0xab   : > { %p4569_p1 = scmp.ne.s32.totalorder %s5991_s13, %s4568_s29  ;;  %p4575_p12 = scmp.lt.u32.totalorder %s4568_s29, %s5991_s13 }
  0xad   : > { %p4571_p3 = pnand %p4569_p1, %p5084_p8 }
  0xaf   : > { %p4572_p11 = pneg %p4571_p3 }
  0xb1   : > { %p4577_p13 = pnand %p4575_p12, %p4572_p11 }
  0xb3   : > { %4580 = shalt.err (!%p4577_p13)
}
  0xb4   : > { %s4581_s22 = scalar_lea.vmem %s558_s24, 256  ;;  %p4589_p7 = scmp.lt.s32.totalorder %s558_s24, %s558_s24 }
  0xb5   : > { %p4582_p0 = scmp.ne.s32.totalorder %s558_s24, %s4581_s22  ;;  %p4590_p9 = scmp.lt.s32.totalorder %s4581_s22, %s4581_s22 }
  0xb7   : > { %p4584_p2 = pnand %p4582_p0, %p5084_p8  ;;  %p4591_p4 = por %p4590_p9, %p4589_p7 }
  0xb9   : > { %p4585_p5 = pneg %p4584_p2 }
  0xbb   : > { %p4592_p10 = pnand %p4591_p4, %p4585_p5 }
  0xbd   : > { %4595 = shalt.err (!%p4592_p10)
}
  0xbe   : > { %4232 = dma.hbm_to_vmem [thread:$0]  (!%p5068_p6), %s5991_s13, 256, %s558_s24, [#allocation24], %s6029_s0, %s6029_s0, %s6028_s25  }
  0xbf   : > { %s4929_s3 = smov [#allocation7]   ;;  %s4930_s17 = smov [#allocation10]  }
  0xc0   : > { %s414_s20 = sshll.u32 %s4929_s3, 4  ;;  %s440_s29 = sshll.u32 %s4930_s17, 4  ;;  %s415_s20 = int_to_ptr.vmem [resolvable:$true] %s414_s20  ;;  %s441_s29 = int_to_ptr.vmem [resolvable:$true] %s440_s29 }
  0xc1   : > { %s6031_s2 = sld [smem:[#allocation43_spill]] }
  0xc7   : > { %s4596_s30 = scalar_lea.hbm %s6031_s2, 32 }
  0xc8   : > { %p4597_p1 = scmp.ne.s32.totalorder %s6031_s2, %s4596_s30  ;;  %p4603_p12 = scmp.lt.u32.totalorder %s4596_s30, %s6031_s2 }
  0xca   : > { %p4599_p3 = pnand %p4597_p1, %p5084_p8 }
  0xcc   : > { %p4600_p11 = pneg %p4599_p3 }
  0xce   : > { %p4605_p13 = pnand %p4603_p12, %p4600_p11 }
  0xd0   : > { %4608 = shalt.err (!%p4605_p13)
}
  0xd1   : > { %s4609_s25 = scalar_lea.vmem %s415_s20, 32  ;;  %p4617_p7 = scmp.lt.s32.totalorder %s415_s20, %s415_s20 }
  0xd2   : > { %p4610_p0 = scmp.ne.s32.totalorder %s415_s20, %s4609_s25  ;;  %p4618_p9 = scmp.lt.s32.totalorder %s4609_s25, %s4609_s25 }
  0xd4   : > { %p4612_p2 = pnand %p4610_p0, %p5084_p8  ;;  %p4619_p4 = por %p4618_p9, %p4617_p7 }
  0xd6   : > { %p4613_p5 = pneg %p4612_p2 }
  0xd8   : > { %p4620_p10 = pnand %p4619_p4, %p4613_p5 }
  0xda   : > { %4623 = shalt.err (!%p4620_p10)
}
  0xdb   : > { %s6032_s0 = smov 1   ;;  %s4624_s17 = scalar_lea.hbm %s5982_s4, 32 }
  0xdc   : > { %4199 = dma.hbm_to_vmem [thread:$0]  (!%p5068_p6), %s6031_s2, 32, %s415_s20, [#allocation6], %s6030_s1, %s6030_s1, %s6032_s0  }
  0xdd   : > { %p4625_p1 = scmp.ne.s32.totalorder %s5982_s4, %s4624_s17  ;;  %p4631_p12 = scmp.lt.u32.totalorder %s4624_s17, %s5982_s4 }
  0xdf   : > { %p4627_p3 = pnand %p4625_p1, %p5084_p8 }
  0xe1   : > { %p4628_p11 = pneg %p4627_p3 }
  0xe3   : > { %p4633_p13 = pnand %p4631_p12, %p4628_p11 }
  0xe5   : > { %4636 = shalt.err (!%p4633_p13)
}
  0xe6   : > { %s4637_s22 = scalar_lea.vmem %s441_s29, 32  ;;  %p4645_p7 = scmp.lt.s32.totalorder %s441_s29, %s441_s29 }
  0xe7   : > { %p4638_p0 = scmp.ne.s32.totalorder %s441_s29, %s4637_s22  ;;  %p4646_p9 = scmp.lt.s32.totalorder %s4637_s22, %s4637_s22 }
  0xe9   : > { %p4640_p2 = pnand %p4638_p0, %p5084_p8  ;;  %p4647_p4 = por %p4646_p9, %p4645_p7 }
  0xeb   : > { %p4641_p5 = pneg %p4640_p2 }
  0xed   : > { %p4648_p10 = pnand %p4647_p4, %p4641_p5 }
  0xef   : > { %4651 = shalt.err (!%p4648_p10)
}
  0xf0   : > { %4205 = dma.hbm_to_vmem [thread:$0]  (!%p5068_p6), %s5982_s4, 32, %s441_s29, [#allocation9], %s6030_s1, %s6030_s1, %s6032_s0  }
  0xf1   : > { %s4931_s25 = smov [#allocation13]   ;;  %s4932_s24 = smov [#allocation16]  }
  0xf2   : > { %s466_s18 = sshll.u32 %s4931_s25, 4  ;;  %s492_s27 = sshll.u32 %s4932_s24, 4  ;;  %s467_s18 = int_to_ptr.vmem [resolvable:$true] %s466_s18  ;;  %s493_s27 = int_to_ptr.vmem [resolvable:$true] %s492_s27 }
  0xf3   : > { %s4652_s15 = scalar_lea.hbm %s5984_s6, 32 }
  0xf4   : > { %p4653_p1 = scmp.ne.s32.totalorder %s5984_s6, %s4652_s15  ;;  %p4659_p12 = scmp.lt.u32.totalorder %s4652_s15, %s5984_s6 }
  0xf6   : > { %p4655_p3 = pnand %p4653_p1, %p5084_p8 }
  0xf8   : > { %p4656_p11 = pneg %p4655_p3 }
  0xfa   : > { %p4661_p13 = pnand %p4659_p12, %p4656_p11 }
  0xfc   : > { %4664 = shalt.err (!%p4661_p13)
}
  0xfd   : > { %s4665_s29 = scalar_lea.vmem %s467_s18, 32  ;;  %p4673_p7 = scmp.lt.s32.totalorder %s467_s18, %s467_s18 }
  0xfe   : > { %p4666_p0 = scmp.ne.s32.totalorder %s467_s18, %s4665_s29  ;;  %p4674_p9 = scmp.lt.s32.totalorder %s4665_s29, %s4665_s29 }
 0x100   : > { %p4668_p2 = pnand %p4666_p0, %p5084_p8  ;;  %p4675_p4 = por %p4674_p9, %p4673_p7 }
 0x102   : > { %p4669_p5 = pneg %p4668_p2 }
 0x104   : > { %p4676_p10 = pnand %p4675_p4, %p4669_p5 }
 0x106   : > { %4679 = shalt.err (!%p4676_p10)
}
 0x107   : > { %4211 = dma.hbm_to_vmem [thread:$0]  (!%p5068_p6), %s5984_s6, 32, %s467_s18, [#allocation12], %s6030_s1, %s6030_s1, %s6032_s0  }
 0x108   : > { %s4680_s3 = scalar_lea.hbm %s5986_s8, 32 }
 0x109   : > { %p4681_p1 = scmp.ne.s32.totalorder %s5986_s8, %s4680_s3  ;;  %p4687_p12 = scmp.lt.u32.totalorder %s4680_s3, %s5986_s8 }
 0x10b   : > { %p4683_p3 = pnand %p4681_p1, %p5084_p8 }
 0x10d   : > { %p4684_p11 = pneg %p4683_p3 }
 0x10f   : > { %p4689_p13 = pnand %p4687_p12, %p4684_p11 }
 0x111   : > { %4692 = shalt.err (!%p4689_p13)
}
 0x112   : > { %s4693_s16 = scalar_lea.vmem %s493_s27, 32  ;;  %p4701_p7 = scmp.lt.s32.totalorder %s493_s27, %s493_s27 }
 0x113   : > { %p4694_p0 = scmp.ne.s32.totalorder %s493_s27, %s4693_s16  ;;  %p4702_p9 = scmp.lt.s32.totalorder %s4693_s16, %s4693_s16 }
 0x115   : > { %p4696_p2 = pnand %p4694_p0, %p5084_p8  ;;  %p4703_p4 = por %p4702_p9, %p4701_p7 }
 0x117   : > { %p4697_p5 = pneg %p4696_p2 }
 0x119   : > { %p4704_p10 = pnand %p4703_p4, %p4697_p5 }
 0x11b   : > { %4707 = shalt.err (!%p4704_p10)
}
 0x11c   : > { %4217 = dma.hbm_to_vmem [thread:$0]  (!%p5068_p6), %s5986_s8, 32, %s493_s27, [#allocation15], %s6030_s1, %s6030_s1, %s6032_s0  }
 0x11d   : > { %s4933_s29 = smov [#allocation19]   ;;  %s4934_s19 = smov [#allocation22]  }
 0x11e   : > { %s518_s20 = sshll.u32 %s4933_s29, 4  ;;  %s544_s25 = sshll.u32 %s4934_s19, 4  ;;  %s519_s20 = int_to_ptr.vmem [resolvable:$true] %s518_s20  ;;  %s545_s25 = int_to_ptr.vmem [resolvable:$true] %s544_s25 }
 0x11f   : > { %s4708_s17 = scalar_lea.hbm %s5988_s10, 32 }
 0x120   : > { %p4709_p1 = scmp.ne.s32.totalorder %s5988_s10, %s4708_s17  ;;  %p4715_p12 = scmp.lt.u32.totalorder %s4708_s17, %s5988_s10 }
 0x122   : > { %p4711_p3 = pnand %p4709_p1, %p5084_p8 }
 0x124   : > { %p4712_p11 = pneg %p4711_p3 }
 0x126   : > { %p4717_p13 = pnand %p4715_p12, %p4712_p11 }
 0x128   : > { %4720 = shalt.err (!%p4717_p13)
}
 0x129   : > { %s4721_s27 = scalar_lea.vmem %s519_s20, 32  ;;  %p4729_p7 = scmp.lt.s32.totalorder %s519_s20, %s519_s20 }
 0x12a   : > { %p4722_p0 = scmp.ne.s32.totalorder %s519_s20, %s4721_s27  ;;  %p4730_p9 = scmp.lt.s32.totalorder %s4721_s27, %s4721_s27 }
 0x12c   : > { %p4724_p2 = pnand %p4722_p0, %p5084_p8  ;;  %p4731_p4 = por %p4730_p9, %p4729_p7 }
 0x12e   : > { %p4725_p5 = pneg %p4724_p2 }
 0x130   : > { %p4732_p10 = pnand %p4731_p4, %p4725_p5 }
 0x132   : > { %4735 = shalt.err (!%p4732_p10)
}
 0x133   : > { %4223 = dma.hbm_to_vmem [thread:$0]  (!%p5068_p6), %s5988_s10, 32, %s519_s20, [#allocation18], %s6030_s1, %s6030_s1, %s6032_s0  }
 0x134   : > { %s4736_s24 = scalar_lea.hbm %s5990_s12, 32 }
 0x135   : > { %p4737_p1 = scmp.ne.s32.totalorder %s5990_s12, %s4736_s24  ;;  %p4743_p12 = scmp.lt.u32.totalorder %s4736_s24, %s5990_s12 }
 0x137   : > { %p4739_p3 = pnand %p4737_p1, %p5084_p8 }
 0x139   : > { %p4740_p11 = pneg %p4739_p3 }
 0x13b   : > { %p4745_p13 = pnand %p4743_p12, %p4740_p11 }
 0x13d   : > { %4748 = shalt.err (!%p4745_p13)
}
 0x13e   : > { %s4749_s30 = scalar_lea.vmem %s545_s25, 32  ;;  %p4757_p7 = scmp.lt.s32.totalorder %s545_s25, %s545_s25 }
 0x13f   : > { %p4750_p0 = scmp.ne.s32.totalorder %s545_s25, %s4749_s30  ;;  %p4758_p9 = scmp.lt.s32.totalorder %s4749_s30, %s4749_s30 }
 0x141   : > { %p4752_p2 = pnand %p4750_p0, %p5084_p8  ;;  %p4759_p4 = por %p4758_p9, %p4757_p7 }
 0x143   : > { %p4753_p5 = pneg %p4752_p2 }
 0x145   : > { %p4760_p10 = pnand %p4759_p4, %p4753_p5 }
 0x147   : > { %4763 = shalt.err (!%p4760_p10)
}
 0x148   : > { %4229 = dma.hbm_to_vmem [thread:$0]  (!%p5068_p6), %s5990_s12, 32, %s545_s25, [#allocation21], %s6030_s1, %s6030_s1, %s6032_s0  }
 0x149   : > { %s4935_s27 = smov [#allocation25]   ;;  %s4764_s19 = scalar_lea.hbm %s5992_s14, 16 }
 0x14a   : > { %s571_s18 = sshll.u32 %s4935_s27, 4  ;;  %p4765_p1 = scmp.ne.s32.totalorder %s5992_s14, %s4764_s19  ;;  %s572_s18 = int_to_ptr.vmem [resolvable:$true] %s571_s18 }
 0x14b   : > { %p4771_p12 = scmp.lt.u32.totalorder %s4764_s19, %s5992_s14 }
 0x14c   : > { %p4767_p3 = pnand %p4765_p1, %p5084_p8 }
 0x14e   : > { %p4768_p11 = pneg %p4767_p3 }
 0x150   : > { %p4773_p13 = pnand %p4771_p12, %p4768_p11 }
 0x152   : > { %4776 = shalt.err (!%p4773_p13)
}
 0x153   : > { %s4777_s1 = scalar_lea.vmem %s572_s18, 16  ;;  %s4784_s0 = scalar_lea.vmem %s572_s18, 32 }
 0x154   : > { %p4778_p0 = scmp.ne.s32.totalorder %s572_s18, %s4777_s1  ;;  %p4785_p7 = scmp.lt.s32.totalorder %s572_s18, %s572_s18 }
 0x155   : > { %p4786_p9 = scmp.lt.s32.totalorder %s4784_s0, %s4777_s1 }
 0x156   : > { %p4780_p2 = pnand %p4778_p0, %p5084_p8 }
 0x157   : > { %p4787_p4 = por %p4786_p9, %p4785_p7 }
 0x158   : > { %p4781_p5 = pneg %p4780_p2 }
 0x15a   : > { %p4788_p10 = pnand %p4787_p4, %p4781_p5 }
 0x15c   : > { %4791 = shalt.err (!%p4788_p10)
}
 0x15d   : > { %s6033_s30 = sld [smem:[#allocation38_spill]]  ;;  %s6034_s20 = sld [smem:[#allocation37_spill]] }
 0x15e   : > { %s6035_s26 = sld [smem:[#allocation36_spill]]  ;;  %s6036_s16 = sld [smem:[#allocation39_spill]] }
 0x15f   : > { %4235 = dma.hbm_to_vmem [thread:$0]  (!%p5068_p6), %s5992_s14, 16, %s572_s18, [#allocation24]  }
 0x160   : > { %s3773_s27 = sadd.s32 4294967294, %s4916_s21   ;;  %s5386_s28 = sadd.s32 1, %s4916_s21  }
 0x161   : > { %s42_s22 = ssub.s32 %s4916_s21, %s5386_s28  ;;  %p53_p3 = scmp.eq.s32.totalorder %s4916_s21, 0 }
 0x162   : > { %p43_p8 = scmp.eq.s32.totalorder %s42_s22, 0  ;;  %p382_p2 = scmp.eq.s32.totalorder %s3773_s27, 1 }
 0x163   : > { %s45_s29 = sadd.s32 1, %s6033_s30  ;;  %p52_p1 = scmp.ne.s32.totalorder %s6033_s30, %s6034_s20 }
 0x164   : > { %p58_p11 = scmp.ne.s32.totalorder %s6034_s20, %s6035_s26  ;;  %p6038_p13 = scmp.eq.s32.totalorder %s6036_s16, 0 }
 0x165   : > { %s5397_s19 = scalar_select %p43_p8, %s6033_s30, %s45_s29  }
 0x166   : > { %p5399_p12 = por %p53_p3, %p52_p1  ;;  %p5405_p6 = por %p6038_p13, %p58_p11 }
 0x167   : > { %p376_p0 = scmp.eq.s32.totalorder %s6036_s16, 1  ;;  %p4258_p5 = scmp.lt.s32.totalorder %s4916_s21, 2 }
 0x168   : > { %s582_s3 = sand.u32 1, %s6033_s30   ;;  %p5416_p9 = por %p382_p2, %p58_p11 }
 0x169   : > { %p5412_p7 = por %p376_p0, %p52_p1  ;;  %s3790_s1 = sshll.u32 %s582_s3, 2 }
 0x16a   : > { %s6041_s15 = scalar_select %p5416_p9, 1, 0 }
 0x16b   : > { %s6040_s17 = scalar_select %p5412_p7, 1, 0 }
 0x16c   : > { %s3791_s0 = sshll.u32 %s4916_s21, 6  ;;  %s6042_s20 = sld [smem:[#allocation41_spill]] }
 0x16d   : > { %s586_s30 = scalar_lea.vmem [#allocation2], %s3790_s1  ;;  %p5430_p4 = pnand %p4258_p5, %p5399_p12 }
 0x16e   : > { %s593_s16 = sshll.u32 %s586_s30, 4  ;;  %s583_s29 = scalar_lea.sflag [#allocation3], %s582_s3  ;;  %s5426_s16 = int_to_ptr.vmem [resolvable:$true] %s593_s16 }
 0x16f   : > { %p4794_p8 = pneg %p5430_p4 }
 0x172   : > { %s6043_s26 = smov %s6042_s20  ;;  %s5424_s22 = scalar_lea.hbm %s6042_s20, %s3791_s0 }
 0x173   : > { %s4792_s2 = scalar_lea.hbm %s5424_s22, 64  ;;  %s4797_s25 = scalar_lea.hbm %s6043_s26, 128 }
 0x174   : > { %p4793_p10 = scmp.ne.s32.totalorder %s5424_s22, %s4792_s2  ;;  %p4798_p11 = scmp.lt.u32.totalorder %s5424_s22, %s6043_s26 }
 0x175   : > { %p4799_p12 = scmp.lt.u32.totalorder %s4797_s25, %s4792_s2  ;;  %p4801_p0 = scmp.lt.u32.totalorder %s4792_s2, %s5424_s22 }
 0x176   : > { %p4795_p1 = pnand %p4794_p8, %p4793_p10 }
 0x177   : > { %p4800_p13 = por %p4799_p12, %p4798_p11 }
 0x178   : > { %p4796_p3 = pneg %p4795_p1 }
 0x179   : > { %p4802_p2 = por %p4801_p0, %p4800_p13 }
 0x17b   : > { %p4803_p5 = pnand %p4802_p2, %p4796_p3 }
 0x17d   : > { %4806 = shalt.err (!%p4803_p5)
}
 0x17e   : > { %s4807_s3 = scalar_lea.vmem %s5426_s16, 64  ;;  %s4936_s20 = smov [#allocation2]  }
 0x17f   : > { %p4808_p10 = scmp.ne.s32.totalorder %s5426_s16, %s4807_s3  ;;  %s4812_s30 = sshll.u32 %s4936_s20, 4  ;;  %s4813_s30 = int_to_ptr.vmem [resolvable:$false] %s4812_s30 }
 0x180   : > { %s4814_s1 = scalar_lea.vmem %s4813_s30, 128  ;;  %p4815_p7 = scmp.lt.s32.totalorder %s5426_s16, %s4813_s30 }
 0x181   : > { %p4810_p1 = pnand %p4808_p10, %p4794_p8  ;;  %p4816_p11 = scmp.lt.s32.totalorder %s4814_s1, %s4807_s3 }
 0x183   : > { %p4811_p9 = pneg %p4810_p1  ;;  %p4817_p12 = por %p4816_p11, %p4815_p7 }
 0x185   : > { %p4818_p13 = pnand %p4817_p12, %p4811_p9 }
 0x187   : > { %4821 = shalt.err (!%p4818_p13)
}
 0x188   : > { %4239 = dma.hbm_to_vmem [thread:$0]  (!%p5430_p4), %s5424_s22, 64, %s5426_s16, %s583_s29  }
 0x189   : > { %s6045_s2 = sld [smem:[#allocation40_spill]] }
 0x18f   : > { %p6046_p3 = scmp.ne.s32.totalorder %s6045_s2, 0 }
 0x190   : > { %s6047_s0 = sld [smem:[#allocation37_spill]] (!%p6046_p3) }
 0x191   : > { %602 = sbr.rel (%p6046_p3) target bundleno = 6065 (0x17b1), region = 80 }
 0x196   : > { %s5462_s25 = sand.u32 (!%p6046_p3), 1, %s6047_s0  }
 0x197   : > { %s3793_s24 = sshll.u32 (!%p6046_p3), %s5462_s25, 2  ;;  %s605_s23 = scalar_lea.sflag (!%p6046_p3), [#allocation3], %s5462_s25 }
 0x198   : > { %s608_s3 = scalar_lea.vmem [#allocation2], %s3793_s24 }
 0x199   : > { %4867 = dma.done.wait (%p5405_p6), %s605_s23, 64  }
 0x19a   : > { %4869 = vsyncadd (%p5405_p6), %s605_s23, 4294967232  ;;  %s6048_s22 = sld [smem:[#allocation39_spill]] }
 0x1a0   : > { %p6049_p7 = scmp.eq.s32.totalorder %s6048_s22, 0 }
 0x1a2   : > { %4871 = dma.done.wait (%p6049_p7), [#allocation6], 544   ;;  %p6050_p9 = pmov %p6049_p7 }
 0x1a3   : > { %p6051_p4 = pmov %p6049_p7 }
 0x1a4   : > { %4873 = vsyncadd (%p6050_p9), [#allocation6], 4294966752 }
 0x1a5   : > { %4875 = dma.done.wait (%p6051_p4), [#allocation9], 544   ;;  %p6052_p8 = pmov %p6051_p4 }
 0x1a6   : > { %p6053_p0 = pmov %p6051_p4 }
 0x1a7   : > { %4877 = vsyncadd (%p6052_p8), [#allocation9], 4294966752 }
 0x1a8   : > { %4879 = dma.done.wait (%p6053_p0), [#allocation12], 64   ;;  %p6054_p2 = pmov %p6053_p0 }
 0x1a9   : > { %p6055_p6 = pmov %p6053_p0 }
 0x1aa   : > { %4881 = vsyncadd (%p6054_p2), [#allocation12], 4294967232 }
 0x1ab   : > { %4883 = dma.done.wait (%p6055_p6), [#allocation15], 544   ;;  %p6056_p5 = pmov %p6053_p0 }
 0x1ac   : > { %p6057_p10 = pmov %p6053_p0 }
 0x1ad   : > { %4885 = vsyncadd (%p6056_p5), [#allocation15], 4294966752 }
 0x1ae   : > { %4887 = dma.done.wait (%p6057_p10), [#allocation18], 1056   ;;  %p6058_p1 = pmov %p6053_p0 }
 0x1af   : > { %p6059_p11 = pmov %p6053_p0 }
 0x1b0   : > { %4889 = vsyncadd (%p6058_p1), [#allocation18], 4294966240 }
 0x1b1   : > { %4891 = dma.done.wait (%p6059_p11), [#allocation21], 64   ;;  %p6060_p12 = pmov %p6053_p0 }
 0x1b2   : > { %p6061_p13 = pmov %p6053_p0 }
 0x1b3   : > { %4893 = vsyncadd (%p6060_p12), [#allocation21], 4294967232 }
 0x1b4   : > { %4895 = dma.done.wait (%p6061_p13), [#allocation24], 272   ;;  %p6062_p3 = pmov %p6053_p0 }
 0x1b5   : > { %v4937_v0 = vmov 0.0   ;;  %vm4938_vm0 = vmmov 0   ;;  %v4337_v1 = vld [vmem:[#allocation5] sm:$0xff]   ;;  %v4338_v2 = vld [vmem:[#allocation5 + $0x8] sm:$0xff]   ;;  %v5506_v3 = vld [vmem:[%s608_s3] sm:$0xf]  ;;  %v714_v15 = vlaneseq }
 0x1b6   : > { %4897 = vsyncadd (%p6062_p3), [#allocation24], 4294967024  ;;  %3957 = vmatprep.subr.bf16.mxu0 %v4937_v0  ;;  %3961 = vmatprep.mubr.msk.bf16.mxu0 %vm4938_vm0, %v4937_v0  ;;  %vm744_vm1 = vcmask 261120   ;;  %v3809_v4 = vcombine.low %v5506_v3, %v5506_v3  ;;  %v3810_v5 = vld [vmem:[#allocation7] ss:$0 sm:$0xff]  ;;  %s4939_s18 = smov 104  }
 0x1b7   : > { %3965 = vmatprep.subr.bf16.mxu1 %v4937_v0  ;;  %3967 = vmatprep.mubr.msk.bf16.mxu1 %vm4938_vm0, %v4937_v0  ;;  %s4940_s16 = smov 120   ;;  %s4941_s27 = smov 96   ;;  %v5541_v16 = vshrl.u32 %v714_v15, 7  ;;  %v5543_v17 = vand.u32 127, %v714_v15  ;;  %v4943_v18 = vmov 1983009808  }
 0x1b8   : > { %3958 = vmatpush3.bf16.msra.mxu0 %v4337_v1  ;;  %s4942_s29 = smov 112   ;;  %v802_v19 = vunpack.c.l.s4 %v4943_v18  ;;  %v4944_v20 = vmov 1934713408   ;;  %vm1250_vm3 = vcmask 64512   ;;  %s4946_s20 = smov 64   ;;  %vm1486_vm4 = vcmask 1043456  }
 0x1b9   : > { %3959 = vmatprep.subr.bf16.mxu0 %v4937_v0  ;;  %vm718_vm2 = vcmp.le.s32.totalorder %v5543_v17, %v5541_v16  ;;  %v834_v21 = vunpack.c.l.s4 %v4944_v20  ;;  %s4947_s30 = smov 16   ;;  %s4948_s1 = smov 8   ;;  %vm1817_vm5 = vcmask 130048   ;;  %vm1819_vm6 = vcmask 195584  }
 0x1ba   : > { %v803_v22 = vunpack.c.0.s8 %v802_v19  ;;  %s4949_s2 = smov 24   ;;  %vm2027_vm7 = vcmask 523264   ;;  %s3891_s0 = sshll.u32 %s6048_s22, 6 }
 0x1bb   : > { %v835_v25 = vunpack.c.0.s8 %v834_v21  ;;  %s710_s23 = scalar_lea.vmem [#allocation26], %s3793_s24  ;;  %s3557_s22 = scalar_lea.sflag [#allocation4], %s5462_s25 }
 0x1bc   : > { %3960 = vmatpush3.bf16.msra.mxu0 %v4338_v2  ;;  %v5548_v26 = vsub.s32 %v803_v22, %v5541_v16  ;;  %s3570_s3 = sshll.u32 %s710_s23, 4  ;;  %p6064_p9 = scmp.ne.s32.totalorder %s6040_s17, 0  ;;  %s5936_s3 = int_to_ptr.vmem [resolvable:$true] %s3570_s3 }
 0x1bd   : > { %3971 = vmatprep.subr.bf16.mxu0 %v4937_v0  ;;  %v5551_v33 = vsub.s32 %v835_v25, %v5541_v16  ;;  %s4950_s24 = smov [#allocation26]  }
 0x1bf   : > { %3962 = vmatmul.mubr.msk.bf16.vlgmr.msra.gmra.mrb[0].mxu0 %vm744_vm1, %v3809_v4 }
 0x1c0   : > { %3973 = vmatprep.mubr.msk.bf16.mxu0 %vm4938_vm0, %v4937_v0 }
 0x292   : > { %v782_v6 = vpop.f32.mrb[0].mxu0 }
 0x293   : > { %v5515_v7 = vadd.f32 %v3810_v5, %v782_v6  ;;  %v3963_v8 = vpop.f32.mrb[1].mxu0 }
 0x294   : > { %v785_v9 = vpop.f32.mrb[2].mxu0 }
 0x295   : > { %944 = vrot.lane.b32.xlu1 %v5515_v7, %s4939_s18  ;;  %940 = vrot.lane.b32.xlu0 %v5515_v7, %s4940_s16  ;;  %v3964_v10 = vpop.f32.mrb[3].mxu0  ;;  %v788_v14 = vmul.f32 0.35355338, %v5515_v7 }
 0x299   : > { %946 = vrot.lane.b32.xlu1 %v5515_v7, %s4941_s27  ;;  %942 = vrot.lane.b32.xlu0 %v5515_v7, %s4942_s29 }
 0x307   : > { %v5525_v11 = vpop.permute.xlu0 %940  ;;  %v5529_v12 = vpop.permute.xlu1 %944 }
 0x308   : > { %948 = vrot.lane.b32.xlu0 %v5525_v11, %s4941_s27 }
 0x30b   : > { %v5531_v13 = vpop.permute.xlu0 %942  ;;  %v947_v23 = vpop.permute.xlu1 %946 }
 0x30c   : > { %952 = vrot.lane.b32.xlu0 %v5529_v12, %s4941_s27  ;;  %950 = vrot.lane.b32.xlu1 %v5531_v13, %s4941_s27 }
 0x310   : > { %793 = vrot.lane.b32.xlu0 %v788_v14, %s4942_s29  ;;  %790 = vrot.lane.b32.xlu1 %v788_v14, %s4940_s16 }
 0x314   : > { %796 = vrot.lane.b32.xlu1 %v788_v14, %s4939_s18 }
 0x37a   : > { %v949_v24 = vpop.permute.xlu0 %948 }
 0x37e   : > { %v951_v27 = vpop.permute.xlu1 %950  ;;  %v953_v28 = vpop.permute.xlu0 %952 }
 0x37f   : > { %v958_v29 = vcombine.low %v947_v23, %v951_v27  ;;  %v959_v30 = vcombine.high %v947_v23, %v951_v27  ;;  %v974_v31 = vcombine.low %v949_v24, %v953_v28  ;;  %v975_v32 = vcombine.high %v949_v24, %v953_v28 }
 0x381   : > { %v966_v34 = vrot.slane %v958_v29, %v5548_v26  ;;  %v973_v35 = vrot.slane %v959_v30, %v5548_v26  ;;  %v982_v36 = vrot.slane %v974_v31, %v5548_v26  ;;  %v989_v37 = vrot.slane %v975_v32, %v5548_v26 }
 0x382   : > { %v791_v38 = vpop.permute.xlu1 %790  ;;  %v794_v43 = vpop.permute.xlu0 %793 }
 0x383   : > { %v990_v39 = vcombine.low %v966_v34, %v982_v36  ;;  %v991_v40 = vcombine.high %v966_v34, %v982_v36  ;;  %v1006_v41 = vcombine.low %v973_v35, %v989_v37  ;;  %v1007_v42 = vcombine.high %v973_v35, %v989_v37 }
 0x384   : > { %v799_v48 = vcombine.low %v788_v14, %v794_v43  ;;  %v800_v49 = vcombine.high %v788_v14, %v794_v43 }
 0x385   : > { %v998_v44 = vrot.slane %v990_v39, %v5551_v33  ;;  %v1005_v45 = vrot.slane %v991_v40, %v5551_v33  ;;  %v1014_v46 = vrot.slane %v1006_v41, %v5551_v33  ;;  %v1021_v47 = vrot.slane %v1007_v42, %v5551_v33 }
 0x386   : > { %v797_v50 = vpop.permute.xlu1 %796  ;;  %v807_v61 = vrot.slane %v799_v48, %v5548_v26  ;;  %v814_v62 = vrot.slane %v800_v49, %v5548_v26 }
 0x387   : > { %v1026_v51 = vcombine.low %v998_v44, %v1005_v45  ;;  %v3816_v52 = vcombine.high %v998_v44, %v1005_v45  ;;  %v1042_v53 = vcombine.low %v1014_v46, %v1021_v47  ;;  %v3817_v54 = vcombine.high %v1014_v46, %v1021_v47 }
 0x388   : > { %v815_v55 = vcombine.low %v791_v38, %v797_v50  ;;  %v816_v56 = vcombine.high %v791_v38, %v797_v50 }
 0x389   : > { %v1033_v57 = vrot.slane %v1026_v51, %v5548_v26  ;;  %v1041_v58 = vrot.slane %v3816_v52, %v5548_v26  ;;  %v1049_v59 = vrot.slane %v1042_v53, %v5548_v26  ;;  %v1057_v60 = vrot.slane %v3817_v54, %v5548_v26 }
 0x38a   : > { %v823_v63 = vrot.slane %v815_v55, %v5548_v26  ;;  %v830_v1 = vrot.slane %v816_v56, %v5548_v26 }
 0x38b   : > { %v1058_v2 = vcombine.low %v1033_v57, %v1041_v58  ;;  %v1074_v4 = vcombine.low %v1049_v59, %v1057_v60  ;;  %v1059_v15 = vcombine.high %v1033_v57, %v1041_v58  ;;  %v1075_v18 = vcombine.high %v1049_v59, %v1057_v60 }
 0x38c   : > { %v831_v5 = vcombine.low %v807_v61, %v823_v63  ;;  %v832_v6 = vcombine.high %v807_v61, %v823_v63  ;;  %v847_v8 = vcombine.low %v814_v62, %v830_v1  ;;  %v848_v9 = vcombine.high %v814_v62, %v830_v1 }
 0x38d   : > { %v1066_v10 = vrot.slane %v1058_v2, %v5551_v33  ;;  %v1082_v14 = vrot.slane %v1074_v4, %v5551_v33  ;;  %v1073_v32 = vrot.slane %v1059_v15, %v5551_v33  ;;  %v1089_v34 = vrot.slane %v1075_v18, %v5551_v33 }
 0x38e   : > { %v839_v19 = vrot.slane %v831_v5, %v5551_v33  ;;  %v846_v20 = vrot.slane %v832_v6, %v5551_v33  ;;  %v855_v21 = vrot.slane %v847_v8, %v5551_v33  ;;  %v862_v22 = vrot.slane %v848_v9, %v5551_v33 }
 0x38f   : > { %v1090_v23 = vcombine.low %v1066_v10, %v1082_v14  ;;  %v1091_v24 = vcombine.high %v1066_v10, %v1082_v14  ;;  %v1092_v43 = vcombine.low %v1073_v32, %v1089_v34  ;;  %v1093_v44 = vcombine.high %v1073_v32, %v1089_v34 }
 0x390   : > { %v867_v25 = vcombine.low %v839_v19, %v846_v20  ;;  %v3814_v27 = vcombine.high %v839_v19, %v846_v20  ;;  %v883_v28 = vcombine.low %v855_v21, %v862_v22  ;;  %v3815_v29 = vcombine.high %v855_v21, %v862_v22 }
 0x391   : > { %v1094_v30 = vpack.c.bf16 %v1090_v23, %v1090_v23  ;;  %v1095_v31 = vpack.c.bf16 %v1091_v24, %v1091_v24  ;;  %v1096_v51 = vpack.c.bf16 %v1092_v43, %v1092_v43  ;;  %v1097_v52 = vpack.c.bf16 %v1093_v44, %v1093_v44 }
 0x392   : > { %v874_v35 = vrot.slane %v867_v25, %v5548_v26  ;;  %v882_v36 = vrot.slane %v3814_v27, %v5548_v26  ;;  %v890_v37 = vrot.slane %v883_v28, %v5548_v26  ;;  %v898_v38 = vrot.slane %v3815_v29, %v5548_v26 }
 0x393   : > { %v1255_v39 = vsel %vm1250_vm3, %v1094_v30, 0  ;;  %v1301_v40 = vsel %vm1250_vm3, %v1095_v31, 0  ;;  %v1347_v57 = vsel %vm1250_vm3, %v1096_v51, 0  ;;  %v1393_v58 = vsel %vm1250_vm3, %v1097_v52, 0 }
 0x394   : > { %3966 = vmatpush3.bf16.xpose.msra.mxu1 %v1255_v39  ;;  %3972 = vmatpush3.bf16.xpose.msra.mxu0 %v1301_v40  ;;  %v899_v41 = vcombine.low %v874_v35, %v882_v36  ;;  %v915_v42 = vcombine.low %v890_v37, %v898_v38  ;;  %v900_v46 = vcombine.high %v874_v35, %v882_v36  ;;  %v4945_v63 = vmov -1e+30  }
 0x395   : > { %3977 = vmatprep.subr.bf16.mxu1 %v4937_v0  ;;  %3983 = vmatprep.subr.bf16.mxu0 %v4937_v0  ;;  %v916_v47 = vcombine.high %v890_v37, %v898_v38  ;;  %v5608_v1 = vsel %vm718_vm2, 0.0, %v4945_v63 }
 0x396   : > { %v907_v45 = vrot.slane %v899_v41, %v5551_v33  ;;  %v923_v48 = vrot.slane %v915_v42, %v5551_v33  ;;  %v914_v55 = vrot.slane %v900_v46, %v5551_v33 }
 0x397   : > { %v930_v56 = vrot.slane %v916_v47, %v5551_v33 }
 0x398   : > { %v931_v49 = vcombine.low %v907_v45, %v923_v48  ;;  %v932_v50 = vcombine.high %v907_v45, %v923_v48 }
 0x399   : > { %v933_v59 = vcombine.low %v914_v55, %v930_v56  ;;  %v934_v60 = vcombine.high %v914_v55, %v930_v56 }
 0x39a   : > { %v935_v53 = vpack.c.bf16 %v931_v49, %v931_v49  ;;  %v936_v54 = vpack.c.bf16 %v932_v50, %v932_v50 }
 0x39b   : > { %v937_v61 = vpack.c.bf16 %v933_v59, %v933_v59  ;;  %v938_v62 = vpack.c.bf16 %v934_v60, %v934_v60 }
 0x39c   : > { %3968 = vmatmul.mubr.msk.bf16.vlgmr.msra.gmra.mrb[0].mxu1 %vm1250_vm3, %v935_v53  ;;  %3974 = vmatmul.mubr.msk.bf16.vlgmr.msra.gmra.mrb[4].mxu0 %vm1250_vm3, %v936_v54 }
 0x39d   : > { %3978 = vmatpush3.bf16.xpose.msra.mxu1 %v1347_v57  ;;  %3984 = vmatpush3.bf16.xpose.msra.mxu0 %v1393_v58 }
 0x39e   : > { %3979 = vmatprep.mubr.msk.bf16.mxu1 %vm4938_vm0, %v4937_v0  ;;  %3985 = vmatprep.mubr.msk.bf16.mxu0 %vm4938_vm0, %v4937_v0 }
 0x39f   : > { %3989 = vmatprep.subr.bf16.mxu1 %v4937_v0  ;;  %3995 = vmatprep.subr.bf16.mxu0 %v4937_v0 }
 0x3a4   : > { %3980 = vmatmul.mubr.msk.bf16.vlgmr.msra.gmra.mrb[4].mxu1 %vm1250_vm3, %v937_v61  ;;  %3986 = vmatmul.mubr.msk.bf16.vlgmr.msra.gmra.mrb[8].mxu0 %vm1250_vm3, %v938_v62 }
 0x3a5   : > { %3991 = vmatprep.mubr.msk.bf16.mxu1 %vm4938_vm0, %v4937_v0  ;;  %3997 = vmatprep.mubr.msk.bf16.mxu0 %vm4938_vm0, %v4937_v0 }
 0x46f   : > { %v1291_v2 = vpop.f32.mrb[0].mxu1  ;;  %v1337_v4 = vpop.f32.mrb[4].mxu0 }
 0x470   : > { %v1292_v5 = vadd.f32 %v1291_v2, %v5608_v1  ;;  %v1338_v6 = vadd.f32 %v1337_v4, %v5608_v1  ;;  %v3969_v8 = vpop.f32.mrb[1].mxu1  ;;  %v3975_v9 = vpop.f32.mrb[5].mxu0 }
 0x471   : > { %v1294_v10 = vpop.f32.mrb[2].mxu1  ;;  %v1340_v14 = vpop.f32.mrb[6].mxu0 }
 0x472   : > { %v3970_v15 = vpop.f32.mrb[3].mxu1  ;;  %v3976_v18 = vpop.f32.mrb[7].mxu0  ;;  %v1435_v19 = vsel %vm1250_vm3, %v1292_v5, -inf  ;;  %v1438_v20 = vsel %vm1250_vm3, %v1338_v6, -inf }
 0x473   : > { %1436 = vmax.xlane.f32.xlu0 %v1435_v19  ;;  %1439 = vmax.xlane.f32.xlu1 %v1438_v20 }
 0x477   : > { %v1383_v16 = vpop.f32.mrb[4].mxu1  ;;  %v1429_v17 = vpop.f32.mrb[8].mxu0 }
 0x478   : > { %v1384_v21 = vadd.f32 %v1383_v16, %v5608_v1  ;;  %v3981_v22 = vpop.f32.mrb[5].mxu1  ;;  %v3987_v23 = vpop.f32.mrb[9].mxu0  ;;  %v1430_v27 = vadd.f32 %v1429_v17, %v5608_v1 }
 0x479   : > { %v1386_v24 = vpop.f32.mrb[6].mxu1  ;;  %v1432_v25 = vpop.f32.mrb[10].mxu0 }
 0x47a   : > { %v3982_v28 = vpop.f32.mrb[7].mxu1  ;;  %v3988_v29 = vpop.f32.mrb[11].mxu0  ;;  %v1441_v30 = vsel %vm1250_vm3, %v1384_v21, -inf  ;;  %v1444_v31 = vsel %vm1250_vm3, %v1430_v27, -inf }
 0x47b   : > { %1442 = vmax.xlane.f32.xlu0 %v1441_v30 }
 0x47f   : > { %1445 = vmax.xlane.f32.xlu0 %v1444_v31 }
 0x484   : > { %1098 = vrot.lane.b32.xlu1 %v5515_v7, %s4946_s20 }
 0x500   : > { %v1437_v32 = vpop.xlane.xlu0 %1436  ;;  %v1440_v34 = vpop.xlane.xlu1 %1439 }
 0x501   : > { %v1447_v35 = vsub.f32 %v1292_v5, %v1437_v32  ;;  %v1448_v36 = vsub.f32 %v1338_v6, %v1440_v34 }
 0x503   : > { %v1451_v37 = vmul.f32 1.442695, %v1447_v35  ;;  %v1453_v38 = vmul.f32 1.442695, %v1448_v36 }
 0x505   : > { %4360 = vpow2.f32 %v1451_v37 }
 0x506   : > { %4362 = vpow2.f32 %v1453_v38 }
 0x508   : > { %v1443_v7 = vpop.xlane.xlu0 %1442 }
 0x509   : > { %v1449_v43 = vsub.f32 %v1384_v21, %v1443_v7 }
 0x50b   : > { %v1455_v46 = vmul.f32 1.442695, %v1449_v43 }
 0x50c   : > { %v1446_v44 = vpop.xlane.xlu0 %1445 }
 0x50d   : > { %v1450_v45 = vsub.f32 %v1430_v27, %v1446_v44  ;;  %4364 = vpow2.f32 %v1455_v46 }
 0x50f   : > { %v5620_v39 = vpop.eup %4360  ;;  %v1457_v47 = vmul.f32 1.442695, %v1450_v45 }
 0x510   : > { %v5622_v40 = vpop.eup %4362  ;;  %v1459_v41 = vsel %vm1250_vm3, %v5620_v39, 0.0 }
 0x511   : > { %1460 = vadd.xlane.f32.xlu1 %v1459_v41  ;;  %v1462_v42 = vsel %vm1250_vm3, %v5622_v40, 0.0  ;;  %4366 = vpow2.f32 %v1457_v47 }
 0x512   : > { %1463 = vadd.xlane.f32.xlu0 %v1462_v42 }
 0x517   : > { %v5634_v48 = vpop.eup %4364 }
 0x51b   : > { %v5636_v49 = vpop.eup %4366 }
 0x522   : > { %1102 = vrot.lane.b32.xlu1 %v5531_v13, %s4946_s20  ;;  %v1465_v13 = vsel %vm1250_vm3, %v5634_v48, 0.0 }
 0x526   : > { %1104 = vrot.lane.b32.xlu1 %v5529_v12, %s4946_s20  ;;  %v1468_v12 = vsel %vm1250_vm3, %v5636_v49, 0.0 }
 0x528   : > { %1100 = vrot.lane.b32.xlu0 %v5525_v11, %s4946_s20  ;;  %v1099_v11 = vpop.permute.xlu1 %1098 }
 0x547   : > { %1466 = vadd.xlane.f32.xlu0 %v1465_v13 }
 0x54a   : > { %1469 = vadd.xlane.f32.xlu1 %v1468_v12 }
 0x59e   : > { %v1461_v50 = vpop.xlane.xlu1 %1460 }
 0x59f   : > { %v1464_v51 = vpop.xlane.xlu0 %1463  ;;  %4368 = vrcp.f32 %v1461_v50 }
 0x5a0   : > { %4370 = vrcp.f32 %v1464_v51 }
 0x5a2   : > { %v1103_v52 = vpop.permute.xlu1 %1102 }
 0x5a3   : > { %v1110_v53 = vcombine.low %v1099_v11, %v1103_v52  ;;  %v1111_v54 = vcombine.high %v1099_v11, %v1103_v52  ;;  %v1101_v55 = vpop.permute.xlu0 %1100 }
 0x5a5   : > { %v1118_v59 = vrot.slane %v1110_v53, %v5548_v26  ;;  %v1125_v60 = vrot.slane %v1111_v54, %v5548_v26 }
 0x5a6   : > { %v1105_v56 = vpop.permute.xlu1 %1104 }
 0x5a7   : > { %v1126_v57 = vcombine.low %v1101_v55, %v1105_v56  ;;  %v1127_v58 = vcombine.high %v1101_v55, %v1105_v56 }
 0x5a9   : > { %v1134_v61 = vrot.slane %v1126_v57, %v5548_v26  ;;  %v1141_v62 = vrot.slane %v1127_v58, %v5548_v26  ;;  %v4369_v29 = vpop.eup %4368 }
 0x5aa   : > { %v4371_v32 = vpop.eup %4370  ;;  %v1472_v38 = vmul.f32 %v4369_v29, %v5620_v39 }
 0x5ab   : > { %v1142_v63 = vcombine.low %v1118_v59, %v1134_v61  ;;  %v1143_v2 = vcombine.high %v1118_v59, %v1134_v61  ;;  %v1158_v4 = vcombine.low %v1125_v60, %v1141_v62  ;;  %v1159_v5 = vcombine.high %v1125_v60, %v1141_v62 }
 0x5ac   : > { %v1474_v41 = vmul.f32 %v4371_v32, %v5622_v40  ;;  %v1479_v47 = vpack.c.bf16 %v1472_v38, %v1472_v38 }
 0x5ad   : > { %v1150_v6 = vrot.slane %v1142_v63, %v5551_v33  ;;  %v1157_v8 = vrot.slane %v1143_v2, %v5551_v33  ;;  %v1166_v9 = vrot.slane %v1158_v4, %v5551_v33  ;;  %v1173_v10 = vrot.slane %v1159_v5, %v5551_v33 }
 0x5ae   : > { %v1480_v13 = vpack.c.bf16 %v1474_v41, %v1474_v41 }
 0x5af   : > { %v1178_v14 = vcombine.low %v1150_v6, %v1157_v8  ;;  %v3818_v15 = vcombine.high %v1150_v6, %v1157_v8  ;;  %v1194_v18 = vcombine.low %v1166_v9, %v1173_v10  ;;  %v3819_v19 = vcombine.high %v1166_v9, %v1173_v10 }
 0x5b1   : > { %v1185_v20 = vrot.slane %v1178_v14, %v5548_v26  ;;  %v1193_v16 = vrot.slane %v3818_v15, %v5548_v26  ;;  %v1201_v17 = vrot.slane %v1194_v18, %v5548_v26  ;;  %v1209_v21 = vrot.slane %v3819_v19, %v5548_v26 }
 0x5b3   : > { %v1210_v22 = vcombine.low %v1185_v20, %v1193_v16  ;;  %v1211_v23 = vcombine.high %v1185_v20, %v1193_v16  ;;  %v1226_v24 = vcombine.low %v1201_v17, %v1209_v21  ;;  %v1227_v25 = vcombine.high %v1201_v17, %v1209_v21 }
 0x5b5   : > { %v1218_v27 = vrot.slane %v1210_v22, %v5551_v33  ;;  %v1225_v28 = vrot.slane %v1211_v23, %v5551_v33  ;;  %v1234_v30 = vrot.slane %v1226_v24, %v5551_v33  ;;  %v1241_v31 = vrot.slane %v1227_v25, %v5551_v33  ;;  %v4340_v25 = vld [vmem:[#allocation8] sm:$0xff]  }
 0x5b7   : > { %v1242_v34 = vcombine.low %v1218_v27, %v1234_v30  ;;  %v1243_v35 = vcombine.high %v1218_v27, %v1234_v30  ;;  %v1244_v36 = vcombine.low %v1225_v28, %v1241_v31  ;;  %v1245_v37 = vcombine.high %v1225_v28, %v1241_v31 }
 0x5b9   : > { %v1246_v42 = vpack.c.bf16 %v1242_v34, %v1242_v34  ;;  %v1247_v7 = vpack.c.bf16 %v1243_v35, %v1243_v35  ;;  %v1248_v45 = vpack.c.bf16 %v1244_v36, %v1244_v36  ;;  %v1249_v46 = vpack.c.bf16 %v1245_v37, %v1245_v37  ;;  %v4341_v36 = vld [vmem:[#allocation8 + $0x8] sm:$0xff]  }
 0x5bb   : > { %v1488_v43 = vsel %vm1486_vm4, %v1246_v42, 0  ;;  %v1534_v44 = vsel %vm1486_vm4, %v1247_v7, 0  ;;  %v1580_v39 = vsel %vm1486_vm4, %v1248_v45, 0  ;;  %v1626_v40 = vsel %vm1486_vm4, %v1249_v46, 0 }
 0x5bc   : > { %3990 = vmatpush3.bf16.msra.mxu1 %v1488_v43  ;;  %3996 = vmatpush3.bf16.msra.mxu0 %v1534_v44 }
 0x5bd   : > { %4001 = vmatprep.subr.bf16.mxu1 %v4937_v0  ;;  %4007 = vmatprep.subr.bf16.mxu0 %v4937_v0 }
 0x5bf   : > { %3992 = vmatmul.mubr.msk.bf16.vlgmr.msra.gmra.mrb[8].mxu1 %vm1250_vm3, %v1479_v47  ;;  %3998 = vmatmul.mubr.msk.bf16.vlgmr.msra.gmra.mrb[12].mxu0 %vm1250_vm3, %v1480_v13 }
 0x5c0   : > { %4002 = vmatpush3.bf16.msra.mxu1 %v1580_v39  ;;  %4008 = vmatpush3.bf16.msra.mxu0 %v1626_v40 }
 0x5c1   : > { %4003 = vmatprep.mubr.msk.bf16.mxu1 %vm4938_vm0, %v4937_v0  ;;  %4009 = vmatprep.mubr.msk.bf16.mxu0 %vm4938_vm0, %v4937_v0 }
 0x5c2   : > { %4013 = vmatprep.subr.bf16.mxu1 %v4937_v0  ;;  %4021 = vmatprep.subr.bf16.mxu0 %v4937_v0 }
 0x5d4   : > { %v1467_v12 = vpop.xlane.xlu0 %1466 }
 0x5d5   : > { %4372 = vrcp.f32 %v1467_v12 }
 0x5d7   : > { %v1470_v11 = vpop.xlane.xlu1 %1469 }
 0x5d8   : > { %4374 = vrcp.f32 %v1470_v11 }
 0x5df   : > { %v4373_v50 = vpop.eup %4372 }
 0x5e0   : > { %v1476_v51 = vmul.f32 %v4373_v50, %v5634_v48 }
 0x5e2   : > { %v4375_v52 = vpop.eup %4374  ;;  %v1481_v53 = vpack.c.bf16 %v1476_v51, %v1476_v51 }
 0x5e3   : > { %v1478_v54 = vmul.f32 %v4375_v52, %v5636_v49 }
 0x5e4   : > { %4004 = vmatmul.mubr.msk.bf16.vlgmr.msra.gmra.mrb[12].mxu1 %vm1250_vm3, %v1481_v53 }
 0x5e5   : > { %v1482_v55 = vpack.c.bf16 %v1478_v54, %v1478_v54  ;;  %4017 = vmatprep.mubr.msk.bf16.mxu1 %vm4938_vm0, %v4937_v0  ;;  %4014 = vmatpush3.bf16.msra.mxu1 %v4340_v25 }
 0x5e6   : > { %4015 = vmatprep.subr.bf16.mxu1 %v4937_v0 }
 0x5e7   : > { %4010 = vmatmul.mubr.msk.bf16.vlgmr.msra.gmra.mrb[16].mxu0 %vm1250_vm3, %v1482_v55 }
 0x5e8   : > { %4025 = vmatprep.mubr.msk.bf16.mxu0 %vm4938_vm0, %v4937_v0 }
 0x5e9   : > { %4016 = vmatpush3.bf16.msra.mxu1 %v4341_v36 }
 0x5ea   : > { %4029 = vmatprep.subr.bf16.mxu1 %v4937_v0 }
 0x692   : > { %v1524_v56 = vpop.f32.mrb[8].mxu1  ;;  %v1570_v57 = vpop.f32.mrb[12].mxu0 }
 0x693   : > { %v3993_v58 = vpop.f32.mrb[9].mxu1  ;;  %v3999_v59 = vpop.f32.mrb[13].mxu0 }
 0x694   : > { %v1527_v48 = vpop.f32.mrb[10].mxu1  ;;  %v1573_v60 = vpop.f32.mrb[14].mxu0  ;;  %v3830_v58 = vld [vmem:[#allocation10] ss:$0 sm:$0xff]  ;;  %v713_v59 = vunpack.c.l.bf16 %v5506_v3  ;;  %v4344_v3 = vld [vmem:[#allocation17] sm:$0xff]  }
 0x695   : > { %v3994_v61 = vpop.f32.mrb[11].mxu1  ;;  %v4000_v62 = vpop.f32.mrb[15].mxu0 }
 0x6b7   : > { %v1616_v49 = vpop.f32.mrb[12].mxu1 }
 0x6b8   : > { %v1668_v63 = vcombine.low %v1524_v56, %v1616_v49  ;;  %v1669_v2 = vcombine.high %v1524_v56, %v1616_v49  ;;  %v4005_v4 = vpop.f32.mrb[13].mxu1 }
 0x6b9   : > { %v1619_v5 = vpop.f32.mrb[14].mxu1 }
 0x6ba   : > { %v4006_v6 = vpop.f32.mrb[15].mxu1  ;;  %v1662_v8 = vpop.f32.mrb[16].mxu0  ;;  %v1676_v18 = vrot.slane %v1668_v63, %v5548_v26  ;;  %v1683_v19 = vrot.slane %v1669_v2, %v5548_v26 }
 0x6bb   : > { %v1684_v9 = vcombine.low %v1570_v57, %v1662_v8  ;;  %v1685_v10 = vcombine.high %v1570_v57, %v1662_v8  ;;  %v4011_v14 = vpop.f32.mrb[17].mxu0 }
 0x6bc   : > { %v1665_v15 = vpop.f32.mrb[18].mxu0  ;;  %v4343_v14 = vld [vmem:[#allocation14 + $0x8] sm:$0xff]  }
 0x6bd   : > { %v1692_v20 = vrot.slane %v1684_v9, %v5548_v26  ;;  %v1699_v16 = vrot.slane %v1685_v10, %v5548_v26  ;;  %v4012_v17 = vpop.f32.mrb[19].mxu0  ;;  %v4342_v10 = vld [vmem:[#allocation14] sm:$0xff]   ;;  %v4345_v15 = vld [vmem:[#allocation17 + $0x8] sm:$0xff]  }
 0x6be   : > { %4022 = vmatpush3.bf16.msra.mxu0 %v4342_v10  ;;  %v3834_v17 = vld [vmem:[#allocation11] ss:$0 sm:$0xff] }
 0x6bf   : > { %v1700_v21 = vcombine.low %v1676_v18, %v1692_v20  ;;  %v1701_v22 = vcombine.high %v1676_v18, %v1692_v20  ;;  %v1716_v23 = vcombine.low %v1683_v19, %v1699_v16  ;;  %v1717_v24 = vcombine.high %v1683_v19, %v1699_v16  ;;  %4023 = vmatprep.subr.bf16.mxu0 %v4937_v0 }
 0x6c1   : > { %v1708_v27 = vrot.slane %v1700_v21, %v5551_v33  ;;  %v1715_v28 = vrot.slane %v1701_v22, %v5551_v33  ;;  %v1724_v29 = vrot.slane %v1716_v23, %v5551_v33  ;;  %v1731_v30 = vrot.slane %v1717_v24, %v5551_v33  ;;  %v3835_v22 = vld [vmem:[#allocation13] ss:$0 sm:$0xff] }
 0x6c2   : > { %4024 = vmatpush3.bf16.msra.mxu0 %v4343_v14 }
 0x6c3   : > { %v1736_v31 = vcombine.low %v1708_v27, %v1715_v28  ;;  %v3828_v32 = vcombine.high %v1708_v27, %v1715_v28  ;;  %v1752_v34 = vcombine.low %v1724_v29, %v1731_v30  ;;  %v3829_v35 = vcombine.high %v1724_v29, %v1731_v30  ;;  %4041 = vmatprep.subr.bf16.mxu0 %v4937_v0  ;;  %v4346_v27 = vld [vmem:[#allocation17 + $0x10] sm:$0xff]   ;;  %v4347_v28 = vld [vmem:[#allocation17 + $0x18] sm:$0xff]  }
 0x6c4   : > { %v3836_v29 = vld [vmem:[#allocation16] ss:$0 sm:$0xff] }
 0x6c5   : > { %v1743_v37 = vrot.slane %v1736_v31, %v5548_v26  ;;  %v1751_v38 = vrot.slane %v3828_v32, %v5548_v26  ;;  %v1759_v41 = vrot.slane %v1752_v34, %v5548_v26  ;;  %v1767_v42 = vrot.slane %v3829_v35, %v5548_v26 }
 0x6c7   : > { %v1769_v7 = vcombine.high %v1743_v37, %v1751_v38  ;;  %v1785_v43 = vcombine.high %v1759_v41, %v1767_v42  ;;  %v1768_v44 = vcombine.low %v1743_v37, %v1751_v38  ;;  %v1784_v45 = vcombine.low %v1759_v41, %v1767_v42  ;;  %v3840_v38 = vld [vmem:[#allocation19] ss:$0 sm:$0xff] }
 0x6c9   : > { %v1783_v46 = vrot.slane %v1769_v7, %v5551_v33  ;;  %v1799_v47 = vrot.slane %v1785_v43, %v5551_v33  ;;  %v1776_v13 = vrot.slane %v1768_v44, %v5551_v33  ;;  %v1792_v39 = vrot.slane %v1784_v45, %v5551_v33 }
 0x6cb   : > { %v1802_v40 = vcombine.low %v1783_v46, %v1799_v47  ;;  %v1801_v12 = vcombine.high %v1776_v13, %v1792_v39  ;;  %v1803_v11 = vcombine.high %v1783_v46, %v1799_v47  ;;  %v1800_v50 = vcombine.low %v1776_v13, %v1792_v39 }
 0x6cd   : > { %1809 = vrot.lane.b32.xlu1 %v1802_v40, %s4947_s30  ;;  %1805 = vrot.lane.b32.xlu0 %v1801_v12, %s4948_s1 }
 0x6d1   : > { %1813 = vrot.lane.b32.xlu0 %v1803_v11, %s4949_s2  ;;  %v4348_v11 = vld [vmem:[#allocation5 + $0x10] sm:$0xff]  }
 0x73f   : > { %v1806_v51 = vpop.permute.xlu0 %1805  ;;  %v1810_v52 = vpop.permute.xlu1 %1809 }
 0x740   : > { %v1816_v53 = vsel %vm1250_vm3, %v1800_v50, %v1806_v51  ;;  %v4349_v50 = vld [vmem:[#allocation5 + $0x18] sm:$0xff]  }
 0x741   : > { %v1818_v55 = vsel %vm1817_vm5, %v1816_v53, %v1810_v52 }
 0x743   : > { %v1814_v54 = vpop.permute.xlu0 %1813 }
 0x744   : > { %v1820_v56 = vsel %vm1819_vm6, %v1818_v55, %v1814_v54  ;;  %v3846_v55 = vld [vmem:[#allocation20] ss:$0 sm:$0xff] }
 0x745   : > { %v1821_v57 = vpack.c.bf16 %v1820_v56, %v1820_v56 }
 0x747   : > { %4018 = vmatmul.mubr.msk.bf16.vlgmr.msra.gmra.mrb[16].mxu1 %vm744_vm1, %v1821_v57  ;;  %v3847_v57 = vld [vmem:[#allocation22] ss:$0 sm:$0xff] }
 0x748   : > { %4037 = vmatprep.mubr.msk.bf16.mxu1 %vm4938_vm0, %v4937_v0  ;;  %4030 = vmatpush3.bf16.msra.mxu1 %v4344_v3 }
 0x749   : > { %4031 = vmatprep.subr.bf16.mxu1 %v4937_v0 }
 0x74c   : > { %4032 = vmatpush3.bf16.msra.mxu1 %v4345_v15 }
 0x74d   : > { %4033 = vmatprep.subr.bf16.mxu1 %v4937_v0 }
 0x750   : > { %4034 = vmatpush3.bf16.msra.mxu1 %v4346_v27 }
 0x751   : > { %4035 = vmatprep.subr.bf16.mxu1 %v4937_v0 }
 0x754   : > { %4036 = vmatpush3.bf16.msra.mxu1 %v4347_v28 }
 0x755   : > { %4055 = vmatprep.subr.bf16.mxu1 %v4937_v0 }
 0x81a   : > { %v1882_v48 = vpop.f32.mrb[16].mxu1 }
 0x81b   : > { %v1883_v60 = vadd.f32 %v3830_v58, %v1882_v48  ;;  %v4019_v61 = vpop.f32.mrb[17].mxu1 }
 0x81c   : > { %v1885_v62 = vpop.f32.mrb[18].mxu1 }
 0x81d   : > { %v4020_v49 = vpop.f32.mrb[19].mxu1  ;;  %v1888_v63 = vadd.f32 %v1883_v60, %v713_v59  ;;  %v3848_v60 = vld [vmem:[#allocation7 + $0x1] ss:$0 sm:$0xff] }
 0x81f   : > { %v1891_v2 = vsel %vm744_vm1, %v1888_v63, 0.0 }
 0x820   : > { %1892 = vadd.xlane.f32.xlu1 %v1891_v2 }
 0x8ad   : > { %v1893_v4 = vpop.xlane.xlu1 %1892 }
 0x8ae   : > { %v1895_v5 = vmul.f32 0.03125, %v1893_v4 }
 0x8b0   : > { %v1896_v6 = vsub.f32 %v1888_v63, %v1895_v5 }
 0x8b2   : > { %v1897_v8 = vmul.f32 %v1896_v6, %v1896_v6 }
 0x8b4   : > { %v1898_v9 = vsel %vm744_vm1, %v1897_v8, 0.0 }
 0x8b5   : > { %1899 = vadd.xlane.f32.xlu0 %v1898_v9 }
 0x942   : > { %v1900_v18 = vpop.xlane.xlu0 %1899 }
 0x943   : > { %v1901_v19 = vmul.f32 0.03125, %v1900_v18 }
 0x945   : > { %v1902_v20 = vadd.f32 1e-05, %v1901_v19 }
 0x947   : > { %4376 = vrsqrt.f32 %v1902_v20 }
 0x951   : > { %v4377_v16 = vpop.eup %4376 }
 0x952   : > { %v1904_v21 = vmul.f32 %v4377_v16, %v1896_v6 }
 0x954   : > { %v1911_v23 = vmul.f32 %v3834_v17, %v1904_v21 }
 0x956   : > { %v1918_v24 = vadd.f32 %v3835_v22, %v1911_v23 }
 0x958   : > { %v1919_v25 = vpack.c.bf16 %v1918_v24, %v1918_v24 }
 0x95a   : > { %4026 = vmatmul.mubr.msk.bf16.vlgmr.msra.gmra.mrb[20].mxu0 %vm744_vm1, %v1919_v25 }
 0x95b   : > { %4045 = vmatprep.mubr.msk.bf16.mxu0 %vm4938_vm0, %v4937_v0  ;;  %4042 = vmatpush3.bf16.msra.mxu0 %v4348_v11 }
 0x95c   : > { %4043 = vmatprep.subr.bf16.mxu0 %v4937_v0 }
 0x95f   : > { %4044 = vmatpush3.bf16.msra.mxu0 %v4349_v50 }
 0x960   : > { %4049 = vmatprep.subr.bf16.mxu0 %v4937_v0 }
 0xa2d   : > { %v1980_v30 = vpop.f32.mrb[20].mxu0 }
 0xa2e   : > { %v1981_v31 = vadd.f32 %v3836_v29, %v1980_v30  ;;  %v4027_v32 = vpop.f32.mrb[21].mxu0 }
 0xa2f   : > { %v1983_v34 = vpop.f32.mrb[22].mxu0 }
 0xa30   : > { %v1986_v35 = vmax.f32 %v1981_v31, 0.0  ;;  %v4028_v36 = vpop.f32.mrb[23].mxu0 }
 0xa32   : > { %v1987_v37 = vpack.c.bf16 %v1986_v35, %v1986_v35 }
 0xa34   : > { %4038 = vmatmul.mubr.msk.bf16.vlgmr.msra.gmra.mrb[20].mxu1 %vm2027_vm7, %v1987_v37 }
 0xa35   : > { %4057 = vmatprep.mubr.msk.bf16.mxu1 %vm4938_vm0, %v4937_v0 }
 0xb07   : > { %v2065_v41 = vpop.f32.mrb[20].mxu1 }
 0xb08   : > { %v2066_v42 = vadd.f32 %v3840_v38, %v2065_v41  ;;  %v4039_v7 = vpop.f32.mrb[21].mxu1 }
 0xb09   : > { %v2068_v43 = vpop.f32.mrb[22].mxu1 }
 0xb0a   : > { %v4040_v44 = vpop.f32.mrb[23].mxu1  ;;  %v2071_v45 = vadd.f32 %v2066_v42, %v1918_v24 }
 0xb0c   : > { %v2074_v46 = vsel %vm744_vm1, %v2071_v45, 0.0 }
 0xb0d   : > { %2075 = vadd.xlane.f32.xlu0 %v2074_v46 }
 0xb9a   : > { %v2076_v47 = vpop.xlane.xlu0 %2075 }
 0xb9b   : > { %v2077_v13 = vmul.f32 0.03125, %v2076_v47 }
 0xb9d   : > { %v2078_v39 = vsub.f32 %v2071_v45, %v2077_v13 }
 0xb9f   : > { %v2079_v40 = vmul.f32 %v2078_v39, %v2078_v39 }
 0xba1   : > { %v2080_v12 = vsel %vm744_vm1, %v2079_v40, 0.0 }
 0xba2   : > { %2081 = vadd.xlane.f32.xlu1 %v2080_v12 }
 0xc2f   : > { %v2082_v51 = vpop.xlane.xlu1 %2081 }
 0xc30   : > { %v2083_v52 = vmul.f32 0.03125, %v2082_v51 }
 0xc32   : > { %v2084_v53 = vadd.f32 1e-05, %v2083_v52 }
 0xc34   : > { %4378 = vrsqrt.f32 %v2084_v53 }
 0xc3e   : > { %v4379_v54 = vpop.eup %4378 }
 0xc3f   : > { %v2086_v56 = vmul.f32 %v4379_v54, %v2078_v39 }
 0xc41   : > { %v2093_v58 = vmul.f32 %v3846_v55, %v2086_v56 }
 0xc43   : > { %v5728_v59 = vadd.f32 %v3847_v57, %v2093_v58 }
 0xc45   : > { %v2101_v48 = vpack.c.bf16 %v5728_v59, %v5728_v59 }
 0xc47   : > { %4046 = vmatmul.mubr.msk.bf16.vlgmr.msra.gmra.mrb[24].mxu0 %vm744_vm1, %v2101_v48 }
 0xc48   : > { %4051 = vmatprep.mubr.msk.bf16.mxu0 %vm4938_vm0, %v4937_v0 }
 0xd1a   : > { %v2164_v61 = vpop.f32.mrb[24].mxu0 }
 0xd1b   : > { %v5735_v62 = vadd.f32 %v3848_v60, %v2164_v61  ;;  %v4047_v49 = vpop.f32.mrb[25].mxu0 }
 0xd1c   : > { %v2167_v63 = vpop.f32.mrb[26].mxu0 }
 0xd1d   : > { %2324 = vrot.lane.b32.xlu1 %v5735_v62, %s4942_s29  ;;  %2322 = vrot.lane.b32.xlu0 %v5735_v62, %s4940_s16  ;;  %v4048_v2 = vpop.f32.mrb[27].mxu0  ;;  %v2170_v6 = vmul.f32 0.35355338, %v5735_v62 }
 0xd21   : > { %2326 = vrot.lane.b32.xlu1 %v5735_v62, %s4939_s18  ;;  %2328 = vrot.lane.b32.xlu0 %v5735_v62, %s4941_s27 }
 0xd8f   : > { %v5745_v4 = vpop.permute.xlu1 %2324  ;;  %v5747_v5 = vpop.permute.xlu0 %2322 }
 0xd90   : > { %2332 = vrot.lane.b32.xlu0 %v5745_v4, %s4941_s27  ;;  %2330 = vrot.lane.b32.xlu1 %v5747_v5, %s4941_s27 }
 0xd93   : > { %v5754_v8 = vpop.permute.xlu1 %2326  ;;  %v2329_v9 = vpop.permute.xlu0 %2328 }
 0xd94   : > { %2334 = vrot.lane.b32.xlu1 %v5754_v8, %s4941_s27  ;;  %2172 = vrot.lane.b32.xlu0 %v2170_v6, %s4940_s16  ;;  %s6063_s27 = sld [smem:[#allocation45_spill]] }
 0xd98   : > { %2175 = vrot.lane.b32.xlu1 %v2170_v6, %s4942_s29  ;;  %2178 = vrot.lane.b32.xlu0 %v2170_v6, %s4939_s18 }
 0xd9a   : > { %s5934_s29 = scalar_lea.hbm %s6063_s27, %s3891_s0 }
 0xe02   : > { %v2331_v10 = vpop.permute.xlu1 %2330  ;;  %v2333_v14 = vpop.permute.xlu0 %2332 }
 0xe03   : > { %v2340_v3 = vcombine.low %v2329_v9, %v2333_v14  ;;  %v2341_v15 = vcombine.high %v2329_v9, %v2333_v14 }
 0xe05   : > { %v2348_v17 = vrot.slane %v2340_v3, %v5548_v26  ;;  %v2355_v21 = vrot.slane %v2341_v15, %v5548_v26 }
 0xe06   : > { %v2335_v18 = vpop.permute.xlu1 %2334  ;;  %v2173_v19 = vpop.permute.xlu0 %2172 }
 0xe07   : > { %v2356_v20 = vcombine.low %v2331_v10, %v2335_v18  ;;  %v2357_v16 = vcombine.high %v2331_v10, %v2335_v18 }
 0xe09   : > { %v2364_v22 = vrot.slane %v2356_v20, %v5548_v26  ;;  %v2371_v23 = vrot.slane %v2357_v16, %v5548_v26 }
 0xe0a   : > { %v2176_v24 = vpop.permute.xlu1 %2175  ;;  %v2179_v25 = vpop.permute.xlu0 %2178 }
 0xe0b   : > { %v2372_v27 = vcombine.low %v2348_v17, %v2364_v22  ;;  %v2373_v28 = vcombine.high %v2348_v17, %v2364_v22  ;;  %v2388_v29 = vcombine.low %v2355_v21, %v2371_v23  ;;  %v2389_v30 = vcombine.high %v2355_v21, %v2371_v23 }
 0xe0c   : > { %v2181_v31 = vcombine.low %v2170_v6, %v2176_v24  ;;  %v2182_v32 = vcombine.high %v2170_v6, %v2176_v24  ;;  %v2197_v34 = vcombine.low %v2173_v19, %v2179_v25  ;;  %v2198_v35 = vcombine.high %v2173_v19, %v2179_v25 }
 0xe0d   : > { %v2380_v36 = vrot.slane %v2372_v27, %v5551_v33  ;;  %v2387_v37 = vrot.slane %v2373_v28, %v5551_v33  ;;  %v2396_v38 = vrot.slane %v2388_v29, %v5551_v33  ;;  %v2403_v41 = vrot.slane %v2389_v30, %v5551_v33 }
 0xe0e   : > { %v2189_v42 = vrot.slane %v2181_v31, %v5548_v26  ;;  %v2196_v7 = vrot.slane %v2182_v32, %v5548_v26  ;;  %v2205_v43 = vrot.slane %v2197_v34, %v5548_v26  ;;  %v2212_v44 = vrot.slane %v2198_v35, %v5548_v26 }
 0xe0f   : > { %v2408_v45 = vcombine.low %v2380_v36, %v2387_v37  ;;  %v3854_v46 = vcombine.high %v2380_v36, %v2387_v37  ;;  %v2424_v47 = vcombine.low %v2396_v38, %v2403_v41  ;;  %v3855_v13 = vcombine.high %v2396_v38, %v2403_v41 }
 0xe10   : > { %v2213_v39 = vcombine.low %v2189_v42, %v2205_v43  ;;  %v2214_v40 = vcombine.high %v2189_v42, %v2205_v43  ;;  %v2229_v12 = vcombine.low %v2196_v7, %v2212_v44  ;;  %v2230_v11 = vcombine.high %v2196_v7, %v2212_v44 }
 0xe11   : > { %v2415_v50 = vrot.slane %v2408_v45, %v5548_v26  ;;  %v2423_v51 = vrot.slane %v3854_v46, %v5548_v26  ;;  %v2431_v52 = vrot.slane %v2424_v47, %v5548_v26  ;;  %v2439_v53 = vrot.slane %v3855_v13, %v5548_v26 }
 0xe12   : > { %v2221_v54 = vrot.slane %v2213_v39, %v5551_v33  ;;  %v2228_v55 = vrot.slane %v2214_v40, %v5551_v33  ;;  %v2237_v56 = vrot.slane %v2229_v12, %v5551_v33  ;;  %v2244_v57 = vrot.slane %v2230_v11, %v5551_v33 }
 0xe13   : > { %v2440_v58 = vcombine.low %v2415_v50, %v2423_v51  ;;  %v2456_v48 = vcombine.low %v2431_v52, %v2439_v53  ;;  %v2441_v60 = vcombine.high %v2415_v50, %v2423_v51  ;;  %v2457_v61 = vcombine.high %v2431_v52, %v2439_v53 }
 0xe14   : > { %v2249_v49 = vcombine.low %v2221_v54, %v2228_v55  ;;  %v3852_v63 = vcombine.high %v2221_v54, %v2228_v55  ;;  %v2265_v2 = vcombine.low %v2237_v56, %v2244_v57  ;;  %v3853_v6 = vcombine.high %v2237_v56, %v2244_v57 }
 0xe15   : > { %v2448_v9 = vrot.slane %v2440_v58, %v5551_v33  ;;  %v2464_v10 = vrot.slane %v2456_v48, %v5551_v33  ;;  %v2455_v16 = vrot.slane %v2441_v60, %v5551_v33  ;;  %v2471_v17 = vrot.slane %v2457_v61, %v5551_v33 }
 0xe16   : > { %v2256_v14 = vrot.slane %v2249_v49, %v5548_v26  ;;  %v2264_v3 = vrot.slane %v3852_v63, %v5548_v26  ;;  %v2272_v15 = vrot.slane %v2265_v2, %v5548_v26  ;;  %v2280_v18 = vrot.slane %v3853_v6, %v5548_v26 }
 0xe17   : > { %v2472_v19 = vcombine.low %v2448_v9, %v2464_v10  ;;  %v2473_v20 = vcombine.high %v2448_v9, %v2464_v10  ;;  %v2474_v30 = vcombine.low %v2455_v16, %v2471_v17  ;;  %v2475_v31 = vcombine.high %v2455_v16, %v2471_v17 }
 0xe18   : > { %v2281_v21 = vcombine.low %v2256_v14, %v2264_v3  ;;  %v2297_v22 = vcombine.low %v2272_v15, %v2280_v18  ;;  %v2282_v32 = vcombine.high %v2256_v14, %v2264_v3  ;;  %v2298_v34 = vcombine.high %v2272_v15, %v2280_v18 }
 0xe19   : > { %v2476_v23 = vpack.c.bf16 %v2472_v19, %v2472_v19  ;;  %v2477_v24 = vpack.c.bf16 %v2473_v20, %v2473_v20  ;;  %v2478_v37 = vpack.c.bf16 %v2474_v30, %v2474_v30  ;;  %v2479_v38 = vpack.c.bf16 %v2475_v31, %v2475_v31 }
 0xe1a   : > { %v2289_v25 = vrot.slane %v2281_v21, %v5551_v33  ;;  %v2305_v27 = vrot.slane %v2297_v22, %v5551_v33  ;;  %v2296_v7 = vrot.slane %v2282_v32, %v5551_v33  ;;  %v2312_v43 = vrot.slane %v2298_v34, %v5551_v33 }
 0xe1b   : > { %v2636_v28 = vsel %vm1250_vm3, %v2476_v23, 0  ;;  %v2682_v29 = vsel %vm1250_vm3, %v2477_v24, 0  ;;  %v2728_v44 = vsel %vm1250_vm3, %v2478_v37, 0  ;;  %v2774_v45 = vsel %vm1250_vm3, %v2479_v38, 0 }
 0xe1c   : > { %4050 = vmatpush3.bf16.xpose.msra.mxu0 %v2636_v28  ;;  %4056 = vmatpush3.bf16.xpose.msra.mxu1 %v2682_v29  ;;  %v2313_v35 = vcombine.low %v2289_v25, %v2305_v27  ;;  %v2314_v36 = vcombine.high %v2289_v25, %v2305_v27  ;;  %v2315_v46 = vcombine.low %v2296_v7, %v2312_v43 }
 0xe1d   : > { %4061 = vmatprep.subr.bf16.mxu0 %v4937_v0  ;;  %4067 = vmatprep.subr.bf16.mxu1 %v4937_v0  ;;  %v2316_v47 = vcombine.high %v2296_v7, %v2312_v43 }
 0xe1e   : > { %v2317_v41 = vpack.c.bf16 %v2313_v35, %v2313_v35  ;;  %v2318_v42 = vpack.c.bf16 %v2314_v36, %v2314_v36  ;;  %v2319_v13 = vpack.c.bf16 %v2315_v46, %v2315_v46 }
 0xe1f   : > { %v2320_v39 = vpack.c.bf16 %v2316_v47, %v2316_v47 }
 0xe23   : > { %4052 = vmatmul.mubr.msk.bf16.vlgmr.msra.gmra.mrb[28].mxu0 %vm1250_vm3, %v2317_v41  ;;  %4058 = vmatmul.mubr.msk.bf16.vlgmr.msra.gmra.mrb[24].mxu1 %vm1250_vm3, %v2318_v42 }
 0xe24   : > { %4062 = vmatpush3.bf16.xpose.msra.mxu0 %v2728_v44  ;;  %4068 = vmatpush3.bf16.xpose.msra.mxu1 %v2774_v45 }
 0xe25   : > { %4063 = vmatprep.mubr.msk.bf16.mxu0 %vm4938_vm0, %v4937_v0  ;;  %4069 = vmatprep.mubr.msk.bf16.mxu1 %vm4938_vm0, %v4937_v0 }
 0xe26   : > { %4073 = vmatprep.subr.bf16.mxu0 %v4937_v0  ;;  %4079 = vmatprep.subr.bf16.mxu1 %v4937_v0 }
 0xe2b   : > { %4064 = vmatmul.mubr.msk.bf16.vlgmr.msra.gmra.mrb[32].mxu0 %vm1250_vm3, %v2319_v13  ;;  %4070 = vmatmul.mubr.msk.bf16.vlgmr.msra.gmra.mrb[28].mxu1 %vm1250_vm3, %v2320_v39 }
 0xe2c   : > { %4075 = vmatprep.mubr.msk.bf16.mxu0 %vm4938_vm0, %v4937_v0  ;;  %4081 = vmatprep.mubr.msk.bf16.mxu1 %vm4938_vm0, %v4937_v0 }
 0xef6   : > { %v2672_v40 = vpop.f32.mrb[28].mxu0  ;;  %v2718_v12 = vpop.f32.mrb[24].mxu1 }
 0xef7   : > { %v2673_v11 = vadd.f32 %v2672_v40, %v5608_v1  ;;  %v2719_v50 = vadd.f32 %v2718_v12, %v5608_v1  ;;  %v4053_v51 = vpop.f32.mrb[29].mxu0  ;;  %v4059_v52 = vpop.f32.mrb[25].mxu1 }
 0xef8   : > { %v2675_v53 = vpop.f32.mrb[30].mxu0  ;;  %v2721_v54 = vpop.f32.mrb[26].mxu1 }
 0xef9   : > { %v4054_v55 = vpop.f32.mrb[31].mxu0  ;;  %v4060_v56 = vpop.f32.mrb[27].mxu1  ;;  %v2819_v57 = vsel %vm1250_vm3, %v2719_v50, -inf  ;;  %v2816_v58 = vsel %vm1250_vm3, %v2673_v11, -inf }
 0xefa   : > { %2820 = vmax.xlane.f32.xlu0 %v2819_v57  ;;  %2817 = vmax.xlane.f32.xlu1 %v2816_v58 }
 0xefe   : > { %v2764_v48 = vpop.f32.mrb[32].mxu0  ;;  %v2810_v60 = vpop.f32.mrb[28].mxu1 }
 0xeff   : > { %v2765_v61 = vadd.f32 %v2764_v48, %v5608_v1  ;;  %v2811_v49 = vadd.f32 %v2810_v60, %v5608_v1  ;;  %v4065_v63 = vpop.f32.mrb[33].mxu0  ;;  %v4071_v2 = vpop.f32.mrb[29].mxu1 }
 0xf00   : > { %v2767_v6 = vpop.f32.mrb[34].mxu0  ;;  %v2813_v9 = vpop.f32.mrb[30].mxu1 }
 0xf01   : > { %v4066_v10 = vpop.f32.mrb[35].mxu0  ;;  %v4072_v14 = vpop.f32.mrb[31].mxu1  ;;  %v2825_v3 = vsel %vm1250_vm3, %v2811_v49, -inf  ;;  %v2822_v15 = vsel %vm1250_vm3, %v2765_v61, -inf }
 0xf02   : > { %2826 = vmax.xlane.f32.xlu1 %v2825_v3  ;;  %2823 = vmax.xlane.f32.xlu0 %v2822_v15 }
 0xf13   : > { %2482 = vrot.lane.b32.xlu1 %v5747_v5, %s4946_s20 }
 0xf18   : > { %2480 = vrot.lane.b32.xlu0 %v5735_v62, %s4946_s20 }
 0xf87   : > { %v2821_v18 = vpop.xlane.xlu0 %2820  ;;  %v2818_v1 = vpop.xlane.xlu1 %2817 }
 0xf88   : > { %v2829_v19 = vsub.f32 %v2719_v50, %v2821_v18  ;;  %v2828_v20 = vsub.f32 %v2673_v11, %v2818_v1 }
 0xf8a   : > { %v2834_v16 = vmul.f32 1.442695, %v2829_v19  ;;  %v2832_v17 = vmul.f32 1.442695, %v2828_v20 }
 0xf8c   : > { %4380 = vpow2.f32 %v2834_v16 }
 0xf8d   : > { %4382 = vpow2.f32 %v2832_v17 }
 0xf8f   : > { %v2824_v62 = vpop.xlane.xlu0 %2823  ;;  %v2827_v24 = vpop.xlane.xlu1 %2826 }
 0xf90   : > { %v2830_v25 = vsub.f32 %v2765_v61, %v2824_v62  ;;  %v2831_v27 = vsub.f32 %v2811_v49, %v2827_v24 }
 0xf92   : > { %v2836_v28 = vmul.f32 1.442695, %v2830_v25  ;;  %v2838_v29 = vmul.f32 1.442695, %v2831_v27 }
 0xf93   : > { %v2481_v34 = vpop.permute.xlu0 %2480 }
 0xf94   : > { %4384 = vpow2.f32 %v2836_v28 }
 0xf95   : > { %4386 = vpow2.f32 %v2838_v29 }
 0xf96   : > { %v5825_v21 = vpop.eup %4380 }
 0xf97   : > { %v5827_v22 = vpop.eup %4382  ;;  %v2843_v23 = vsel %vm1250_vm3, %v5825_v21, 0.0 }
 0xf98   : > { %2844 = vadd.xlane.f32.xlu1 %v2843_v23  ;;  %v2840_v5 = vsel %vm1250_vm3, %v5827_v22, 0.0 }
 0xf99   : > { %2841 = vadd.xlane.f32.xlu0 %v2840_v5 }
 0xf9e   : > { %v5837_v30 = vpop.eup %4384 }
 0xf9f   : > { %v5839_v31 = vpop.eup %4386  ;;  %v2846_v32 = vsel %vm1250_vm3, %v5837_v30, 0.0 }
 0xfa9   : > { %2484 = vrot.lane.b32.xlu1 %v5745_v4, %s4946_s20  ;;  %v2849_v4 = vsel %vm1250_vm3, %v5839_v31, 0.0 }
 0xfaf   : > { %2486 = vrot.lane.b32.xlu0 %v5754_v8, %s4946_s20  ;;  %v2483_v8 = vpop.permute.xlu1 %2482  ;;  %s4822_s20 = scalar_lea.vmem %s5936_s3, 64 }
 0xfb0   : > { %p4823_p7 = scmp.ne.s32.totalorder %s5936_s3, %s4822_s20 }
 0xfb2   : > { %p4824_p4 = pnand %p4823_p7, %p6064_p9 }
 0xfb4   : > { %p4825_p8 = pneg %p4824_p4 }
 0xfcd   : > { %2847 = vadd.xlane.f32.xlu1 %v2846_v32 }
 0xfce   : > { %2850 = vadd.xlane.f32.xlu0 %v2849_v4 }
0x1025   : > { %v2845_v35 = vpop.xlane.xlu1 %2844 }
0x1026   : > { %v2842_v36 = vpop.xlane.xlu0 %2841  ;;  %4388 = vrcp.f32 %v2845_v35 }
0x1027   : > { %4390 = vrcp.f32 %v2842_v36 }
0x1029   : > { %v2485_v37 = vpop.permute.xlu1 %2484 }
0x102a   : > { %v2492_v38 = vcombine.low %v2481_v34, %v2485_v37  ;;  %v2493_v41 = vcombine.high %v2481_v34, %v2485_v37  ;;  %v2487_v42 = vpop.permute.xlu0 %2486 }
0x102b   : > { %v2508_v7 = vcombine.low %v2483_v8, %v2487_v42  ;;  %v2509_v43 = vcombine.high %v2483_v8, %v2487_v42 }
0x102c   : > { %v2500_v44 = vrot.slane %v2492_v38, %v5548_v26  ;;  %v2507_v45 = vrot.slane %v2493_v41, %v5548_v26 }
0x102d   : > { %v2516_v46 = vrot.slane %v2508_v7, %v5548_v26  ;;  %v2523_v47 = vrot.slane %v2509_v43, %v5548_v26 }
0x102f   : > { %v2524_v13 = vcombine.low %v2500_v44, %v2516_v46  ;;  %v2525_v39 = vcombine.high %v2500_v44, %v2516_v46  ;;  %v2540_v40 = vcombine.low %v2507_v45, %v2523_v47  ;;  %v2541_v12 = vcombine.high %v2507_v45, %v2523_v47 }
0x1030   : > { %v4389_v10 = vpop.eup %4388 }
0x1031   : > { %v2532_v11 = vrot.slane %v2524_v13, %v5551_v33  ;;  %v2539_v50 = vrot.slane %v2525_v39, %v5551_v33  ;;  %v2548_v51 = vrot.slane %v2540_v40, %v5551_v33  ;;  %v2555_v52 = vrot.slane %v2541_v12, %v5551_v33  ;;  %v4391_v15 = vpop.eup %4390 }
0x1032   : > { %v2855_v16 = vmul.f32 %v4389_v10, %v5825_v21  ;;  %v2853_v17 = vmul.f32 %v4391_v15, %v5827_v22 }
0x1033   : > { %v2560_v53 = vcombine.low %v2532_v11, %v2539_v50  ;;  %v3856_v54 = vcombine.high %v2532_v11, %v2539_v50  ;;  %v2576_v55 = vcombine.low %v2548_v51, %v2555_v52  ;;  %v3857_v56 = vcombine.high %v2548_v51, %v2555_v52 }
0x1034   : > { %v2860_v28 = vpack.c.bf16 %v2853_v17, %v2853_v17  ;;  %v2861_v29 = vpack.c.bf16 %v2855_v16, %v2855_v16 }
0x1035   : > { %v2567_v57 = vrot.slane %v2560_v53, %v5548_v26  ;;  %v2575_v58 = vrot.slane %v3856_v54, %v5548_v26  ;;  %v2583_v48 = vrot.slane %v2576_v55, %v5548_v26  ;;  %v2591_v60 = vrot.slane %v3857_v56, %v5548_v26 }
0x1037   : > { %v2592_v61 = vcombine.low %v2567_v57, %v2575_v58  ;;  %v2593_v49 = vcombine.high %v2567_v57, %v2575_v58  ;;  %v2608_v63 = vcombine.low %v2583_v48, %v2591_v60  ;;  %v2609_v2 = vcombine.high %v2583_v48, %v2591_v60 }
0x1039   : > { %v2600_v6 = vrot.slane %v2592_v61, %v5551_v33  ;;  %v2607_v9 = vrot.slane %v2593_v49, %v5551_v33  ;;  %v2616_v14 = vrot.slane %v2608_v63, %v5551_v33  ;;  %v2623_v3 = vrot.slane %v2609_v2, %v5551_v33  ;;  %v4350_v63 = vld [vmem:[#allocation8 + $0x10] sm:$0xff]  }
0x103b   : > { %v2624_v18 = vcombine.low %v2600_v6, %v2616_v14  ;;  %v2625_v1 = vcombine.high %v2600_v6, %v2616_v14  ;;  %v2626_v19 = vcombine.low %v2607_v9, %v2623_v3  ;;  %v2627_v20 = vcombine.high %v2607_v9, %v2623_v3 }
0x103d   : > { %v2628_v23 = vpack.c.bf16 %v2624_v18, %v2624_v18  ;;  %v2629_v5 = vpack.c.bf16 %v2625_v1, %v2625_v1  ;;  %v2630_v25 = vpack.c.bf16 %v2626_v19, %v2626_v19  ;;  %v2631_v27 = vpack.c.bf16 %v2627_v20, %v2627_v20  ;;  %v4351_v1 = vld [vmem:[#allocation8 + $0x18] sm:$0xff]  }
0x103f   : > { %v2868_v62 = vsel %vm1486_vm4, %v2628_v23, 0  ;;  %v2914_v24 = vsel %vm1486_vm4, %v2629_v5, 0  ;;  %v2960_v21 = vsel %vm1486_vm4, %v2630_v25, 0  ;;  %v3006_v22 = vsel %vm1486_vm4, %v2631_v27, 0 }
0x1040   : > { %4074 = vmatpush3.bf16.msra.mxu0 %v2868_v62  ;;  %4080 = vmatpush3.bf16.msra.mxu1 %v2914_v24 }
0x1041   : > { %4085 = vmatprep.subr.bf16.mxu0 %v4937_v0  ;;  %4091 = vmatprep.subr.bf16.mxu1 %v4937_v0 }
0x1043   : > { %4076 = vmatmul.mubr.msk.bf16.vlgmr.msra.gmra.mrb[36].mxu0 %vm1250_vm3, %v2860_v28  ;;  %4082 = vmatmul.mubr.msk.bf16.vlgmr.msra.gmra.mrb[32].mxu1 %vm1250_vm3, %v2861_v29 }
0x1044   : > { %4086 = vmatpush3.bf16.msra.mxu0 %v2960_v21  ;;  %4092 = vmatpush3.bf16.msra.mxu1 %v3006_v22 }
0x1045   : > { %4087 = vmatprep.mubr.msk.bf16.mxu0 %vm4938_vm0, %v4937_v0  ;;  %4093 = vmatprep.mubr.msk.bf16.mxu1 %vm4938_vm0, %v4937_v0 }
0x1046   : > { %4097 = vmatprep.subr.bf16.mxu0 %v4937_v0  ;;  %4105 = vmatprep.subr.bf16.mxu1 %v4937_v0 }
0x105a   : > { %v2848_v32 = vpop.xlane.xlu1 %2847 }
0x105b   : > { %4392 = vrcp.f32 %v2848_v32  ;;  %v2851_v4 = vpop.xlane.xlu0 %2850 }
0x105c   : > { %4394 = vrcp.f32 %v2851_v4 }
0x1065   : > { %v4393_v8 = vpop.eup %4392 }
0x1066   : > { %v4395_v34 = vpop.eup %4394  ;;  %v2857_v35 = vmul.f32 %v4393_v8, %v5837_v30 }
0x1067   : > { %v2859_v36 = vmul.f32 %v4395_v34, %v5839_v31 }
0x1068   : > { %v2862_v37 = vpack.c.bf16 %v2857_v35, %v2857_v35 }
0x1069   : > { %v2863_v38 = vpack.c.bf16 %v2859_v36, %v2859_v36 }
0x106a   : > { %4088 = vmatmul.mubr.msk.bf16.vlgmr.msra.gmra.mrb[40].mxu0 %vm1250_vm3, %v2862_v37 }
0x106b   : > { %4094 = vmatmul.mubr.msk.bf16.vlgmr.msra.gmra.mrb[36].mxu1 %vm1250_vm3, %v2863_v38  ;;  %4101 = vmatprep.mubr.msk.bf16.mxu0 %vm4938_vm0, %v4937_v0  ;;  %v3868_v38 = vld [vmem:[#allocation10 + $0x1] ss:$0 sm:$0xff] }
0x106c   : > { %4109 = vmatprep.mubr.msk.bf16.mxu1 %vm4938_vm0, %v4937_v0  ;;  %4098 = vmatpush3.bf16.msra.mxu0 %v4350_v63 }
0x106d   : > { %4099 = vmatprep.subr.bf16.mxu0 %v4937_v0 }
0x1070   : > { %4100 = vmatpush3.bf16.msra.mxu0 %v4351_v1 }
0x1071   : > { %4113 = vmatprep.subr.bf16.mxu0 %v4937_v0 }
0x1116   : > { %v2904_v41 = vpop.f32.mrb[36].mxu0  ;;  %v2950_v42 = vpop.f32.mrb[32].mxu1 }
0x1117   : > { %v4077_v7 = vpop.f32.mrb[37].mxu0  ;;  %v4083_v43 = vpop.f32.mrb[33].mxu1 }
0x1118   : > { %v2907_v44 = vpop.f32.mrb[38].mxu0  ;;  %v2953_v30 = vpop.f32.mrb[34].mxu1 }
0x1119   : > { %v4078_v45 = vpop.f32.mrb[39].mxu0  ;;  %v4084_v31 = vpop.f32.mrb[35].mxu1 }
0x113d   : > { %v2996_v46 = vpop.f32.mrb[40].mxu0 }
0x113e   : > { %v3048_v47 = vcombine.low %v2904_v41, %v2996_v46  ;;  %v3049_v13 = vcombine.high %v2904_v41, %v2996_v46  ;;  %v3042_v39 = vpop.f32.mrb[36].mxu1  ;;  %v4089_v40 = vpop.f32.mrb[41].mxu0 }
0x113f   : > { %v3064_v12 = vcombine.low %v2950_v42, %v3042_v39  ;;  %v3065_v11 = vcombine.high %v2950_v42, %v3042_v39  ;;  %v4095_v50 = vpop.f32.mrb[37].mxu1  ;;  %v2999_v51 = vpop.f32.mrb[42].mxu0  ;;  %v4352_v40 = vld [vmem:[#allocation14 + $0x10] sm:$0xff]  }
0x1140   : > { %v3056_v52 = vrot.slane %v3048_v47, %v5548_v26  ;;  %v3063_v53 = vrot.slane %v3049_v13, %v5548_v26  ;;  %v3045_v54 = vpop.f32.mrb[38].mxu1  ;;  %v4090_v55 = vpop.f32.mrb[43].mxu0  ;;  %4106 = vmatpush3.bf16.msra.mxu1 %v4352_v40 }
0x1141   : > { %v3072_v56 = vrot.slane %v3064_v12, %v5548_v26  ;;  %v3079_v57 = vrot.slane %v3065_v11, %v5548_v26  ;;  %v4096_v58 = vpop.f32.mrb[39].mxu1  ;;  %v4353_v12 = vld [vmem:[#allocation14 + $0x18] sm:$0xff]   ;;  %4107 = vmatprep.subr.bf16.mxu1 %v4937_v0  ;;  %v4354_v11 = vld [vmem:[#allocation17 + $0x20] sm:$0xff]  }
0x1142   : > { %v3872_v54 = vld [vmem:[#allocation11 + $0x1] ss:$0 sm:$0xff] }
0x1143   : > { %v3080_v48 = vcombine.low %v3056_v52, %v3072_v56  ;;  %v3081_v60 = vcombine.high %v3056_v52, %v3072_v56  ;;  %v3096_v61 = vcombine.low %v3063_v53, %v3079_v57  ;;  %v3097_v49 = vcombine.high %v3063_v53, %v3079_v57  ;;  %v3873_v56 = vld [vmem:[#allocation13 + $0x1] ss:$0 sm:$0xff] }
0x1144   : > { %4108 = vmatpush3.bf16.msra.mxu1 %v4353_v12 }
0x1145   : > { %v3088_v2 = vrot.slane %v3080_v48, %v5551_v33  ;;  %v3095_v6 = vrot.slane %v3081_v60, %v5551_v33  ;;  %v3104_v9 = vrot.slane %v3096_v61, %v5551_v33  ;;  %v3111_v10 = vrot.slane %v3097_v49, %v5551_v33  ;;  %4125 = vmatprep.subr.bf16.mxu1 %v4937_v0  ;;  %v4356_v60 = vld [vmem:[#allocation17 + $0x30] sm:$0xff]   ;;  %v4357_v61 = vld [vmem:[#allocation17 + $0x38] sm:$0xff]  }
0x1146   : > { %v3874_v49 = vld [vmem:[#allocation16 + $0x1] ss:$0 sm:$0xff] }
0x1147   : > { %v3116_v14 = vcombine.low %v3088_v2, %v3095_v6  ;;  %v3866_v3 = vcombine.high %v3088_v2, %v3095_v6  ;;  %v3132_v15 = vcombine.low %v3104_v9, %v3111_v10  ;;  %v3867_v18 = vcombine.high %v3104_v9, %v3111_v10 }
0x1149   : > { %v3123_v19 = vrot.slane %v3116_v14, %v5548_v26  ;;  %v3131_v20 = vrot.slane %v3866_v3, %v5548_v26  ;;  %v3139_v16 = vrot.slane %v3132_v15, %v5548_v26  ;;  %v3147_v17 = vrot.slane %v3867_v18, %v5548_v26  ;;  %v3878_v15 = vld [vmem:[#allocation19 + $0x1] ss:$0 sm:$0xff] }
0x114b   : > { %v3149_v23 = vcombine.high %v3123_v19, %v3131_v20  ;;  %v3165_v5 = vcombine.high %v3139_v16, %v3147_v17  ;;  %v3148_v62 = vcombine.low %v3123_v19, %v3131_v20  ;;  %v3164_v24 = vcombine.low %v3139_v16, %v3147_v17 }
0x114d   : > { %v3163_v25 = vrot.slane %v3149_v23, %v5551_v33  ;;  %v3179_v27 = vrot.slane %v3165_v5, %v5551_v33  ;;  %v3156_v28 = vrot.slane %v3148_v62, %v5551_v33  ;;  %v3172_v29 = vrot.slane %v3164_v24, %v5551_v33 }
0x114f   : > { %v3182_v21 = vcombine.low %v3163_v25, %v3179_v27  ;;  %v3181_v22 = vcombine.high %v3156_v28, %v3172_v29  ;;  %v3183_v32 = vcombine.high %v3163_v25, %v3179_v27  ;;  %v3180_v4 = vcombine.low %v3156_v28, %v3172_v29  ;;  %v4358_v28 = vld [vmem:[#allocation23] sm:$0xff]   ;;  %v4359_v29 = vld [vmem:[#allocation23 + $0x8] sm:$0xff]  }
0x1151   : > { %3189 = vrot.lane.b32.xlu1 %v3182_v21, %s4947_s30  ;;  %3185 = vrot.lane.b32.xlu0 %v3181_v22, %s4948_s1  ;;  %s4826_s30 = sshll.u32 %s4950_s24, 4  ;;  %s4827_s30 = int_to_ptr.vmem [resolvable:$false] %s4826_s30 }
0x1152   : > { %s4828_s1 = scalar_lea.vmem %s4827_s30, 128  ;;  %p4829_p0 = scmp.lt.s32.totalorder %s5936_s3, %s4827_s30 }
0x1153   : > { %p4830_p2 = scmp.lt.s32.totalorder %s4828_s1, %s4822_s20 }
0x1155   : > { %3193 = vrot.lane.b32.xlu1 %v3183_v32, %s4949_s2  ;;  %p4831_p6 = por %p4830_p2, %p4829_p0 }
0x1157   : > { %p4832_p5 = pnand %p4831_p6, %p4825_p8 }
0x11c3   : > { %v3190_v26 = vpop.permute.xlu1 %3189  ;;  %v3186_v8 = vpop.permute.xlu0 %3185 }
0x11c4   : > { %v3196_v34 = vsel %vm1250_vm3, %v3180_v4, %v3186_v8 }
0x11c5   : > { %v3197_v36 = vsel %vm1817_vm5, %v3196_v34, %v3190_v26  ;;  %v3884_v26 = vld [vmem:[#allocation20 + $0x1] ss:$0 sm:$0xff]  ;;  %v3885_v34 = vld [vmem:[#allocation22 + $0x1] ss:$0 sm:$0xff] }
0x11c7   : > { %v3194_v35 = vpop.permute.xlu1 %3193 }
0x11c8   : > { %v3198_v37 = vsel %vm1819_vm6, %v3197_v36, %v3194_v35 }
0x11c9   : > { %v3199_v33 = vpack.c.bf16 %v3198_v37, %v3198_v37 }
0x11cb   : > { %4102 = vmatmul.mubr.msk.bf16.vlgmr.msra.gmra.mrb[44].mxu0 %vm744_vm1, %v3199_v33  ;;  %v3886_v33 = vld [vmem:[#allocation25] ss:$0 sm:$0xff] }
0x11cc   : > { %4121 = vmatprep.mubr.msk.bf16.mxu0 %vm4938_vm0, %v4937_v0  ;;  %4114 = vmatpush3.bf16.msra.mxu0 %v4354_v11 }
0x11cd   : > { %4115 = vmatprep.subr.bf16.mxu0 %v4937_v0 }
0x129e   : > { %v3262_v41 = vpop.f32.mrb[44].mxu0 }
0x129f   : > { %v3263_v42 = vadd.f32 %v3868_v38, %v3262_v41  ;;  %v4103_v7 = vpop.f32.mrb[45].mxu0 }
0x12a0   : > { %v3265_v43 = vpop.f32.mrb[46].mxu0 }
0x12a1   : > { %v4104_v44 = vpop.f32.mrb[47].mxu0  ;;  %v3268_v30 = vadd.f32 %v3263_v42, %v5728_v59  ;;  %v4355_v59 = vld [vmem:[#allocation17 + $0x28] sm:$0xff]  }
0x12a2   : > { %4116 = vmatpush3.bf16.msra.mxu0 %v4355_v59 }
0x12a3   : > { %v3273_v45 = vsel %vm744_vm1, %v3268_v30, 0.0  ;;  %4117 = vmatprep.subr.bf16.mxu0 %v4937_v0 }
0x12a4   : > { %3274 = vadd.xlane.f32.xlu0 %v3273_v45 }
0x12a6   : > { %4118 = vmatpush3.bf16.msra.mxu0 %v4356_v60 }
0x12a7   : > { %4119 = vmatprep.subr.bf16.mxu0 %v4937_v0 }
0x12aa   : > { %4120 = vmatpush3.bf16.msra.mxu0 %v4357_v61 }
0x1331   : > { %v3275_v31 = vpop.xlane.xlu0 %3274 }
0x1332   : > { %v3276_v46 = vmul.f32 0.03125, %v3275_v31 }
0x1334   : > { %v3277_v47 = vsub.f32 %v3268_v30, %v3276_v46 }
0x1336   : > { %v3278_v13 = vmul.f32 %v3277_v47, %v3277_v47 }
0x1338   : > { %v3279_v39 = vsel %vm744_vm1, %v3278_v13, 0.0 }
0x1339   : > { %3280 = vadd.xlane.f32.xlu1 %v3279_v39 }
0x13c6   : > { %v3281_v50 = vpop.xlane.xlu1 %3280 }
0x13c7   : > { %v3282_v51 = vmul.f32 0.03125, %v3281_v50 }
0x13c9   : > { %v3283_v52 = vadd.f32 1e-05, %v3282_v51 }
0x13cb   : > { %4396 = vrsqrt.f32 %v3283_v52 }
0x13d5   : > { %v4397_v53 = vpop.eup %4396 }
0x13d6   : > { %v3285_v55 = vmul.f32 %v4397_v53, %v3277_v47 }
0x13d8   : > { %v3292_v57 = vmul.f32 %v3872_v54, %v3285_v55 }
0x13da   : > { %v3299_v58 = vadd.f32 %v3873_v56, %v3292_v57 }
0x13dc   : > { %v3300_v48 = vpack.c.bf16 %v3299_v58, %v3299_v58 }
0x13de   : > { %4110 = vmatmul.mubr.msk.bf16.vlgmr.msra.gmra.mrb[40].mxu1 %vm744_vm1, %v3300_v48 }
0x13df   : > { %4129 = vmatprep.mubr.msk.bf16.mxu1 %vm4938_vm0, %v4937_v0  ;;  %4126 = vmatpush3.bf16.msra.mxu1 %v4358_v28 }
0x13e0   : > { %4127 = vmatprep.subr.bf16.mxu1 %v4937_v0 }
0x13e3   : > { %4128 = vmatpush3.bf16.msra.mxu1 %v4359_v29 }
0x14b1   : > { %v3363_v63 = vpop.f32.mrb[40].mxu1 }
0x14b2   : > { %v3364_v2 = vadd.f32 %v3874_v49, %v3363_v63  ;;  %v4111_v6 = vpop.f32.mrb[41].mxu1 }
0x14b3   : > { %v3366_v9 = vpop.f32.mrb[42].mxu1 }
0x14b4   : > { %v3369_v10 = vmax.f32 %v3364_v2, 0.0  ;;  %v4112_v14 = vpop.f32.mrb[43].mxu1 }
0x14b6   : > { %v3370_v3 = vpack.c.bf16 %v3369_v10, %v3369_v10 }
0x14b8   : > { %4122 = vmatmul.mubr.msk.bf16.vlgmr.msra.gmra.mrb[48].mxu0 %vm2027_vm7, %v3370_v3 }
0x158b   : > { %v3449_v18 = vpop.f32.mrb[48].mxu0 }
0x158c   : > { %v3450_v1 = vadd.f32 %v3878_v15, %v3449_v18  ;;  %v4123_v19 = vpop.f32.mrb[49].mxu0 }
0x158d   : > { %v3452_v20 = vpop.f32.mrb[50].mxu0 }
0x158e   : > { %v4124_v16 = vpop.f32.mrb[51].mxu0  ;;  %v3455_v17 = vadd.f32 %v3450_v1, %v3299_v58 }
0x1590   : > { %v3460_v23 = vsel %vm744_vm1, %v3455_v17, 0.0 }
0x1591   : > { %3461 = vadd.xlane.f32.xlu0 %v3460_v23 }
0x161e   : > { %v3462_v5 = vpop.xlane.xlu0 %3461 }
0x161f   : > { %v3463_v62 = vmul.f32 0.03125, %v3462_v5 }
0x1621   : > { %v3464_v24 = vsub.f32 %v3455_v17, %v3463_v62 }
0x1623   : > { %v3465_v25 = vmul.f32 %v3464_v24, %v3464_v24 }
0x1625   : > { %v3466_v27 = vsel %vm744_vm1, %v3465_v25, 0.0 }
0x1626   : > { %3467 = vadd.xlane.f32.xlu0 %v3466_v27 }
0x16b3   : > { %v3468_v21 = vpop.xlane.xlu0 %3467 }
0x16b4   : > { %v3469_v22 = vmul.f32 0.03125, %v3468_v21 }
0x16b6   : > { %v3470_v32 = vadd.f32 1e-05, %v3469_v22 }
0x16b8   : > { %4398 = vrsqrt.f32 %v3470_v32 }
0x16c2   : > { %v4399_v4 = vpop.eup %4398 }
0x16c3   : > { %v3472_v8 = vmul.f32 %v4399_v4, %v3464_v24 }
0x16c5   : > { %v3479_v35 = vmul.f32 %v3884_v26, %v3472_v8 }
0x16c7   : > { %v3486_v36 = vadd.f32 %v3885_v34, %v3479_v35 }
0x16c9   : > { %v3487_v37 = vpack.c.bf16 %v3486_v36, %v3486_v36 }
0x16cb   : > { %4130 = vmatmul.mubr.msk.bf16.vlgmr.msra.gmra.mrb[44].mxu1 %vm744_vm1, %v3487_v37 }
0x179e   : > { %v3548_v0 = vpop.f32.mrb[44].mxu1 }
0x179f   : > { %v3549_v38 = vadd.f32 %v3886_v33, %v3548_v0  ;;  %v4131_v41 = vpop.f32.mrb[45].mxu1 }
0x17a0   : > { %v3551_v42 = vpop.f32.mrb[46].mxu1 }
0x17a1   : > { %v3554_v7 = vpack.c.bf16 %v3549_v38, %v3549_v38  ;;  %v4132_v43 = vpop.f32.mrb[47].mxu1 }
0x17a3   : > { %3555 = vst [vmem:[%s710_s23] sm:$0xf] %v3554_v7 }
0x17a4   : > { %4835 = shalt.err (!%p4832_p5)
}
0x17a5   : > { %s4836_s25 = scalar_lea.hbm %s5934_s29, 64  ;;  %s4840_s23 = scalar_lea.hbm %s6063_s27, 128 }
0x17a6   : > { %p4837_p10 = scmp.ne.s32.totalorder %s5934_s29, %s4836_s25  ;;  %p4841_p12 = scmp.lt.u32.totalorder %s5934_s29, %s6063_s27 }
0x17a7   : > { %p4842_p13 = scmp.lt.u32.totalorder %s4840_s23, %s4836_s25  ;;  %p4844_p7 = scmp.lt.u32.totalorder %s4836_s25, %s5934_s29 }
0x17a8   : > { %p4838_p1 = pnand %p4837_p10, %p6064_p9 }
0x17a9   : > { %p4843_p3 = por %p4842_p13, %p4841_p12 }
0x17aa   : > { %p4839_p11 = pneg %p4838_p1 }
0x17ab   : > { %p4845_p4 = por %p4844_p7, %p4843_p3 }
0x17ad   : > { %p4846_p8 = pnand %p4845_p4, %p4839_p11 }
0x17af   : > { %4849 = shalt.err (!%p4846_p8)
}
0x17b0   : > { %4191 = dma.vmem_to_hbm [thread:$0]  (%p6064_p9), %s5936_s3, 64, %s5934_s29, %s3557_s22  }
0x17b1 PF: > { %s6065_s20 = sld [smem:[#allocation36_spill]]  ;;  %p6066_p0 = scmp.ne.s32.totalorder %s6041_s15, 0 }
0x17b2   : > { %p6067_p2 = scmp.ge.s32.totalorder %s4916_s21, 2 }
0x17b4   : > { %p4241_p6 = pnand %p6067_p2, %p6066_p0 }
0x17b7   : > { %s3582_s24 = sand.u32 1, %s6065_s20  }
0x17b8   : > { %s3583_s30 = scalar_lea.sflag [#allocation4], %s3582_s24 }
0x17b9   : > { %4899 = dma.done.wait (!%p4241_p6), %s3583_s30, 64  }
0x17ba   : > { %4901 = vsyncadd (!%p4241_p6), %s3583_s30, 4294967232  ;;  %s6068_s18 = sld [smem:[#allocation37_spill]]  ;;  %s6069_s1 = sld [smem:[#allocation38_spill]] }
0x17bb   : > { %s6070_s25 = smov %s5397_s19  ;;  %p35_p5 = scmp.ge.s32.totalorder %s5386_s28, 4  }
0x17bc   : > { %s6072_s20 = smov %s6070_s25  ;;  %s6073_s21 = smov %s5386_s28 }
0x17bd   :  { %37 = sbr.rel (!%p35_p5) target bundleno = 18 (0x12), region = 193 }
0x17c0   : > { %s6071_s19 = smov %s6069_s1 }
0x17c4   :  { %3588 = vsyncpa [#allocation3], 1 }
0x17c5   :  { %3590 = vsyncpa [#allocation3 + $0x1], 1 }
0x17c6   :  { %3591 = vsyncpa [#allocation6], 1 }
0x17c7   :  { %3592 = vsyncpa [#allocation9], 1 }
0x17c8   :  { %3593 = vsyncpa [#allocation12], 1 }
0x17c9   :  { %3594 = vsyncpa [#allocation15], 1 }
0x17ca   :  { %3595 = vsyncpa [#allocation18], 1 }
0x17cb   :  { %3596 = vsyncpa [#allocation21], 1 }
0x17cc   :  { %3597 = vsyncpa [#allocation24], 1 }
0x17cd   :  { %3598 = vsyncpa [#allocation4], 1 }
0x17ce   :  { %3600 = vsyncpa [#allocation4 + $0x1], 1 }

// kernel: tpu_custom_call.1
= control target key start
LH: loop header
LB: loop body
LE: loop exit
PB: predicated region body
PF: predicated region fallthrough
CT: control target
= control target key end

     0   :  { %s5978_s0 = inlined_call_operand.hbm [shape: bf16[2,8,32], index: 0, kind: input, shape index: {}]   ;;  %s5979_s1 = inlined_call_operand.hbm [shape: bf16[2,32,96], index: 1, kind: input, shape index: {}]   ;;  %s5980_s2 = inlined_call_operand.hbm [shape: f32[2,1,96], index: 2, kind: input, shape index: {}]   ;;  %s5981_s3 = inlined_call_operand.hbm [shape: bf16[2,32,32], index: 3, kind: input, shape index: {}]   ;;  %s5982_s4 = inlined_call_operand.hbm [shape: f32[2,1,32], index: 4, kind: input, shape index: {}]   ;;  %s5983_s5 = inlined_call_operand.hbm [shape: f32[2,1,32], index: 5, kind: input, shape index: {}]   ;;  %s5984_s6 = inlined_call_operand.hbm [shape: f32[2,1,32], index: 6, kind: input, shape index: {}]   ;;  %s5985_s7 = inlined_call_operand.hbm [shape: bf16[2,32,64], index: 7, kind: input, shape index: {}]   ;;  %s5986_s8 = inlined_call_operand.hbm [shape: f32[2,1,64], index: 8, kind: input, shape index: {}]   ;;  %s5987_s9 = inlined_call_operand.hbm [shape: bf16[2,64,32], index: 9, kind: input, shape index: {}]   ;;  %s5988_s10 = inlined_call_operand.hbm [shape: f32[2,1,32], index: 10, kind: input, shape index: {}]   ;;  %s5989_s11 = inlined_call_operand.hbm [shape: f32[2,1,32], index: 11, kind: input, shape index: {}]   ;;  %s5990_s12 = inlined_call_operand.hbm [shape: f32[2,1,32], index: 12, kind: input, shape index: {}]   ;;  %s5991_s13 = inlined_call_operand.hbm [shape: bf16[32,128], index: 13, kind: input, shape index: {}]   ;;  %s5992_s14 = inlined_call_operand.hbm [shape: f32[1,128], index: 14, kind: input, shape index: {}]   ;;  %s5993_s15 = inlined_call_operand.hbm [shape: bf16[2,8,128], index: 15, kind: output, shape index: {}]  }
   0x1   :  { %6013 = sst [smem:[#allocation41_spill]] %s5978_s0 }
   0x2   :  { %6014 = sst [smem:[#allocation42_spill]] %s5979_s1 }
   0x3   :  { %6015 = sst [smem:[#allocation43_spill]] %s5980_s2 }
   0x4   :  { %6016 = sst [smem:[#allocation44_spill]] %s5981_s3 }
   0x5   :  { %6017 = sst [smem:[#allocation45_spill]] %s5993_s15 }
   0x6   :  { %20 = vsyncpa [#allocation3], 0 }
   0x7   :  { %22 = vsyncpa [#allocation3 + $0x1], 0 }
   0x8   :  { %23 = vsyncpa [#allocation6], 0 }
   0x9   :  { %24 = vsyncpa [#allocation9], 0 }
   0xa   :  { %25 = vsyncpa [#allocation12], 0 }
   0xb   :  { %26 = vsyncpa [#allocation15], 0 }
   0xc   :  { %27 = vsyncpa [#allocation18], 0 }
   0xd   :  { %28 = vsyncpa [#allocation21], 0 }
   0xe   :  { %29 = vsyncpa [#allocation24], 0 }
   0xf   :  { %30 = vsyncpa [#allocation4], 0 }
  0x10   :  { %32 = vsyncpa [#allocation4 + $0x1], 0  ;;  %s5031_s18 = smov 0   ;;  %s5033_s19 = smov 0  }
  0x11   :  { %s5035_s20 = smov 0   ;;  %s5037_s21 = smov 0  }
  0x12 LB: > { %6018 = sst [smem:[#allocation36_spill]] %s4904_s18  ;;  %s4918_s22 = smov [#allocation5]   ;;  %s4916_s21 = sphi %s5037_s21, %s6073_s21   ;;  %s4912_s20 = sphi %s5035_s20, %s6072_s20   ;;  %s4908_s19 = sphi %s5033_s19, %s6071_s19   ;;  %s4904_s18 = sphi %s5031_s18, %s6068_s18  }
  0x13   : > { %6019 = sst [smem:[#allocation37_spill]] %s4908_s19  ;;  %s401_s23 = sshll.u32 %s4918_s22, 4  ;;  %s5057_s23 = int_to_ptr.vmem [resolvable:$true] %s401_s23 }
  0x14   : > { %6020 = sst [smem:[#allocation38_spill]] %s4912_s20  ;;  %s5052_s24 = sadd.s32 4294967295, %s4916_s21  }
  0x15   : > { %6021 = sst [smem:[#allocation39_spill]] %s5052_s24  ;;  %p3774_p0 = scmp.ge.s32.totalorder %s4916_s21, 1 }
  0x16   : > { %p6002_p1 = scmp.eq.s32.totalorder %s5052_s24, 0  ;;  %p389_p2 = scmp.lt.s32.totalorder %s4916_s21, 3 }
  0x17   : > { %s4919_s26 = smov [#allocation8]   ;;  %s4920_s29 = smov [#allocation11]  }
  0x18   : > { %p5059_p3 = pnand %p3774_p0, %p389_p2  ;;  %s427_s27 = sshll.u32 %s4919_s26, 4  ;;  %s5072_s27 = int_to_ptr.vmem [resolvable:$true] %s427_s27 }
  0x19   : > { %s5074_s30 = sshll.u32 %s4920_s29, 4  ;;  %s6025_s1 = sld [smem:[#allocation42_spill]]  ;;  %s454_s30 = int_to_ptr.vmem [resolvable:$true] %s5074_s30 }
  0x1a   : > { %s6022_s25 = scalar_select %p5059_p3, 1, 0 }
  0x1b   : > { %p4193_p5 = pneg %p5059_p3 }
  0x1c   : > { %6023 = sst [smem:[#allocation40_spill]] %s6022_s25 }
  0x1d   : > { %p5068_p6 = pnand %p4193_p5, %p6002_p1 }
  0x1f   : > { %s4400_s22 = scalar_lea.hbm %s6025_s1, 512  ;;  %p5084_p8 = pneg %p5068_p6 }
  0x20   : > { %p4401_p7 = scmp.ne.s32.totalorder %s6025_s1, %s4400_s22  ;;  %p4407_p11 = scmp.lt.u32.totalorder %s4400_s22, %s6025_s1 }
  0x22   : > { %p4403_p9 = pnand %p5084_p8, %p4401_p7 }
  0x24   : > { %p4404_p10 = pneg %p4403_p9 }
  0x26   : > { %p4409_p12 = pnand %p4407_p11, %p4404_p10 }
  0x28   : > { %4412 = shalt.err (!%p4409_p12)
}
  0x29   : > { %s4413_s15 = scalar_lea.vmem %s5057_s23, 512  ;;  %p4421_p5 = scmp.lt.s32.totalorder %s5057_s23, %s5057_s23 }
  0x2a   : > { %p4414_p13 = scmp.ne.s32.totalorder %s5057_s23, %s4413_s15  ;;  %p4422_p4 = scmp.lt.s32.totalorder %s4413_s15, %s4413_s15 }
  0x2c   : > { %p4416_p0 = pnand %p4414_p13, %p5084_p8  ;;  %p4423_p7 = por %p4422_p4, %p4421_p5 }
  0x2e   : > { %p4417_p2 = pneg %p4416_p0 }
  0x30   : > { %p4424_p9 = pnand %p4423_p7, %p4417_p2 }
  0x32   : > { %4427 = shalt.err (!%p4424_p9)
}
  0x33   : > { %s6004_s25 = smov 64   ;;  %s6006_s0 = smov 4  }
  0x34   : > { %4196 = dma.hbm_to_vmem [thread:$0]  (!%p5068_p6), %s6025_s1, 512, %s5057_s23, [#allocation6], %s6004_s25, %s6004_s25, %s6006_s0  }
  0x35   : > { %s6027_s3 = sld [smem:[#allocation44_spill]] }
  0x3b   : > { %s4428_s15 = scalar_lea.hbm %s6027_s3, 512 }
  0x3c   : > { %p4429_p4 = scmp.ne.s32.totalorder %s6027_s3, %s4428_s15  ;;  %p4435_p12 = scmp.lt.u32.totalorder %s4428_s15, %s6027_s3 }
  0x3e   : > { %p4431_p10 = pnand %p4429_p4, %p5084_p8 }
  0x40   : > { %p4432_p11 = pneg %p4431_p10 }
  0x42   : > { %p4437_p13 = pnand %p4435_p12, %p4432_p11 }
  0x44   : > { %4440 = shalt.err (!%p4437_p13)
}
  0x45   : > { %s4441_s23 = scalar_lea.vmem %s5072_s27, 512  ;;  %p4449_p7 = scmp.lt.s32.totalorder %s5072_s27, %s5072_s27 }
  0x46   : > { %p4442_p0 = scmp.ne.s32.totalorder %s5072_s27, %s4441_s23  ;;  %p4450_p9 = scmp.lt.s32.totalorder %s4441_s23, %s4441_s23 }
  0x48   : > { %p4444_p2 = pnand %p4442_p0, %p5084_p8  ;;  %p4451_p4 = por %p4450_p9, %p4449_p7 }
  0x4a   : > { %p4445_p5 = pneg %p4444_p2 }
  0x4c   : > { %p4452_p10 = pnand %p4451_p4, %p4445_p5 }
  0x4e   : > { %4455 = shalt.err (!%p4452_p10)
}
  0x4f   : > { %4202 = dma.hbm_to_vmem [thread:$0]  (!%p5068_p6), %s6027_s3, 512, %s5072_s27, [#allocation9], %s6004_s25, %s6004_s25, %s6006_s0  }
  0x50   : > { %s4456_s16 = scalar_lea.hbm %s5983_s5, 32 }
  0x51   : > { %p4457_p11 = scmp.ne.s32.totalorder %s5983_s5, %s4456_s16  ;;  %p4463_p0 = scmp.lt.u32.totalorder %s4456_s16, %s5983_s5 }
  0x53   : > { %p4459_p12 = pnand %p4457_p11, %p5084_p8 }
  0x55   : > { %p4460_p13 = pneg %p4459_p12 }
  0x57   : > { %p4465_p2 = pnand %p4463_p0, %p4460_p13 }
  0x59   : > { %4468 = shalt.err (!%p4465_p2)
}
  0x5a   : > { %s4469_s23 = scalar_lea.vmem %s454_s30, 32  ;;  %p4477_p4 = scmp.lt.s32.totalorder %s454_s30, %s454_s30 }
  0x5b   : > { %p4470_p5 = scmp.ne.s32.totalorder %s454_s30, %s4469_s23  ;;  %p4478_p10 = scmp.lt.s32.totalorder %s4469_s23, %s4469_s23 }
  0x5d   : > { %p4472_p7 = pnand %p4470_p5, %p5084_p8  ;;  %p4479_p1 = por %p4478_p10, %p4477_p4 }
  0x5f   : > { %p4473_p9 = pneg %p4472_p7 }
  0x61   : > { %p4480_p3 = pnand %p4479_p1, %p4473_p9 }
  0x63   : > { %4483 = shalt.err (!%p4480_p3)
}
  0x64   : > { %s6008_s27 = smov 16   ;;  %s6010_s18 = smov 1  }
  0x65   : > { %4208 = dma.hbm_to_vmem [thread:$0]  (!%p5068_p6), %s5983_s5, 32, %s454_s30, [#allocation12], %s6008_s27, %s6008_s27, %s6010_s18  }
  0x66   : > { %s4925_s24 = smov [#allocation14]   ;;  %s4926_s17 = smov [#allocation17]  }
  0x67   : > { %s479_s16 = sshll.u32 %s4925_s24, 4  ;;  %s505_s22 = sshll.u32 %s4926_s17, 4  ;;  %s480_s16 = int_to_ptr.vmem [resolvable:$true] %s479_s16  ;;  %s506_s22 = int_to_ptr.vmem [resolvable:$true] %s505_s22 }
  0x68   : > { %s4484_s23 = scalar_lea.hbm %s5985_s7, 512 }
  0x69   : > { %p4485_p1 = scmp.ne.s32.totalorder %s5985_s7, %s4484_s23  ;;  %p4491_p12 = scmp.lt.u32.totalorder %s4484_s23, %s5985_s7 }
  0x6b   : > { %p4487_p3 = pnand %p4485_p1, %p5084_p8 }
  0x6d   : > { %p4488_p11 = pneg %p4487_p3 }
  0x6f   : > { %p4493_p13 = pnand %p4491_p12, %p4488_p11 }
  0x71   : > { %4496 = shalt.err (!%p4493_p13)
}
  0x72   : > { %s4497_s30 = scalar_lea.vmem %s480_s16, 512  ;;  %p4505_p7 = scmp.lt.s32.totalorder %s480_s16, %s480_s16 }
  0x73   : > { %p4498_p0 = scmp.ne.s32.totalorder %s480_s16, %s4497_s30  ;;  %p4506_p9 = scmp.lt.s32.totalorder %s4497_s30, %s4497_s30 }
  0x75   : > { %p4500_p2 = pnand %p4498_p0, %p5084_p8  ;;  %p4507_p4 = por %p4506_p9, %p4505_p7 }
  0x77   : > { %p4501_p5 = pneg %p4500_p2 }
  0x79   : > { %p4508_p10 = pnand %p4507_p4, %p4501_p5 }
  0x7b   : > { %4511 = shalt.err (!%p4508_p10)
}
  0x7c   : > { %s6028_s25 = smov 4   ;;  %s6029_s0 = smov 64  }
  0x7d   : > { %4214 = dma.hbm_to_vmem [thread:$0]  (!%p5068_p6), %s5985_s7, 512, %s480_s16, [#allocation15], %s6029_s0, %s6029_s0, %s6028_s25  }
  0x7e   : > { %s4512_s24 = scalar_lea.hbm %s5987_s9, 1024 }
  0x7f   : > { %p4513_p1 = scmp.ne.s32.totalorder %s5987_s9, %s4512_s24  ;;  %p4519_p12 = scmp.lt.u32.totalorder %s4512_s24, %s5987_s9 }
  0x81   : > { %p4515_p3 = pnand %p4513_p1, %p5084_p8 }
  0x83   : > { %p4516_p11 = pneg %p4515_p3 }
  0x85   : > { %p4521_p13 = pnand %p4519_p12, %p4516_p11 }
  0x87   : > { %4524 = shalt.err (!%p4521_p13)
}
  0x88   : > { %s4525_s30 = scalar_lea.vmem %s506_s22, 1024  ;;  %p4533_p7 = scmp.lt.s32.totalorder %s506_s22, %s506_s22 }
  0x89   : > { %p4526_p0 = scmp.ne.s32.totalorder %s506_s22, %s4525_s30  ;;  %p4534_p9 = scmp.lt.s32.totalorder %s4525_s30, %s4525_s30 }
  0x8b   : > { %p4528_p2 = pnand %p4526_p0, %p5084_p8  ;;  %p4535_p4 = por %p4534_p9, %p4533_p7 }
  0x8d   : > { %p4529_p5 = pneg %p4528_p2 }
  0x8f   : > { %p4536_p10 = pnand %p4535_p4, %p4529_p5 }
  0x91   : > { %4539 = shalt.err (!%p4536_p10)
}
  0x92   : > { %4220 = dma.hbm_to_vmem [thread:$0]  (!%p5068_p6), %s5987_s9, 1024, %s506_s22, [#allocation18], %s6029_s0, %s6029_s0, %s6028_s25  }
  0x93   : > { %s4927_s3 = smov [#allocation20]   ;;  %s4928_s20 = smov [#allocation23]  }
  0x94   : > { %s531_s19 = sshll.u32 %s4927_s3, 4  ;;  %s557_s24 = sshll.u32 %s4928_s20, 4  ;;  %s532_s19 = int_to_ptr.vmem [resolvable:$true] %s531_s19  ;;  %s558_s24 = int_to_ptr.vmem [resolvable:$true] %s557_s24 }
  0x95   : > { %s4540_s15 = scalar_lea.hbm %s5989_s11, 32 }
  0x96   : > { %p4541_p1 = scmp.ne.s32.totalorder %s5989_s11, %s4540_s15  ;;  %p4547_p12 = scmp.lt.u32.totalorder %s4540_s15, %s5989_s11 }
  0x98   : > { %p4543_p3 = pnand %p4541_p1, %p5084_p8 }
  0x9a   : > { %p4544_p11 = pneg %p4543_p3 }
  0x9c   : > { %p4549_p13 = pnand %p4547_p12, %p4544_p11 }
  0x9e   : > { %4552 = shalt.err (!%p4549_p13)
}
  0x9f   : > { %s4553_s22 = scalar_lea.vmem %s532_s19, 32  ;;  %p4561_p7 = scmp.lt.s32.totalorder %s532_s19, %s532_s19 }
  0xa0   : > { %p4554_p0 = scmp.ne.s32.totalorder %s532_s19, %s4553_s22  ;;  %p4562_p9 = scmp.lt.s32.totalorder %s4553_s22, %s4553_s22 }
  0xa2   : > { %p4556_p2 = pnand %p4554_p0, %p5084_p8  ;;  %p4563_p4 = por %p4562_p9, %p4561_p7 }
  0xa4   : > { %p4557_p5 = pneg %p4556_p2 }
  0xa6   : > { %p4564_p10 = pnand %p4563_p4, %p4557_p5 }
  0xa8   : > { %4567 = shalt.err (!%p4564_p10)
}
  0xa9   : > { %s6030_s1 = smov 16   ;;  %s4568_s29 = scalar_lea.hbm %s5991_s13, 256 }
  0xaa   : > { %4226 = dma.hbm_to_vmem [thread:$0]  (!%p5068_p6), %s5989_s11, 32, %s532_s19, [#allocation21], %s6030_s1, %s6030_s1, %s6010_s18  }
  0xab   : > { %p4569_p1 = scmp.ne.s32.totalorder %s5991_s13, %s4568_s29  ;;  %p4575_p12 = scmp.lt.u32.totalorder %s4568_s29, %s5991_s13 }
  0xad   : > { %p4571_p3 = pnand %p4569_p1, %p5084_p8 }
  0xaf   : > { %p4572_p11 = pneg %p4571_p3 }
  0xb1   : > { %p4577_p13 = pnand %p4575_p12, %p4572_p11 }
  0xb3   : > { %4580 = shalt.err (!%p4577_p13)
}
  0xb4   : > { %s4581_s22 = scalar_lea.vmem %s558_s24, 256  ;;  %p4589_p7 = scmp.lt.s32.totalorder %s558_s24, %s558_s24 }
  0xb5   : > { %p4582_p0 = scmp.ne.s32.totalorder %s558_s24, %s4581_s22  ;;  %p4590_p9 = scmp.lt.s32.totalorder %s4581_s22, %s4581_s22 }
  0xb7   : > { %p4584_p2 = pnand %p4582_p0, %p5084_p8  ;;  %p4591_p4 = por %p4590_p9, %p4589_p7 }
  0xb9   : > { %p4585_p5 = pneg %p4584_p2 }
  0xbb   : > { %p4592_p10 = pnand %p4591_p4, %p4585_p5 }
  0xbd   : > { %4595 = shalt.err (!%p4592_p10)
}
  0xbe   : > { %4232 = dma.hbm_to_vmem [thread:$0]  (!%p5068_p6), %s5991_s13, 256, %s558_s24, [#allocation24], %s6029_s0, %s6029_s0, %s6028_s25  }
  0xbf   : > { %s4929_s3 = smov [#allocation7]   ;;  %s4930_s17 = smov [#allocation10]  }
  0xc0   : > { %s414_s20 = sshll.u32 %s4929_s3, 4  ;;  %s440_s29 = sshll.u32 %s4930_s17, 4  ;;  %s415_s20 = int_to_ptr.vmem [resolvable:$true] %s414_s20  ;;  %s441_s29 = int_to_ptr.vmem [resolvable:$true] %s440_s29 }
  0xc1   : > { %s6031_s2 = sld [smem:[#allocation43_spill]] }
  0xc7   : > { %s4596_s30 = scalar_lea.hbm %s6031_s2, 32 }
  0xc8   : > { %p4597_p1 = scmp.ne.s32.totalorder %s6031_s2, %s4596_s30  ;;  %p4603_p12 = scmp.lt.u32.totalorder %s4596_s30, %s6031_s2 }
  0xca   : > { %p4599_p3 = pnand %p4597_p1, %p5084_p8 }
  0xcc   : > { %p4600_p11 = pneg %p4599_p3 }
  0xce   : > { %p4605_p13 = pnand %p4603_p12, %p4600_p11 }
  0xd0   : > { %4608 = shalt.err (!%p4605_p13)
}
  0xd1   : > { %s4609_s25 = scalar_lea.vmem %s415_s20, 32  ;;  %p4617_p7 = scmp.lt.s32.totalorder %s415_s20, %s415_s20 }
  0xd2   : > { %p4610_p0 = scmp.ne.s32.totalorder %s415_s20, %s4609_s25  ;;  %p4618_p9 = scmp.lt.s32.totalorder %s4609_s25, %s4609_s25 }
  0xd4   : > { %p4612_p2 = pnand %p4610_p0, %p5084_p8  ;;  %p4619_p4 = por %p4618_p9, %p4617_p7 }
  0xd6   : > { %p4613_p5 = pneg %p4612_p2 }
  0xd8   : > { %p4620_p10 = pnand %p4619_p4, %p4613_p5 }
  0xda   : > { %4623 = shalt.err (!%p4620_p10)
}
  0xdb   : > { %s6032_s0 = smov 1   ;;  %s4624_s17 = scalar_lea.hbm %s5982_s4, 32 }
  0xdc   : > { %4199 = dma.hbm_to_vmem [thread:$0]  (!%p5068_p6), %s6031_s2, 32, %s415_s20, [#allocation6], %s6030_s1, %s6030_s1, %s6032_s0  }
  0xdd   : > { %p4625_p1 = scmp.ne.s32.totalorder %s5982_s4, %s4624_s17  ;;  %p4631_p12 = scmp.lt.u32.totalorder %s4624_s17, %s5982_s4 }
  0xdf   : > { %p4627_p3 = pnand %p4625_p1, %p5084_p8 }
  0xe1   : > { %p4628_p11 = pneg %p4627_p3 }
  0xe3   : > { %p4633_p13 = pnand %p4631_p12, %p4628_p11 }
  0xe5   : > { %4636 = shalt.err (!%p4633_p13)
}
  0xe6   : > { %s4637_s22 = scalar_lea.vmem %s441_s29, 32  ;;  %p4645_p7 = scmp.lt.s32.totalorder %s441_s29, %s441_s29 }
  0xe7   : > { %p4638_p0 = scmp.ne.s32.totalorder %s441_s29, %s4637_s22  ;;  %p4646_p9 = scmp.lt.s32.totalorder %s4637_s22, %s4637_s22 }
  0xe9   : > { %p4640_p2 = pnand %p4638_p0, %p5084_p8  ;;  %p4647_p4 = por %p4646_p9, %p4645_p7 }
  0xeb   : > { %p4641_p5 = pneg %p4640_p2 }
  0xed   : > { %p4648_p10 = pnand %p4647_p4, %p4641_p5 }
  0xef   : > { %4651 = shalt.err (!%p4648_p10)
}
  0xf0   : > { %4205 = dma.hbm_to_vmem [thread:$0]  (!%p5068_p6), %s5982_s4, 32, %s441_s29, [#allocation9], %s6030_s1, %s6030_s1, %s6032_s0  }
  0xf1   : > { %s4931_s25 = smov [#allocation13]   ;;  %s4932_s24 = smov [#allocation16]  }
  0xf2   : > { %s466_s18 = sshll.u32 %s4931_s25, 4  ;;  %s492_s27 = sshll.u32 %s4932_s24, 4  ;;  %s467_s18 = int_to_ptr.vmem [resolvable:$true] %s466_s18  ;;  %s493_s27 = int_to_ptr.vmem [resolvable:$true] %s492_s27 }
  0xf3   : > { %s4652_s15 = scalar_lea.hbm %s5984_s6, 32 }
  0xf4   : > { %p4653_p1 = scmp.ne.s32.totalorder %s5984_s6, %s4652_s15  ;;  %p4659_p12 = scmp.lt.u32.totalorder %s4652_s15, %s5984_s6 }
  0xf6   : > { %p4655_p3 = pnand %p4653_p1, %p5084_p8 }
  0xf8   : > { %p4656_p11 = pneg %p4655_p3 }
  0xfa   : > { %p4661_p13 = pnand %p4659_p12, %p4656_p11 }
  0xfc   : > { %4664 = shalt.err (!%p4661_p13)
}
  0xfd   : > { %s4665_s29 = scalar_lea.vmem %s467_s18, 32  ;;  %p4673_p7 = scmp.lt.s32.totalorder %s467_s18, %s467_s18 }
  0xfe   : > { %p4666_p0 = scmp.ne.s32.totalorder %s467_s18, %s4665_s29  ;;  %p4674_p9 = scmp.lt.s32.totalorder %s4665_s29, %s4665_s29 }
 0x100   : > { %p4668_p2 = pnand %p4666_p0, %p5084_p8  ;;  %p4675_p4 = por %p4674_p9, %p4673_p7 }
 0x102   : > { %p4669_p5 = pneg %p4668_p2 }
 0x104   : > { %p4676_p10 = pnand %p4675_p4, %p4669_p5 }
 0x106   : > { %4679 = shalt.err (!%p4676_p10)
}
 0x107   : > { %4211 = dma.hbm_to_vmem [thread:$0]  (!%p5068_p6), %s5984_s6, 32, %s467_s18, [#allocation12], %s6030_s1, %s6030_s1, %s6032_s0  }
 0x108   : > { %s4680_s3 = scalar_lea.hbm %s5986_s8, 32 }
 0x109   : > { %p4681_p1 = scmp.ne.s32.totalorder %s5986_s8, %s4680_s3  ;;  %p4687_p12 = scmp.lt.u32.totalorder %s4680_s3, %s5986_s8 }
 0x10b   : > { %p4683_p3 = pnand %p4681_p1, %p5084_p8 }
 0x10d   : > { %p4684_p11 = pneg %p4683_p3 }
 0x10f   : > { %p4689_p13 = pnand %p4687_p12, %p4684_p11 }
 0x111   : > { %4692 = shalt.err (!%p4689_p13)
}
 0x112   : > { %s4693_s16 = scalar_lea.vmem %s493_s27, 32  ;;  %p4701_p7 = scmp.lt.s32.totalorder %s493_s27, %s493_s27 }
 0x113   : > { %p4694_p0 = scmp.ne.s32.totalorder %s493_s27, %s4693_s16  ;;  %p4702_p9 = scmp.lt.s32.totalorder %s4693_s16, %s4693_s16 }
 0x115   : > { %p4696_p2 = pnand %p4694_p0, %p5084_p8  ;;  %p4703_p4 = por %p4702_p9, %p4701_p7 }
 0x117   : > { %p4697_p5 = pneg %p4696_p2 }
 0x119   : > { %p4704_p10 = pnand %p4703_p4, %p4697_p5 }
 0x11b   : > { %4707 = shalt.err (!%p4704_p10)
}
 0x11c   : > { %4217 = dma.hbm_to_vmem [thread:$0]  (!%p5068_p6), %s5986_s8, 32, %s493_s27, [#allocation15], %s6030_s1, %s6030_s1, %s6032_s0  }
 0x11d   : > { %s4933_s29 = smov [#allocation19]   ;;  %s4934_s19 = smov [#allocation22]  }
 0x11e   : > { %s518_s20 = sshll.u32 %s4933_s29, 4  ;;  %s544_s25 = sshll.u32 %s4934_s19, 4  ;;  %s519_s20 = int_to_ptr.vmem [resolvable:$true] %s518_s20  ;;  %s545_s25 = int_to_ptr.vmem [resolvable:$true] %s544_s25 }
 0x11f   : > { %s4708_s17 = scalar_lea.hbm %s5988_s10, 32 }
 0x120   : > { %p4709_p1 = scmp.ne.s32.totalorder %s5988_s10, %s4708_s17  ;;  %p4715_p12 = scmp.lt.u32.totalorder %s4708_s17, %s5988_s10 }
 0x122   : > { %p4711_p3 = pnand %p4709_p1, %p5084_p8 }
 0x124   : > { %p4712_p11 = pneg %p4711_p3 }
 0x126   : > { %p4717_p13 = pnand %p4715_p12, %p4712_p11 }
 0x128   : > { %4720 = shalt.err (!%p4717_p13)
}
 0x129   : > { %s4721_s27 = scalar_lea.vmem %s519_s20, 32  ;;  %p4729_p7 = scmp.lt.s32.totalorder %s519_s20, %s519_s20 }
 0x12a   : > { %p4722_p0 = scmp.ne.s32.totalorder %s519_s20, %s4721_s27  ;;  %p4730_p9 = scmp.lt.s32.totalorder %s4721_s27, %s4721_s27 }
 0x12c   : > { %p4724_p2 = pnand %p4722_p0, %p5084_p8  ;;  %p4731_p4 = por %p4730_p9, %p4729_p7 }
 0x12e   : > { %p4725_p5 = pneg %p4724_p2 }
 0x130   : > { %p4732_p10 = pnand %p4731_p4, %p4725_p5 }
 0x132   : > { %4735 = shalt.err (!%p4732_p10)
}
 0x133   : > { %4223 = dma.hbm_to_vmem [thread:$0]  (!%p5068_p6), %s5988_s10, 32, %s519_s20, [#allocation18], %s6030_s1, %s6030_s1, %s6032_s0  }
 0x134   : > { %s4736_s24 = scalar_lea.hbm %s5990_s12, 32 }
 0x135   : > { %p4737_p1 = scmp.ne.s32.totalorder %s5990_s12, %s4736_s24  ;;  %p4743_p12 = scmp.lt.u32.totalorder %s4736_s24, %s5990_s12 }
 0x137   : > { %p4739_p3 = pnand %p4737_p1, %p5084_p8 }
 0x139   : > { %p4740_p11 = pneg %p4739_p3 }
 0x13b   : > { %p4745_p13 = pnand %p4743_p12, %p4740_p11 }
 0x13d   : > { %4748 = shalt.err (!%p4745_p13)
}
 0x13e   : > { %s4749_s30 = scalar_lea.vmem %s545_s25, 32  ;;  %p4757_p7 = scmp.lt.s32.totalorder %s545_s25, %s545_s25 }
 0x13f   : > { %p4750_p0 = scmp.ne.s32.totalorder %s545_s25, %s4749_s30  ;;  %p4758_p9 = scmp.lt.s32.totalorder %s4749_s30, %s4749_s30 }
 0x141   : > { %p4752_p2 = pnand %p4750_p0, %p5084_p8  ;;  %p4759_p4 = por %p4758_p9, %p4757_p7 }
 0x143   : > { %p4753_p5 = pneg %p4752_p2 }
 0x145   : > { %p4760_p10 = pnand %p4759_p4, %p4753_p5 }
 0x147   : > { %4763 = shalt.err (!%p4760_p10)
}
 0x148   : > { %4229 = dma.hbm_to_vmem [thread:$0]  (!%p5068_p6), %s5990_s12, 32, %s545_s25, [#allocation21], %s6030_s1, %s6030_s1, %s6032_s0  }
 0x149   : > { %s4935_s27 = smov [#allocation25]   ;;  %s4764_s19 = scalar_lea.hbm %s5992_s14, 16 }
 0x14a   : > { %s571_s18 = sshll.u32 %s4935_s27, 4  ;;  %p4765_p1 = scmp.ne.s32.totalorder %s5992_s14, %s4764_s19  ;;  %s572_s18 = int_to_ptr.vmem [resolvable:$true] %s571_s18 }
 0x14b   : > { %p4771_p12 = scmp.lt.u32.totalorder %s4764_s19, %s5992_s14 }
 0x14c   : > { %p4767_p3 = pnand %p4765_p1, %p5084_p8 }
 0x14e   : > { %p4768_p11 = pneg %p4767_p3 }
 0x150   : > { %p4773_p13 = pnand %p4771_p12, %p4768_p11 }
 0x152   : > { %4776 = shalt.err (!%p4773_p13)
}
 0x153   : > { %s4777_s1 = scalar_lea.vmem %s572_s18, 16  ;;  %s4784_s0 = scalar_lea.vmem %s572_s18, 32 }
 0x154   : > { %p4778_p0 = scmp.ne.s32.totalorder %s572_s18, %s4777_s1  ;;  %p4785_p7 = scmp.lt.s32.totalorder %s572_s18, %s572_s18 }
 0x155   : > { %p4786_p9 = scmp.lt.s32.totalorder %s4784_s0, %s4777_s1 }
 0x156   : > { %p4780_p2 = pnand %p4778_p0, %p5084_p8 }
 0x157   : > { %p4787_p4 = por %p4786_p9, %p4785_p7 }
 0x158   : > { %p4781_p5 = pneg %p4780_p2 }
 0x15a   : > { %p4788_p10 = pnand %p4787_p4, %p4781_p5 }
 0x15c   : > { %4791 = shalt.err (!%p4788_p10)
}
 0x15d   : > { %s6033_s30 = sld [smem:[#allocation38_spill]]  ;;  %s6034_s20 = sld [smem:[#allocation37_spill]] }
 0x15e   : > { %s6035_s26 = sld [smem:[#allocation36_spill]]  ;;  %s6036_s16 = sld [smem:[#allocation39_spill]] }
 0x15f   : > { %4235 = dma.hbm_to_vmem [thread:$0]  (!%p5068_p6), %s5992_s14, 16, %s572_s18, [#allocation24]  }
 0x160   : > { %s3773_s27 = sadd.s32 4294967294, %s4916_s21   ;;  %s5386_s28 = sadd.s32 1, %s4916_s21  }
 0x161   : > { %s42_s22 = ssub.s32 %s4916_s21, %s5386_s28  ;;  %p53_p3 = scmp.eq.s32.totalorder %s4916_s21, 0 }
 0x162   : > { %p43_p8 = scmp.eq.s32.totalorder %s42_s22, 0  ;;  %p382_p2 = scmp.eq.s32.totalorder %s3773_s27, 1 }
 0x163   : > { %s45_s29 = sadd.s32 1, %s6033_s30  ;;  %p52_p1 = scmp.ne.s32.totalorder %s6033_s30, %s6034_s20 }
 0x164   : > { %p58_p11 = scmp.ne.s32.totalorder %s6034_s20, %s6035_s26  ;;  %p6038_p13 = scmp.eq.s32.totalorder %s6036_s16, 0 }
 0x165   : > { %s5397_s19 = scalar_select %p43_p8, %s6033_s30, %s45_s29  }
 0x166   : > { %p5399_p12 = por %p53_p3, %p52_p1  ;;  %p5405_p6 = por %p6038_p13, %p58_p11 }
 0x167   : > { %p376_p0 = scmp.eq.s32.totalorder %s6036_s16, 1  ;;  %p4258_p5 = scmp.lt.s32.totalorder %s4916_s21, 2 }
 0x168   : > { %s582_s3 = sand.u32 1, %s6033_s30   ;;  %p5416_p9 = por %p382_p2, %p58_p11 }
 0x169   : > { %p5412_p7 = por %p376_p0, %p52_p1  ;;  %s3790_s1 = sshll.u32 %s582_s3, 2 }
 0x16a   : > { %s6041_s15 = scalar_select %p5416_p9, 1, 0 }
 0x16b   : > { %s6040_s17 = scalar_select %p5412_p7, 1, 0 }
 0x16c   : > { %s3791_s0 = sshll.u32 %s4916_s21, 6  ;;  %s6042_s20 = sld [smem:[#allocation41_spill]] }
 0x16d   : > { %s586_s30 = scalar_lea.vmem [#allocation2], %s3790_s1  ;;  %p5430_p4 = pnand %p4258_p5, %p5399_p12 }
 0x16e   : > { %s593_s16 = sshll.u32 %s586_s30, 4  ;;  %s583_s29 = scalar_lea.sflag [#allocation3], %s582_s3  ;;  %s5426_s16 = int_to_ptr.vmem [resolvable:$true] %s593_s16 }
 0x16f   : > { %p4794_p8 = pneg %p5430_p4 }
 0x172   : > { %s6043_s26 = smov %s6042_s20  ;;  %s5424_s22 = scalar_lea.hbm %s6042_s20, %s3791_s0 }
 0x173   : > { %s4792_s2 = scalar_lea.hbm %s5424_s22, 64  ;;  %s4797_s25 = scalar_lea.hbm %s6043_s26, 128 }
 0x174   : > { %p4793_p10 = scmp.ne.s32.totalorder %s5424_s22, %s4792_s2  ;;  %p4798_p11 = scmp.lt.u32.totalorder %s5424_s22, %s6043_s26 }
 0x175   : > { %p4799_p12 = scmp.lt.u32.totalorder %s4797_s25, %s4792_s2  ;;  %p4801_p0 = scmp.lt.u32.totalorder %s4792_s2, %s5424_s22 }
 0x176   : > { %p4795_p1 = pnand %p4794_p8, %p4793_p10 }
 0x177   : > { %p4800_p13 = por %p4799_p12, %p4798_p11 }
 0x178   : > { %p4796_p3 = pneg %p4795_p1 }
 0x179   : > { %p4802_p2 = por %p4801_p0, %p4800_p13 }
 0x17b   : > { %p4803_p5 = pnand %p4802_p2, %p4796_p3 }
 0x17d   : > { %4806 = shalt.err (!%p4803_p5)
}
 0x17e   : > { %s4807_s3 = scalar_lea.vmem %s5426_s16, 64  ;;  %s4936_s20 = smov [#allocation2]  }
 0x17f   : > { %p4808_p10 = scmp.ne.s32.totalorder %s5426_s16, %s4807_s3  ;;  %s4812_s30 = sshll.u32 %s4936_s20, 4  ;;  %s4813_s30 = int_to_ptr.vmem [resolvable:$false] %s4812_s30 }
 0x180   : > { %s4814_s1 = scalar_lea.vmem %s4813_s30, 128  ;;  %p4815_p7 = scmp.lt.s32.totalorder %s5426_s16, %s4813_s30 }
 0x181   : > { %p4810_p1 = pnand %p4808_p10, %p4794_p8  ;;  %p4816_p11 = scmp.lt.s32.totalorder %s4814_s1, %s4807_s3 }
 0x183   : > { %p4811_p9 = pneg %p4810_p1  ;;  %p4817_p12 = por %p4816_p11, %p4815_p7 }
 0x185   : > { %p4818_p13 = pnand %p4817_p12, %p4811_p9 }
 0x187   : > { %4821 = shalt.err (!%p4818_p13)
}
 0x188   : > { %4239 = dma.hbm_to_vmem [thread:$0]  (!%p5430_p4), %s5424_s22, 64, %s5426_s16, %s583_s29  }
 0x189   : > { %s6045_s2 = sld [smem:[#allocation40_spill]] }
 0x18f   : > { %p6046_p3 = scmp.ne.s32.totalorder %s6045_s2, 0 }
 0x190   : > { %s6047_s0 = sld [smem:[#allocation37_spill]] (!%p6046_p3) }
 0x191   : > { %602 = sbr.rel (%p6046_p3) target bundleno = 6065 (0x17b1), region = 80 }
 0x196   : > { %s5462_s25 = sand.u32 (!%p6046_p3), 1, %s6047_s0  }
 0x197   : > { %s3793_s24 = sshll.u32 (!%p6046_p3), %s5462_s25, 2  ;;  %s605_s23 = scalar_lea.sflag (!%p6046_p3), [#allocation3], %s5462_s25 }
 0x198   : > { %s608_s3 = scalar_lea.vmem [#allocation2], %s3793_s24 }
 0x199   : > { %4867 = dma.done.wait (%p5405_p6), %s605_s23, 64  }
 0x19a   : > { %4869 = vsyncadd (%p5405_p6), %s605_s23, 4294967232  ;;  %s6048_s22 = sld [smem:[#allocation39_spill]] }
 0x1a0   : > { %p6049_p7 = scmp.eq.s32.totalorder %s6048_s22, 0 }
 0x1a2   : > { %4871 = dma.done.wait (%p6049_p7), [#allocation6], 544   ;;  %p6050_p9 = pmov %p6049_p7 }
 0x1a3   : > { %p6051_p4 = pmov %p6049_p7 }
 0x1a4   : > { %4873 = vsyncadd (%p6050_p9), [#allocation6], 4294966752 }
 0x1a5   : > { %4875 = dma.done.wait (%p6051_p4), [#allocation9], 544   ;;  %p6052_p8 = pmov %p6051_p4 }
 0x1a6   : > { %p6053_p0 = pmov %p6051_p4 }
 0x1a7   : > { %4877 = vsyncadd (%p6052_p8), [#allocation9], 4294966752 }
 0x1a8   : > { %4879 = dma.done.wait (%p6053_p0), [#allocation12], 64   ;;  %p6054_p2 = pmov %p6053_p0 }
 0x1a9   : > { %p6055_p6 = pmov %p6053_p0 }
 0x1aa   : > { %4881 = vsyncadd (%p6054_p2), [#allocation12], 4294967232 }
 0x1ab   : > { %4883 = dma.done.wait (%p6055_p6), [#allocation15], 544   ;;  %p6056_p5 = pmov %p6053_p0 }
 0x1ac   : > { %p6057_p10 = pmov %p6053_p0 }
 0x1ad   : > { %4885 = vsyncadd (%p6056_p5), [#allocation15], 4294966752 }
 0x1ae   : > { %4887 = dma.done.wait (%p6057_p10), [#allocation18], 1056   ;;  %p6058_p1 = pmov %p6053_p0 }
 0x1af   : > { %p6059_p11 = pmov %p6053_p0 }
 0x1b0   : > { %4889 = vsyncadd (%p6058_p1), [#allocation18], 4294966240 }
 0x1b1   : > { %4891 = dma.done.wait (%p6059_p11), [#allocation21], 64   ;;  %p6060_p12 = pmov %p6053_p0 }
 0x1b2   : > { %p6061_p13 = pmov %p6053_p0 }
 0x1b3   : > { %4893 = vsyncadd (%p6060_p12), [#allocation21], 4294967232 }
 0x1b4   : > { %4895 = dma.done.wait (%p6061_p13), [#allocation24], 272   ;;  %p6062_p3 = pmov %p6053_p0 }
 0x1b5   : > { %v4937_v0 = vmov 0.0   ;;  %vm4938_vm0 = vmmov 0   ;;  %v4337_v1 = vld [vmem:[#allocation5] sm:$0xff]   ;;  %v4338_v2 = vld [vmem:[#allocation5 + $0x8] sm:$0xff]   ;;  %v5506_v3 = vld [vmem:[%s608_s3] sm:$0xf]  ;;  %v714_v15 = vlaneseq }
 0x1b6   : > { %4897 = vsyncadd (%p6062_p3), [#allocation24], 4294967024  ;;  %3957 = vmatprep.subr.bf16.mxu0 %v4937_v0  ;;  %3961 = vmatprep.mubr.msk.bf16.mxu0 %vm4938_vm0, %v4937_v0  ;;  %vm744_vm1 = vcmask 261120   ;;  %v3809_v4 = vcombine.low %v5506_v3, %v5506_v3  ;;  %v3810_v5 = vld [vmem:[#allocation7] ss:$0 sm:$0xff]  ;;  %s4939_s18 = smov 104  }
 0x1b7   : > { %3965 = vmatprep.subr.bf16.mxu1 %v4937_v0  ;;  %3967 = vmatprep.mubr.msk.bf16.mxu1 %vm4938_vm0, %v4937_v0  ;;  %s4940_s16 = smov 120   ;;  %s4941_s27 = smov 96   ;;  %v5541_v16 = vshrl.u32 %v714_v15, 7  ;;  %v5543_v17 = vand.u32 127, %v714_v15  ;;  %v4943_v18 = vmov 1983009808  }
 0x1b8   : > { %3958 = vmatpush3.bf16.msra.mxu0 %v4337_v1  ;;  %s4942_s29 = smov 112   ;;  %v802_v19 = vunpack.c.l.s4 %v4943_v18  ;;  %v4944_v20 = vmov 1934713408   ;;  %vm1250_vm3 = vcmask 64512   ;;  %s4946_s20 = smov 64   ;;  %vm1486_vm4 = vcmask 1043456  }
 0x1b9   : > { %3959 = vmatprep.subr.bf16.mxu0 %v4937_v0  ;;  %vm718_vm2 = vcmp.le.s32.totalorder %v5543_v17, %v5541_v16  ;;  %v834_v21 = vunpack.c.l.s4 %v4944_v20  ;;  %s4947_s30 = smov 16   ;;  %s4948_s1 = smov 8   ;;  %vm1817_vm5 = vcmask 130048   ;;  %vm1819_vm6 = vcmask 195584  }
 0x1ba   : > { %v803_v22 = vunpack.c.0.s8 %v802_v19  ;;  %s4949_s2 = smov 24   ;;  %vm2027_vm7 = vcmask 523264   ;;  %s3891_s0 = sshll.u32 %s6048_s22, 6 }
 0x1bb   : > { %v835_v25 = vunpack.c.0.s8 %v834_v21  ;;  %s710_s23 = scalar_lea.vmem [#allocation26], %s3793_s24  ;;  %s3557_s22 = scalar_lea.sflag [#allocation4], %s5462_s25 }
 0x1bc   : > { %3960 = vmatpush3.bf16.msra.mxu0 %v4338_v2  ;;  %v5548_v26 = vsub.s32 %v803_v22, %v5541_v16  ;;  %s3570_s3 = sshll.u32 %s710_s23, 4  ;;  %p6064_p9 = scmp.ne.s32.totalorder %s6040_s17, 0  ;;  %s5936_s3 = int_to_ptr.vmem [resolvable:$true] %s3570_s3 }
 0x1bd   : > { %3971 = vmatprep.subr.bf16.mxu0 %v4937_v0  ;;  %v5551_v33 = vsub.s32 %v835_v25, %v5541_v16  ;;  %s4950_s24 = smov [#allocation26]  }
 0x1bf   : > { %3962 = vmatmul.mubr.msk.bf16.vlgmr.msra.gmra.mrb[0].mxu0 %vm744_vm1, %v3809_v4 }
 0x1c0   : > { %3973 = vmatprep.mubr.msk.bf16.mxu0 %vm4938_vm0, %v4937_v0 }
 0x292   : > { %v782_v6 = vpop.f32.mrb[0].mxu0 }
 0x293   : > { %v5515_v7 = vadd.f32 %v3810_v5, %v782_v6  ;;  %v3963_v8 = vpop.f32.mrb[1].mxu0 }
 0x294   : > { %v785_v9 = vpop.f32.mrb[2].mxu0 }
 0x295   : > { %944 = vrot.lane.b32.xlu1 %v5515_v7, %s4939_s18  ;;  %940 = vrot.lane.b32.xlu0 %v5515_v7, %s4940_s16  ;;  %v3964_v10 = vpop.f32.mrb[3].mxu0  ;;  %v788_v14 = vmul.f32 0.35355338, %v5515_v7 }
 0x299   : > { %946 = vrot.lane.b32.xlu1 %v5515_v7, %s4941_s27  ;;  %942 = vrot.lane.b32.xlu0 %v5515_v7, %s4942_s29 }
 0x307   : > { %v5525_v11 = vpop.permute.xlu0 %940  ;;  %v5529_v12 = vpop.permute.xlu1 %944 }
 0x308   : > { %948 = vrot.lane.b32.xlu0 %v5525_v11, %s4941_s27 }
 0x30b   : > { %v5531_v13 = vpop.permute.xlu0 %942  ;;  %v947_v23 = vpop.permute.xlu1 %946 }
 0x30c   : > { %952 = vrot.lane.b32.xlu0 %v5529_v12, %s4941_s27  ;;  %950 = vrot.lane.b32.xlu1 %v5531_v13, %s4941_s27 }
 0x310   : > { %793 = vrot.lane.b32.xlu0 %v788_v14, %s4942_s29  ;;  %790 = vrot.lane.b32.xlu1 %v788_v14, %s4940_s16 }
 0x314   : > { %796 = vrot.lane.b32.xlu1 %v788_v14, %s4939_s18 }
 0x37a   : > { %v949_v24 = vpop.permute.xlu0 %948 }
 0x37e   : > { %v951_v27 = vpop.permute.xlu1 %950  ;;  %v953_v28 = vpop.permute.xlu0 %952 }
 0x37f   : > { %v958_v29 = vcombine.low %v947_v23, %v951_v27  ;;  %v959_v30 = vcombine.high %v947_v23, %v951_v27  ;;  %v974_v31 = vcombine.low %v949_v24, %v953_v28  ;;  %v975_v32 = vcombine.high %v949_v24, %v953_v28 }
 0x381   : > { %v966_v34 = vrot.slane %v958_v29, %v5548_v26  ;;  %v973_v35 = vrot.slane %v959_v30, %v5548_v26  ;;  %v982_v36 = vrot.slane %v974_v31, %v5548_v26  ;;  %v989_v37 = vrot.slane %v975_v32, %v5548_v26 }
 0x382   : > { %v791_v38 = vpop.permute.xlu1 %790  ;;  %v794_v43 = vpop.permute.xlu0 %793 }
 0x383   : > { %v990_v39 = vcombine.low %v966_v34, %v982_v36  ;;  %v991_v40 = vcombine.high %v966_v34, %v982_v36  ;;  %v1006_v41 = vcombine.low %v973_v35, %v989_v37  ;;  %v1007_v42 = vcombine.high %v973_v35, %v989_v37 }
 0x384   : > { %v799_v48 = vcombine.low %v788_v14, %v794_v43  ;;  %v800_v49 = vcombine.high %v788_v14, %v794_v43 }
 0x385   : > { %v998_v44 = vrot.slane %v990_v39, %v5551_v33  ;;  %v1005_v45 = vrot.slane %v991_v40, %v5551_v33  ;;  %v1014_v46 = vrot.slane %v1006_v41, %v5551_v33  ;;  %v1021_v47 = vrot.slane %v1007_v42, %v5551_v33 }
 0x386   : > { %v797_v50 = vpop.permute.xlu1 %796  ;;  %v807_v61 = vrot.slane %v799_v48, %v5548_v26  ;;  %v814_v62 = vrot.slane %v800_v49, %v5548_v26 }
 0x387   : > { %v1026_v51 = vcombine.low %v998_v44, %v1005_v45  ;;  %v3816_v52 = vcombine.high %v998_v44, %v1005_v45  ;;  %v1042_v53 = vcombine.low %v1014_v46, %v1021_v47  ;;  %v3817_v54 = vcombine.high %v1014_v46, %v1021_v47 }
 0x388   : > { %v815_v55 = vcombine.low %v791_v38, %v797_v50  ;;  %v816_v56 = vcombine.high %v791_v38, %v797_v50 }
 0x389   : > { %v1033_v57 = vrot.slane %v1026_v51, %v5548_v26  ;;  %v1041_v58 = vrot.slane %v3816_v52, %v5548_v26  ;;  %v1049_v59 = vrot.slane %v1042_v53, %v5548_v26  ;;  %v1057_v60 = vrot.slane %v3817_v54, %v5548_v26 }
 0x38a   : > { %v823_v63 = vrot.slane %v815_v55, %v5548_v26  ;;  %v830_v1 = vrot.slane %v816_v56, %v5548_v26 }
 0x38b   : > { %v1058_v2 = vcombine.low %v1033_v57, %v1041_v58  ;;  %v1074_v4 = vcombine.low %v1049_v59, %v1057_v60  ;;  %v1059_v15 = vcombine.high %v1033_v57, %v1041_v58  ;;  %v1075_v18 = vcombine.high %v1049_v59, %v1057_v60 }
 0x38c   : > { %v831_v5 = vcombine.low %v807_v61, %v823_v63  ;;  %v832_v6 = vcombine.high %v807_v61, %v823_v63  ;;  %v847_v8 = vcombine.low %v814_v62, %v830_v1  ;;  %v848_v9 = vcombine.high %v814_v62, %v830_v1 }
 0x38d   : > { %v1066_v10 = vrot.slane %v1058_v2, %v5551_v33  ;;  %v1082_v14 = vrot.slane %v1074_v4, %v5551_v33  ;;  %v1073_v32 = vrot.slane %v1059_v15, %v5551_v33  ;;  %v1089_v34 = vrot.slane %v1075_v18, %v5551_v33 }
 0x38e   : > { %v839_v19 = vrot.slane %v831_v5, %v5551_v33  ;;  %v846_v20 = vrot.slane %v832_v6, %v5551_v33  ;;  %v855_v21 = vrot.slane %v847_v8, %v5551_v33  ;;  %v862_v22 = vrot.slane %v848_v9, %v5551_v33 }
 0x38f   : > { %v1090_v23 = vcombine.low %v1066_v10, %v1082_v14  ;;  %v1091_v24 = vcombine.high %v1066_v10, %v1082_v14  ;;  %v1092_v43 = vcombine.low %v1073_v32, %v1089_v34  ;;  %v1093_v44 = vcombine.high %v1073_v32, %v1089_v34 }
 0x390   : > { %v867_v25 = vcombine.low %v839_v19, %v846_v20  ;;  %v3814_v27 = vcombine.high %v839_v19, %v846_v20  ;;  %v883_v28 = vcombine.low %v855_v21, %v862_v22  ;;  %v3815_v29 = vcombine.high %v855_v21, %v862_v22 }
 0x391   : > { %v1094_v30 = vpack.c.bf16 %v1090_v23, %v1090_v23  ;;  %v1095_v31 = vpack.c.bf16 %v1091_v24, %v1091_v24  ;;  %v1096_v51 = vpack.c.bf16 %v1092_v43, %v1092_v43  ;;  %v1097_v52 = vpack.c.bf16 %v1093_v44, %v1093_v44 }
 0x392   : > { %v874_v35 = vrot.slane %v867_v25, %v5548_v26  ;;  %v882_v36 = vrot.slane %v3814_v27, %v5548_v26  ;;  %v890_v37 = vrot.slane %v883_v28, %v5548_v26  ;;  %v898_v38 = vrot.slane %v3815_v29, %v5548_v26 }
 0x393   : > { %v1255_v39 = vsel %vm1250_vm3, %v1094_v30, 0  ;;  %v1301_v40 = vsel %vm1250_vm3, %v1095_v31, 0  ;;  %v1347_v57 = vsel %vm1250_vm3, %v1096_v51, 0  ;;  %v1393_v58 = vsel %vm1250_vm3, %v1097_v52, 0 }
 0x394   : > { %3966 = vmatpush3.bf16.xpose.msra.mxu1 %v1255_v39  ;;  %3972 = vmatpush3.bf16.xpose.msra.mxu0 %v1301_v40  ;;  %v899_v41 = vcombine.low %v874_v35, %v882_v36  ;;  %v915_v42 = vcombine.low %v890_v37, %v898_v38  ;;  %v900_v46 = vcombine.high %v874_v35, %v882_v36  ;;  %v4945_v63 = vmov -1e+30  }
 0x395   : > { %3977 = vmatprep.subr.bf16.mxu1 %v4937_v0  ;;  %3983 = vmatprep.subr.bf16.mxu0 %v4937_v0  ;;  %v916_v47 = vcombine.high %v890_v37, %v898_v38  ;;  %v5608_v1 = vsel %vm718_vm2, 0.0, %v4945_v63 }
 0x396   : > { %v907_v45 = vrot.slane %v899_v41, %v5551_v33  ;;  %v923_v48 = vrot.slane %v915_v42, %v5551_v33  ;;  %v914_v55 = vrot.slane %v900_v46, %v5551_v33 }
 0x397   : > { %v930_v56 = vrot.slane %v916_v47, %v5551_v33 }
 0x398   : > { %v931_v49 = vcombine.low %v907_v45, %v923_v48  ;;  %v932_v50 = vcombine.high %v907_v45, %v923_v48 }
 0x399   : > { %v933_v59 = vcombine.low %v914_v55, %v930_v56  ;;  %v934_v60 = vcombine.high %v914_v55, %v930_v56 }
 0x39a   : > { %v935_v53 = vpack.c.bf16 %v931_v49, %v931_v49  ;;  %v936_v54 = vpack.c.bf16 %v932_v50, %v932_v50 }
 0x39b   : > { %v937_v61 = vpack.c.bf16 %v933_v59, %v933_v59  ;;  %v938_v62 = vpack.c.bf16 %v934_v60, %v934_v60 }
 0x39c   : > { %3968 = vmatmul.mubr.msk.bf16.vlgmr.msra.gmra.mrb[0].mxu1 %vm1250_vm3, %v935_v53  ;;  %3974 = vmatmul.mubr.msk.bf16.vlgmr.msra.gmra.mrb[4].mxu0 %vm1250_vm3, %v936_v54 }
 0x39d   : > { %3978 = vmatpush3.bf16.xpose.msra.mxu1 %v1347_v57  ;;  %3984 = vmatpush3.bf16.xpose.msra.mxu0 %v1393_v58 }
 0x39e   : > { %3979 = vmatprep.mubr.msk.bf16.mxu1 %vm4938_vm0, %v4937_v0  ;;  %3985 = vmatprep.mubr.msk.bf16.mxu0 %vm4938_vm0, %v4937_v0 }
 0x39f   : > { %3989 = vmatprep.subr.bf16.mxu1 %v4937_v0  ;;  %3995 = vmatprep.subr.bf16.mxu0 %v4937_v0 }
 0x3a4   : > { %3980 = vmatmul.mubr.msk.bf16.vlgmr.msra.gmra.mrb[4].mxu1 %vm1250_vm3, %v937_v61  ;;  %3986 = vmatmul.mubr.msk.bf16.vlgmr.msra.gmra.mrb[8].mxu0 %vm1250_vm3, %v938_v62 }
 0x3a5   : > { %3991 = vmatprep.mubr.msk.bf16.mxu1 %vm4938_vm0, %v4937_v0  ;;  %3997 = vmatprep.mubr.msk.bf16.mxu0 %vm4938_vm0, %v4937_v0 }
 0x46f   : > { %v1291_v2 = vpop.f32.mrb[0].mxu1  ;;  %v1337_v4 = vpop.f32.mrb[4].mxu0 }
 0x470   : > { %v1292_v5 = vadd.f32 %v1291_v2, %v5608_v1  ;;  %v1338_v6 = vadd.f32 %v1337_v4, %v5608_v1  ;;  %v3969_v8 = vpop.f32.mrb[1].mxu1  ;;  %v3975_v9 = vpop.f32.mrb[5].mxu0 }
 0x471   : > { %v1294_v10 = vpop.f32.mrb[2].mxu1  ;;  %v1340_v14 = vpop.f32.mrb[6].mxu0 }
 0x472   : > { %v3970_v15 = vpop.f32.mrb[3].mxu1  ;;  %v3976_v18 = vpop.f32.mrb[7].mxu0  ;;  %v1435_v19 = vsel %vm1250_vm3, %v1292_v5, -inf  ;;  %v1438_v20 = vsel %vm1250_vm3, %v1338_v6, -inf }
 0x473   : > { %1436 = vmax.xlane.f32.xlu0 %v1435_v19  ;;  %1439 = vmax.xlane.f32.xlu1 %v1438_v20 }
 0x477   : > { %v1383_v16 = vpop.f32.mrb[4].mxu1  ;;  %v1429_v17 = vpop.f32.mrb[8].mxu0 }
 0x478   : > { %v1384_v21 = vadd.f32 %v1383_v16, %v5608_v1  ;;  %v3981_v22 = vpop.f32.mrb[5].mxu1  ;;  %v3987_v23 = vpop.f32.mrb[9].mxu0  ;;  %v1430_v27 = vadd.f32 %v1429_v17, %v5608_v1 }
 0x479   : > { %v1386_v24 = vpop.f32.mrb[6].mxu1  ;;  %v1432_v25 = vpop.f32.mrb[10].mxu0 }
 0x47a   : > { %v3982_v28 = vpop.f32.mrb[7].mxu1  ;;  %v3988_v29 = vpop.f32.mrb[11].mxu0  ;;  %v1441_v30 = vsel %vm1250_vm3, %v1384_v21, -inf  ;;  %v1444_v31 = vsel %vm1250_vm3, %v1430_v27, -inf }
 0x47b   : > { %1442 = vmax.xlane.f32.xlu0 %v1441_v30 }
 0x47f   : > { %1445 = vmax.xlane.f32.xlu0 %v1444_v31 }
 0x484   : > { %1098 = vrot.lane.b32.xlu1 %v5515_v7, %s4946_s20 }
 0x500   : > { %v1437_v32 = vpop.xlane.xlu0 %1436  ;;  %v1440_v34 = vpop.xlane.xlu1 %1439 }
 0x501   : > { %v1447_v35 = vsub.f32 %v1292_v5, %v1437_v32  ;;  %v1448_v36 = vsub.f32 %v1338_v6, %v1440_v34 }
 0x503   : > { %v1451_v37 = vmul.f32 1.442695, %v1447_v35  ;;  %v1453_v38 = vmul.f32 1.442695, %v1448_v36 }
 0x505   : > { %4360 = vpow2.f32 %v1451_v37 }
 0x506   : > { %4362 = vpow2.f32 %v1453_v38 }
 0x508   : > { %v1443_v7 = vpop.xlane.xlu0 %1442 }
 0x509   : > { %v1449_v43 = vsub.f32 %v1384_v21, %v1443_v7 }
 0x50b   : > { %v1455_v46 = vmul.f32 1.442695, %v1449_v43 }
 0x50c   : > { %v1446_v44 = vpop.xlane.xlu0 %1445 }
 0x50d   : > { %v1450_v45 = vsub.f32 %v1430_v27, %v1446_v44  ;;  %4364 = vpow2.f32 %v1455_v46 }
 0x50f   : > { %v5620_v39 = vpop.eup %4360  ;;  %v1457_v47 = vmul.f32 1.442695, %v1450_v45 }
 0x510   : > { %v5622_v40 = vpop.eup %4362  ;;  %v1459_v41 = vsel %vm1250_vm3, %v5620_v39, 0.0 }
 0x511   : > { %1460 = vadd.xlane.f32.xlu1 %v1459_v41  ;;  %v1462_v42 = vsel %vm1250_vm3, %v5622_v40, 0.0  ;;  %4366 = vpow2.f32 %v1457_v47 }
 0x512   : > { %1463 = vadd.xlane.f32.xlu0 %v1462_v42 }
 0x517   : > { %v5634_v48 = vpop.eup %4364 }
 0x51b   : > { %v5636_v49 = vpop.eup %4366 }
 0x522   : > { %1102 = vrot.lane.b32.xlu1 %v5531_v13, %s4946_s20  ;;  %v1465_v13 = vsel %vm1250_vm3, %v5634_v48, 0.0 }
 0x526   : > { %1104 = vrot.lane.b32.xlu1 %v5529_v12, %s4946_s20  ;;  %v1468_v12 = vsel %vm1250_vm3, %v5636_v49, 0.0 }
 0x528   : > { %1100 = vrot.lane.b32.xlu0 %v5525_v11, %s4946_s20  ;;  %v1099_v11 = vpop.permute.xlu1 %1098 }
 0x547   : > { %1466 = vadd.xlane.f32.xlu0 %v1465_v13 }
 0x54a   : > { %1469 = vadd.xlane.f32.xlu1 %v1468_v12 }
 0x59e   : > { %v1461_v50 = vpop.xlane.xlu1 %1460 }
 0x59f   : > { %v1464_v51 = vpop.xlane.xlu0 %1463  ;;  %4368 = vrcp.f32 %v1461_v50 }
 0x5a0   : > { %4370 = vrcp.f32 %v1464_v51 }
 0x5a2   : > { %v1103_v52 = vpop.permute.xlu1 %1102 }
 0x5a3   : > { %v1110_v53 = vcombine.low %v1099_v11, %v1103_v52  ;;  %v1111_v54 = vcombine.high %v1099_v11, %v1103_v52  ;;  %v1101_v55 = vpop.permute.xlu0 %1100 }
 0x5a5   : > { %v1118_v59 = vrot.slane %v1110_v53, %v5548_v26  ;;  %v1125_v60 = vrot.slane %v1111_v54, %v5548_v26 }
 0x5a6   : > { %v1105_v56 = vpop.permute.xlu1 %1104 }
 0x5a7   : > { %v1126_v57 = vcombine.low %v1101_v55, %v1105_v56  ;;  %v1127_v58 = vcombine.high %v1101_v55, %v1105_v56 }
 0x5a9   : > { %v1134_v61 = vrot.slane %v1126_v57, %v5548_v26  ;;  %v1141_v62 = vrot.slane %v1127_v58, %v5548_v26  ;;  %v4369_v29 = vpop.eup %4368 }
 0x5aa   : > { %v4371_v32 = vpop.eup %4370  ;;  %v1472_v38 = vmul.f32 %v4369_v29, %v5620_v39 }
 0x5ab   : > { %v1142_v63 = vcombine.low %v1118_v59, %v1134_v61  ;;  %v1143_v2 = vcombine.high %v1118_v59, %v1134_v61  ;;  %v1158_v4 = vcombine.low %v1125_v60, %v1141_v62  ;;  %v1159_v5 = vcombine.high %v1125_v60, %v1141_v62 }
 0x5ac   : > { %v1474_v41 = vmul.f32 %v4371_v32, %v5622_v40  ;;  %v1479_v47 = vpack.c.bf16 %v1472_v38, %v1472_v38 }
 0x5ad   : > { %v1150_v6 = vrot.slane %v1142_v63, %v5551_v33  ;;  %v1157_v8 = vrot.slane %v1143_v2, %v5551_v33  ;;  %v1166_v9 = vrot.slane %v1158_v4, %v5551_v33  ;;  %v1173_v10 = vrot.slane %v1159_v5, %v5551_v33 }
 0x5ae   : > { %v1480_v13 = vpack.c.bf16 %v1474_v41, %v1474_v41 }
 0x5af   : > { %v1178_v14 = vcombine.low %v1150_v6, %v1157_v8  ;;  %v3818_v15 = vcombine.high %v1150_v6, %v1157_v8  ;;  %v1194_v18 = vcombine.low %v1166_v9, %v1173_v10  ;;  %v3819_v19 = vcombine.high %v1166_v9, %v1173_v10 }
 0x5b1   : > { %v1185_v20 = vrot.slane %v1178_v14, %v5548_v26  ;;  %v1193_v16 = vrot.slane %v3818_v15, %v5548_v26  ;;  %v1201_v17 = vrot.slane %v1194_v18, %v5548_v26  ;;  %v1209_v21 = vrot.slane %v3819_v19, %v5548_v26 }
 0x5b3   : > { %v1210_v22 = vcombine.low %v1185_v20, %v1193_v16  ;;  %v1211_v23 = vcombine.high %v1185_v20, %v1193_v16  ;;  %v1226_v24 = vcombine.low %v1201_v17, %v1209_v21  ;;  %v1227_v25 = vcombine.high %v1201_v17, %v1209_v21 }
 0x5b5   : > { %v1218_v27 = vrot.slane %v1210_v22, %v5551_v33  ;;  %v1225_v28 = vrot.slane %v1211_v23, %v5551_v33  ;;  %v1234_v30 = vrot.slane %v1226_v24, %v5551_v33  ;;  %v1241_v31 = vrot.slane %v1227_v25, %v5551_v33  ;;  %v4340_v25 = vld [vmem:[#allocation8] sm:$0xff]  }
 0x5b7   : > { %v1242_v34 = vcombine.low %v1218_v27, %v1234_v30  ;;  %v1243_v35 = vcombine.high %v1218_v27, %v1234_v30  ;;  %v1244_v36 = vcombine.low %v1225_v28, %v1241_v31  ;;  %v1245_v37 = vcombine.high %v1225_v28, %v1241_v31 }
 0x5b9   : > { %v1246_v42 = vpack.c.bf16 %v1242_v34, %v1242_v34  ;;  %v1247_v7 = vpack.c.bf16 %v1243_v35, %v1243_v35  ;;  %v1248_v45 = vpack.c.bf16 %v1244_v36, %v1244_v36  ;;  %v1249_v46 = vpack.c.bf16 %v1245_v37, %v1245_v37  ;;  %v4341_v36 = vld [vmem:[#allocation8 + $0x8] sm:$0xff]  }
 0x5bb   : > { %v1488_v43 = vsel %vm1486_vm4, %v1246_v42, 0  ;;  %v1534_v44 = vsel %vm1486_vm4, %v1247_v7, 0  ;;  %v1580_v39 = vsel %vm1486_vm4, %v1248_v45, 0  ;;  %v1626_v40 = vsel %vm1486_vm4, %v1249_v46, 0 }
 0x5bc   : > { %3990 = vmatpush3.bf16.msra.mxu1 %v1488_v43  ;;  %3996 = vmatpush3.bf16.msra.mxu0 %v1534_v44 }
 0x5bd   : > { %4001 = vmatprep.subr.bf16.mxu1 %v4937_v0  ;;  %4007 = vmatprep.subr.bf16.mxu0 %v4937_v0 }
 0x5bf   : > { %3992 = vmatmul.mubr.msk.bf16.vlgmr.msra.gmra.mrb[8].mxu1 %vm1250_vm3, %v1479_v47  ;;  %3998 = vmatmul.mubr.msk.bf16.vlgmr.msra.gmra.mrb[12].mxu0 %vm1250_vm3, %v1480_v13 }
 0x5c0   : > { %4002 = vmatpush3.bf16.msra.mxu1 %v1580_v39  ;;  %4008 = vmatpush3.bf16.msra.mxu0 %v1626_v40 }
 0x5c1   : > { %4003 = vmatprep.mubr.msk.bf16.mxu1 %vm4938_vm0, %v4937_v0  ;;  %4009 = vmatprep.mubr.msk.bf16.mxu0 %vm4938_vm0, %v4937_v0 }
 0x5c2   : > { %4013 = vmatprep.subr.bf16.mxu1 %v4937_v0  ;;  %4021 = vmatprep.subr.bf16.mxu0 %v4937_v0 }
 0x5d4   : > { %v1467_v12 = vpop.xlane.xlu0 %1466 }
 0x5d5   : > { %4372 = vrcp.f32 %v1467_v12 }
 0x5d7   : > { %v1470_v11 = vpop.xlane.xlu1 %1469 }
 0x5d8   : > { %4374 = vrcp.f32 %v1470_v11 }
 0x5df   : > { %v4373_v50 = vpop.eup %4372 }
 0x5e0   : > { %v1476_v51 = vmul.f32 %v4373_v50, %v5634_v48 }
 0x5e2   : > { %v4375_v52 = vpop.eup %4374  ;;  %v1481_v53 = vpack.c.bf16 %v1476_v51, %v1476_v51 }
 0x5e3   : > { %v1478_v54 = vmul.f32 %v4375_v52, %v5636_v49 }
 0x5e4   : > { %4004 = vmatmul.mubr.msk.bf16.vlgmr.msra.gmra.mrb[12].mxu1 %vm1250_vm3, %v1481_v53 }
 0x5e5   : > { %v1482_v55 = vpack.c.bf16 %v1478_v54, %v1478_v54  ;;  %4017 = vmatprep.mubr.msk.bf16.mxu1 %vm4938_vm0, %v4937_v0  ;;  %4014 = vmatpush3.bf16.msra.mxu1 %v4340_v25 }
 0x5e6   : > { %4015 = vmatprep.subr.bf16.mxu1 %v4937_v0 }
 0x5e7   : > { %4010 = vmatmul.mubr.msk.bf16.vlgmr.msra.gmra.mrb[16].mxu0 %vm1250_vm3, %v1482_v55 }
 0x5e8   : > { %4025 = vmatprep.mubr.msk.bf16.mxu0 %vm4938_vm0, %v4937_v0 }
 0x5e9   : > { %4016 = vmatpush3.bf16.msra.mxu1 %v4341_v36 }
 0x5ea   : > { %4029 = vmatprep.subr.bf16.mxu1 %v4937_v0 }
 0x692   : > { %v1524_v56 = vpop.f32.mrb[8].mxu1  ;;  %v1570_v57 = vpop.f32.mrb[12].mxu0 }
 0x693   : > { %v3993_v58 = vpop.f32.mrb[9].mxu1  ;;  %v3999_v59 = vpop.f32.mrb[13].mxu0 }
 0x694   : > { %v1527_v48 = vpop.f32.mrb[10].mxu1  ;;  %v1573_v60 = vpop.f32.mrb[14].mxu0  ;;  %v3830_v58 = vld [vmem:[#allocation10] ss:$0 sm:$0xff]  ;;  %v713_v59 = vunpack.c.l.bf16 %v5506_v3  ;;  %v4344_v3 = vld [vmem:[#allocation17] sm:$0xff]  }
 0x695   : > { %v3994_v61 = vpop.f32.mrb[11].mxu1  ;;  %v4000_v62 = vpop.f32.mrb[15].mxu0 }
 0x6b7   : > { %v1616_v49 = vpop.f32.mrb[12].mxu1 }
 0x6b8   : > { %v1668_v63 = vcombine.low %v1524_v56, %v1616_v49  ;;  %v1669_v2 = vcombine.high %v1524_v56, %v1616_v49  ;;  %v4005_v4 = vpop.f32.mrb[13].mxu1 }
 0x6b9   : > { %v1619_v5 = vpop.f32.mrb[14].mxu1 }
 0x6ba   : > { %v4006_v6 = vpop.f32.mrb[15].mxu1  ;;  %v1662_v8 = vpop.f32.mrb[16].mxu0  ;;  %v1676_v18 = vrot.slane %v1668_v63, %v5548_v26  ;;  %v1683_v19 = vrot.slane %v1669_v2, %v5548_v26 }
 0x6bb   : > { %v1684_v9 = vcombine.low %v1570_v57, %v1662_v8  ;;  %v1685_v10 = vcombine.high %v1570_v57, %v1662_v8  ;;  %v4011_v14 = vpop.f32.mrb[17].mxu0 }
 0x6bc   : > { %v1665_v15 = vpop.f32.mrb[18].mxu0  ;;  %v4343_v14 = vld [vmem:[#allocation14 + $0x8] sm:$0xff]  }
 0x6bd   : > { %v1692_v20 = vrot.slane %v1684_v9, %v5548_v26  ;;  %v1699_v16 = vrot.slane %v1685_v10, %v5548_v26  ;;  %v4012_v17 = vpop.f32.mrb[19].mxu0  ;;  %v4342_v10 = vld [vmem:[#allocation14] sm:$0xff]   ;;  %v4345_v15 = vld [vmem:[#allocation17 + $0x8] sm:$0xff]  }
 0x6be   : > { %4022 = vmatpush3.bf16.msra.mxu0 %v4342_v10  ;;  %v3834_v17 = vld [vmem:[#allocation11] ss:$0 sm:$0xff] }
 0x6bf   : > { %v1700_v21 = vcombine.low %v1676_v18, %v1692_v20  ;;  %v1701_v22 = vcombine.high %v1676_v18, %v1692_v20  ;;  %v1716_v23 = vcombine.low %v1683_v19, %v1699_v16  ;;  %v1717_v24 = vcombine.high %v1683_v19, %v1699_v16  ;;  %4023 = vmatprep.subr.bf16.mxu0 %v4937_v0 }
 0x6c1   : > { %v1708_v27 = vrot.slane %v1700_v21, %v5551_v33  ;;  %v1715_v28 = vrot.slane %v1701_v22, %v5551_v33  ;;  %v1724_v29 = vrot.slane %v1716_v23, %v5551_v33  ;;  %v1731_v30 = vrot.slane %v1717_v24, %v5551_v33  ;;  %v3835_v22 = vld [vmem:[#allocation13] ss:$0 sm:$0xff] }
 0x6c2   : > { %4024 = vmatpush3.bf16.msra.mxu0 %v4343_v14 }
 0x6c3   : > { %v1736_v31 = vcombine.low %v1708_v27, %v1715_v28  ;;  %v3828_v32 = vcombine.high %v1708_v27, %v1715_v28  ;;  %v1752_v34 = vcombine.low %v1724_v29, %v1731_v30  ;;  %v3829_v35 = vcombine.high %v1724_v29, %v1731_v30  ;;  %4041 = vmatprep.subr.bf16.mxu0 %v4937_v0  ;;  %v4346_v27 = vld [vmem:[#allocation17 + $0x10] sm:$0xff]   ;;  %v4347_v28 = vld [vmem:[#allocation17 + $0x18] sm:$0xff]  }
 0x6c4   : > { %v3836_v29 = vld [vmem:[#allocation16] ss:$0 sm:$0xff] }
 0x6c5   : > { %v1743_v37 = vrot.slane %v1736_v31, %v5548_v26  ;;  %v1751_v38 = vrot.slane %v3828_v32, %v5548_v26  ;;  %v1759_v41 = vrot.slane %v1752_v34, %v5548_v26  ;;  %v1767_v42 = vrot.slane %v3829_v35, %v5548_v26 }
 0x6c7   : > { %v1769_v7 = vcombine.high %v1743_v37, %v1751_v38  ;;  %v1785_v43 = vcombine.high %v1759_v41, %v1767_v42  ;;  %v1768_v44 = vcombine.low %v1743_v37, %v1751_v38  ;;  %v1784_v45 = vcombine.low %v1759_v41, %v1767_v42  ;;  %v3840_v38 = vld [vmem:[#allocation19] ss:$0 sm:$0xff] }
 0x6c9   : > { %v1783_v46 = vrot.slane %v1769_v7, %v5551_v33  ;;  %v1799_v47 = vrot.slane %v1785_v43, %v5551_v33  ;;  %v1776_v13 = vrot.slane %v1768_v44, %v5551_v33  ;;  %v1792_v39 = vrot.slane %v1784_v45, %v5551_v33 }
 0x6cb   : > { %v1802_v40 = vcombine.low %v1783_v46, %v1799_v47  ;;  %v1801_v12 = vcombine.high %v1776_v13, %v1792_v39  ;;  %v1803_v11 = vcombine.high %v1783_v46, %v1799_v47  ;;  %v1800_v50 = vcombine.low %v1776_v13, %v1792_v39 }
 0x6cd   : > { %1809 = vrot.lane.b32.xlu1 %v1802_v40, %s4947_s30  ;;  %1805 = vrot.lane.b32.xlu0 %v1801_v12, %s4948_s1 }
 0x6d1   : > { %1813 = vrot.lane.b32.xlu0 %v1803_v11, %s4949_s2  ;;  %v4348_v11 = vld [vmem:[#allocation5 + $0x10] sm:$0xff]  }
 0x73f   : > { %v1806_v51 = vpop.permute.xlu0 %1805  ;;  %v1810_v52 = vpop.permute.xlu1 %1809 }
 0x740   : > { %v1816_v53 = vsel %vm1250_vm3, %v1800_v50, %v1806_v51  ;;  %v4349_v50 = vld [vmem:[#allocation5 + $0x18] sm:$0xff]  }
 0x741   : > { %v1818_v55 = vsel %vm1817_vm5, %v1816_v53, %v1810_v52 }
 0x743   : > { %v1814_v54 = vpop.permute.xlu0 %1813 }
 0x744   : > { %v1820_v56 = vsel %vm1819_vm6, %v1818_v55, %v1814_v54  ;;  %v3846_v55 = vld [vmem:[#allocation20] ss:$0 sm:$0xff] }
 0x745   : > { %v1821_v57 = vpack.c.bf16 %v1820_v56, %v1820_v56 }
 0x747   : > { %4018 = vmatmul.mubr.msk.bf16.vlgmr.msra.gmra.mrb[16].mxu1 %vm744_vm1, %v1821_v57  ;;  %v3847_v57 = vld [vmem:[#allocation22] ss:$0 sm:$0xff] }
 0x748   : > { %4037 = vmatprep.mubr.msk.bf16.mxu1 %vm4938_vm0, %v4937_v0  ;;  %4030 = vmatpush3.bf16.msra.mxu1 %v4344_v3 }
 0x749   : > { %4031 = vmatprep.subr.bf16.mxu1 %v4937_v0 }
 0x74c   : > { %4032 = vmatpush3.bf16.msra.mxu1 %v4345_v15 }
 0x74d   : > { %4033 = vmatprep.subr.bf16.mxu1 %v4937_v0 }
 0x750   : > { %4034 = vmatpush3.bf16.msra.mxu1 %v4346_v27 }
 0x751   : > { %4035 = vmatprep.subr.bf16.mxu1 %v4937_v0 }
 0x754   : > { %4036 = vmatpush3.bf16.msra.mxu1 %v4347_v28 }
 0x755   : > { %4055 = vmatprep.subr.bf16.mxu1 %v4937_v0 }
 0x81a   : > { %v1882_v48 = vpop.f32.mrb[16].mxu1 }
 0x81b   : > { %v1883_v60 = vadd.f32 %v3830_v58, %v1882_v48  ;;  %v4019_v61 = vpop.f32.mrb[17].mxu1 }
 0x81c   : > { %v1885_v62 = vpop.f32.mrb[18].mxu1 }
 0x81d   : > { %v4020_v49 = vpop.f32.mrb[19].mxu1  ;;  %v1888_v63 = vadd.f32 %v1883_v60, %v713_v59  ;;  %v3848_v60 = vld [vmem:[#allocation7 + $0x1] ss:$0 sm:$0xff] }
 0x81f   : > { %v1891_v2 = vsel %vm744_vm1, %v1888_v63, 0.0 }
 0x820   : > { %1892 = vadd.xlane.f32.xlu1 %v1891_v2 }
 0x8ad   : > { %v1893_v4 = vpop.xlane.xlu1 %1892 }
 0x8ae   : > { %v1895_v5 = vmul.f32 0.03125, %v1893_v4 }
 0x8b0   : > { %v1896_v6 = vsub.f32 %v1888_v63, %v1895_v5 }
 0x8b2   : > { %v1897_v8 = vmul.f32 %v1896_v6, %v1896_v6 }
 0x8b4   : > { %v1898_v9 = vsel %vm744_vm1, %v1897_v8, 0.0 }
 0x8b5   : > { %1899 = vadd.xlane.f32.xlu0 %v1898_v9 }
 0x942   : > { %v1900_v18 = vpop.xlane.xlu0 %1899 }
 0x943   : > { %v1901_v19 = vmul.f32 0.03125, %v1900_v18 }
 0x945   : > { %v1902_v20 = vadd.f32 1e-05, %v1901_v19 }
 0x947   : > { %4376 = vrsqrt.f32 %v1902_v20 }
 0x951   : > { %v4377_v16 = vpop.eup %4376 }
 0x952   : > { %v1904_v21 = vmul.f32 %v4377_v16, %v1896_v6 }
 0x954   : > { %v1911_v23 = vmul.f32 %v3834_v17, %v1904_v21 }
 0x956   : > { %v1918_v24 = vadd.f32 %v3835_v22, %v1911_v23 }
 0x958   : > { %v1919_v25 = vpack.c.bf16 %v1918_v24, %v1918_v24 }
 0x95a   : > { %4026 = vmatmul.mubr.msk.bf16.vlgmr.msra.gmra.mrb[20].mxu0 %vm744_vm1, %v1919_v25 }
 0x95b   : > { %4045 = vmatprep.mubr.msk.bf16.mxu0 %vm4938_vm0, %v4937_v0  ;;  %4042 = vmatpush3.bf16.msra.mxu0 %v4348_v11 }
 0x95c   : > { %4043 = vmatprep.subr.bf16.mxu0 %v4937_v0 }
 0x95f   : > { %4044 = vmatpush3.bf16.msra.mxu0 %v4349_v50 }
 0x960   : > { %4049 = vmatprep.subr.bf16.mxu0 %v4937_v0 }
 0xa2d   : > { %v1980_v30 = vpop.f32.mrb[20].mxu0 }
 0xa2e   : > { %v1981_v31 = vadd.f32 %v3836_v29, %v1980_v30  ;;  %v4027_v32 = vpop.f32.mrb[21].mxu0 }
 0xa2f   : > { %v1983_v34 = vpop.f32.mrb[22].mxu0 }
 0xa30   : > { %v1986_v35 = vmax.f32 %v1981_v31, 0.0  ;;  %v4028_v36 = vpop.f32.mrb[23].mxu0 }
 0xa32   : > { %v1987_v37 = vpack.c.bf16 %v1986_v35, %v1986_v35 }
 0xa34   : > { %4038 = vmatmul.mubr.msk.bf16.vlgmr.msra.gmra.mrb[20].mxu1 %vm2027_vm7, %v1987_v37 }
 0xa35   : > { %4057 = vmatprep.mubr.msk.bf16.mxu1 %vm4938_vm0, %v4937_v0 }
 0xb07   : > { %v2065_v41 = vpop.f32.mrb[20].mxu1 }
 0xb08   : > { %v2066_v42 = vadd.f32 %v3840_v38, %v2065_v41  ;;  %v4039_v7 = vpop.f32.mrb[21].mxu1 }
 0xb09   : > { %v2068_v43 = vpop.f32.mrb[22].mxu1 }
 0xb0a   : > { %v4040_v44 = vpop.f32.mrb[23].mxu1  ;;  %v2071_v45 = vadd.f32 %v2066_v42, %v1918_v24 }
 0xb0c   : > { %v2074_v46 = vsel %vm744_vm1, %v2071_v45, 0.0 }
 0xb0d   : > { %2075 = vadd.xlane.f32.xlu0 %v2074_v46 }
 0xb9a   : > { %v2076_v47 = vpop.xlane.xlu0 %2075 }
 0xb9b   : > { %v2077_v13 = vmul.f32 0.03125, %v2076_v47 }
 0xb9d   : > { %v2078_v39 = vsub.f32 %v2071_v45, %v2077_v13 }
 0xb9f   : > { %v2079_v40 = vmul.f32 %v2078_v39, %v2078_v39 }
 0xba1   : > { %v2080_v12 = vsel %vm744_vm1, %v2079_v40, 0.0 }
 0xba2   : > { %2081 = vadd.xlane.f32.xlu1 %v2080_v12 }
 0xc2f   : > { %v2082_v51 = vpop.xlane.xlu1 %2081 }
 0xc30   : > { %v2083_v52 = vmul.f32 0.03125, %v2082_v51 }
 0xc32   : > { %v2084_v53 = vadd.f32 1e-05, %v2083_v52 }
 0xc34   : > { %4378 = vrsqrt.f32 %v2084_v53 }
 0xc3e   : > { %v4379_v54 = vpop.eup %4378 }
 0xc3f   : > { %v2086_v56 = vmul.f32 %v4379_v54, %v2078_v39 }
 0xc41   : > { %v2093_v58 = vmul.f32 %v3846_v55, %v2086_v56 }
 0xc43   : > { %v5728_v59 = vadd.f32 %v3847_v57, %v2093_v58 }
 0xc45   : > { %v2101_v48 = vpack.c.bf16 %v5728_v59, %v5728_v59 }
 0xc47   : > { %4046 = vmatmul.mubr.msk.bf16.vlgmr.msra.gmra.mrb[24].mxu0 %vm744_vm1, %v2101_v48 }
 0xc48   : > { %4051 = vmatprep.mubr.msk.bf16.mxu0 %vm4938_vm0, %v4937_v0 }
 0xd1a   : > { %v2164_v61 = vpop.f32.mrb[24].mxu0 }
 0xd1b   : > { %v5735_v62 = vadd.f32 %v3848_v60, %v2164_v61  ;;  %v4047_v49 = vpop.f32.mrb[25].mxu0 }
 0xd1c   : > { %v2167_v63 = vpop.f32.mrb[26].mxu0 }
 0xd1d   : > { %2324 = vrot.lane.b32.xlu1 %v5735_v62, %s4942_s29  ;;  %2322 = vrot.lane.b32.xlu0 %v5735_v62, %s4940_s16  ;;  %v4048_v2 = vpop.f32.mrb[27].mxu0  ;;  %v2170_v6 = vmul.f32 0.35355338, %v5735_v62 }
 0xd21   : > { %2326 = vrot.lane.b32.xlu1 %v5735_v62, %s4939_s18  ;;  %2328 = vrot.lane.b32.xlu0 %v5735_v62, %s4941_s27 }
 0xd8f   : > { %v5745_v4 = vpop.permute.xlu1 %2324  ;;  %v5747_v5 = vpop.permute.xlu0 %2322 }
 0xd90   : > { %2332 = vrot.lane.b32.xlu0 %v5745_v4, %s4941_s27  ;;  %2330 = vrot.lane.b32.xlu1 %v5747_v5, %s4941_s27 }
 0xd93   : > { %v5754_v8 = vpop.permute.xlu1 %2326  ;;  %v2329_v9 = vpop.permute.xlu0 %2328 }
 0xd94   : > { %2334 = vrot.lane.b32.xlu1 %v5754_v8, %s4941_s27  ;;  %2172 = vrot.lane.b32.xlu0 %v2170_v6, %s4940_s16  ;;  %s6063_s27 = sld [smem:[#allocation45_spill]] }
 0xd98   : > { %2175 = vrot.lane.b32.xlu1 %v2170_v6, %s4942_s29  ;;  %2178 = vrot.lane.b32.xlu0 %v2170_v6, %s4939_s18 }
 0xd9a   : > { %s5934_s29 = scalar_lea.hbm %s6063_s27, %s3891_s0 }
 0xe02   : > { %v2331_v10 = vpop.permute.xlu1 %2330  ;;  %v2333_v14 = vpop.permute.xlu0 %2332 }
 0xe03   : > { %v2340_v3 = vcombine.low %v2329_v9, %v2333_v14  ;;  %v2341_v15 = vcombine.high %v2329_v9, %v2333_v14 }
 0xe05   : > { %v2348_v17 = vrot.slane %v2340_v3, %v5548_v26  ;;  %v2355_v21 = vrot.slane %v2341_v15, %v5548_v26 }
 0xe06   : > { %v2335_v18 = vpop.permute.xlu1 %2334  ;;  %v2173_v19 = vpop.permute.xlu0 %2172 }
 0xe07   : > { %v2356_v20 = vcombine.low %v2331_v10, %v2335_v18  ;;  %v2357_v16 = vcombine.high %v2331_v10, %v2335_v18 }
 0xe09   : > { %v2364_v22 = vrot.slane %v2356_v20, %v5548_v26  ;;  %v2371_v23 = vrot.slane %v2357_v16, %v5548_v26 }
 0xe0a   : > { %v2176_v24 = vpop.permute.xlu1 %2175  ;;  %v2179_v25 = vpop.permute.xlu0 %2178 }
 0xe0b   : > { %v2372_v27 = vcombine.low %v2348_v17, %v2364_v22  ;;  %v2373_v28 = vcombine.high %v2348_v17, %v2364_v22  ;;  %v2388_v29 = vcombine.low %v2355_v21, %v2371_v23  ;;  %v2389_v30 = vcombine.high %v2355_v21, %v2371_v23 }
 0xe0c   : > { %v2181_v31 = vcombine.low %v2170_v6, %v2176_v24  ;;  %v2182_v32 = vcombine.high %v2170_v6, %v2176_v24  ;;  %v2197_v34 = vcombine.low %v2173_v19, %v2179_v25  ;;  %v2198_v35 = vcombine.high %v2173_v19, %v2179_v25 }
 0xe0d   : > { %v2380_v36 = vrot.slane %v2372_v27, %v5551_v33  ;;  %v2387_v37 = vrot.slane %v2373_v28, %v5551_v33  ;;  %v2396_v38 = vrot.slane %v2388_v29, %v5551_v33  ;;  %v2403_v41 = vrot.slane %v2389_v30, %v5551_v33 }
 0xe0e   : > { %v2189_v42 = vrot.slane %v2181_v31, %v5548_v26  ;;  %v2196_v7 = vrot.slane %v2182_v32, %v5548_v26  ;;  %v2205_v43 = vrot.slane %v2197_v34, %v5548_v26  ;;  %v2212_v44 = vrot.slane %v2198_v35, %v5548_v26 }
 0xe0f   : > { %v2408_v45 = vcombine.low %v2380_v36, %v2387_v37  ;;  %v3854_v46 = vcombine.high %v2380_v36, %v2387_v37  ;;  %v2424_v47 = vcombine.low %v2396_v38, %v2403_v41  ;;  %v3855_v13 = vcombine.high %v2396_v38, %v2403_v41 }
 0xe10   : > { %v2213_v39 = vcombine.low %v2189_v42, %v2205_v43  ;;  %v2214_v40 = vcombine.high %v2189_v42, %v2205_v43  ;;  %v2229_v12 = vcombine.low %v2196_v7, %v2212_v44  ;;  %v2230_v11 = vcombine.high %v2196_v7, %v2212_v44 }
 0xe11   : > { %v2415_v50 = vrot.slane %v2408_v45, %v5548_v26  ;;  %v2423_v51 = vrot.slane %v3854_v46, %v5548_v26  ;;  %v2431_v52 = vrot.slane %v2424_v47, %v5548_v26  ;;  %v2439_v53 = vrot.slane %v3855_v13, %v5548_v26 }
 0xe12   : > { %v2221_v54 = vrot.slane %v2213_v39, %v5551_v33  ;;  %v2228_v55 = vrot.slane %v2214_v40, %v5551_v33  ;;  %v2237_v56 = vrot.slane %v2229_v12, %v5551_v33  ;;  %v2244_v57 = vrot.slane %v2230_v11, %v5551_v33 }
 0xe13   : > { %v2440_v58 = vcombine.low %v2415_v50, %v2423_v51  ;;  %v2456_v48 = vcombine.low %v2431_v52, %v2439_v53  ;;  %v2441_v60 = vcombine.high %v2415_v50, %v2423_v51  ;;  %v2457_v61 = vcombine.high %v2431_v52, %v2439_v53 }
 0xe14   : > { %v2249_v49 = vcombine.low %v2221_v54, %v2228_v55  ;;  %v3852_v63 = vcombine.high %v2221_v54, %v2228_v55  ;;  %v2265_v2 = vcombine.low %v2237_v56, %v2244_v57  ;;  %v3853_v6 = vcombine.high %v2237_v56, %v2244_v57 }
 0xe15   : > { %v2448_v9 = vrot.slane %v2440_v58, %v5551_v33  ;;  %v2464_v10 = vrot.slane %v2456_v48, %v5551_v33  ;;  %v2455_v16 = vrot.slane %v2441_v60, %v5551_v33  ;;  %v2471_v17 = vrot.slane %v2457_v61, %v5551_v33 }
 0xe16   : > { %v2256_v14 = vrot.slane %v2249_v49, %v5548_v26  ;;  %v2264_v3 = vrot.slane %v3852_v63, %v5548_v26  ;;  %v2272_v15 = vrot.slane %v2265_v2, %v5548_v26  ;;  %v2280_v18 = vrot.slane %v3853_v6, %v5548_v26 }
 0xe17   : > { %v2472_v19 = vcombine.low %v2448_v9, %v2464_v10  ;;  %v2473_v20 = vcombine.high %v2448_v9, %v2464_v10  ;;  %v2474_v30 = vcombine.low %v2455_v16, %v2471_v17  ;;  %v2475_v31 = vcombine.high %v2455_v16, %v2471_v17 }
 0xe18   : > { %v2281_v21 = vcombine.low %v2256_v14, %v2264_v3  ;;  %v2297_v22 = vcombine.low %v2272_v15, %v2280_v18  ;;  %v2282_v32 = vcombine.high %v2256_v14, %v2264_v3  ;;  %v2298_v34 = vcombine.high %v2272_v15, %v2280_v18 }
 0xe19   : > { %v2476_v23 = vpack.c.bf16 %v2472_v19, %v2472_v19  ;;  %v2477_v24 = vpack.c.bf16 %v2473_v20, %v2473_v20  ;;  %v2478_v37 = vpack.c.bf16 %v2474_v30, %v2474_v30  ;;  %v2479_v38 = vpack.c.bf16 %v2475_v31, %v2475_v31 }
 0xe1a   : > { %v2289_v25 = vrot.slane %v2281_v21, %v5551_v33  ;;  %v2305_v27 = vrot.slane %v2297_v22, %v5551_v33  ;;  %v2296_v7 = vrot.slane %v2282_v32, %v5551_v33  ;;  %v2312_v43 = vrot.slane %v2298_v34, %v5551_v33 }
 0xe1b   : > { %v2636_v28 = vsel %vm1250_vm3, %v2476_v23, 0  ;;  %v2682_v29 = vsel %vm1250_vm3, %v2477_v24, 0  ;;  %v2728_v44 = vsel %vm1250_vm3, %v2478_v37, 0  ;;  %v2774_v45 = vsel %vm1250_vm3, %v2479_v38, 0 }
 0xe1c   : > { %4050 = vmatpush3.bf16.xpose.msra.mxu0 %v2636_v28  ;;  %4056 = vmatpush3.bf16.xpose.msra.mxu1 %v2682_v29  ;;  %v2313_v35 = vcombine.low %v2289_v25, %v2305_v27  ;;  %v2314_v36 = vcombine.high %v2289_v25, %v2305_v27  ;;  %v2315_v46 = vcombine.low %v2296_v7, %v2312_v43 }
 0xe1d   : > { %4061 = vmatprep.subr.bf16.mxu0 %v4937_v0  ;;  %4067 = vmatprep.subr.bf16.mxu1 %v4937_v0  ;;  %v2316_v47 = vcombine.high %v2296_v7, %v2312_v43 }
 0xe1e   : > { %v2317_v41 = vpack.c.bf16 %v2313_v35, %v2313_v35  ;;  %v2318_v42 = vpack.c.bf16 %v2314_v36, %v2314_v36  ;;  %v2319_v13 = vpack.c.bf16 %v2315_v46, %v2315_v46 }
 0xe1f   : > { %v2320_v39 = vpack.c.bf16 %v2316_v47, %v2316_v47 }
 0xe23   : > { %4052 = vmatmul.mubr.msk.bf16.vlgmr.msra.gmra.mrb[28].mxu0 %vm1250_vm3, %v2317_v41  ;;  %4058 = vmatmul.mubr.msk.bf16.vlgmr.msra.gmra.mrb[24].mxu1 %vm1250_vm3, %v2318_v42 }
 0xe24   : > { %4062 = vmatpush3.bf16.xpose.msra.mxu0 %v2728_v44  ;;  %4068 = vmatpush3.bf16.xpose.msra.mxu1 %v2774_v45 }
 0xe25   : > { %4063 = vmatprep.mubr.msk.bf16.mxu0 %vm4938_vm0, %v4937_v0  ;;  %4069 = vmatprep.mubr.msk.bf16.mxu1 %vm4938_vm0, %v4937_v0 }
 0xe26   : > { %4073 = vmatprep.subr.bf16.mxu0 %v4937_v0  ;;  %4079 = vmatprep.subr.bf16.mxu1 %v4937_v0 }
 0xe2b   : > { %4064 = vmatmul.mubr.msk.bf16.vlgmr.msra.gmra.mrb[32].mxu0 %vm1250_vm3, %v2319_v13  ;;  %4070 = vmatmul.mubr.msk.bf16.vlgmr.msra.gmra.mrb[28].mxu1 %vm1250_vm3, %v2320_v39 }
 0xe2c   : > { %4075 = vmatprep.mubr.msk.bf16.mxu0 %vm4938_vm0, %v4937_v0  ;;  %4081 = vmatprep.mubr.msk.bf16.mxu1 %vm4938_vm0, %v4937_v0 }
 0xef6   : > { %v2672_v40 = vpop.f32.mrb[28].mxu0  ;;  %v2718_v12 = vpop.f32.mrb[24].mxu1 }
 0xef7   : > { %v2673_v11 = vadd.f32 %v2672_v40, %v5608_v1  ;;  %v2719_v50 = vadd.f32 %v2718_v12, %v5608_v1  ;;  %v4053_v51 = vpop.f32.mrb[29].mxu0  ;;  %v4059_v52 = vpop.f32.mrb[25].mxu1 }
 0xef8   : > { %v2675_v53 = vpop.f32.mrb[30].mxu0  ;;  %v2721_v54 = vpop.f32.mrb[26].mxu1 }
 0xef9   : > { %v4054_v55 = vpop.f32.mrb[31].mxu0  ;;  %v4060_v56 = vpop.f32.mrb[27].mxu1  ;;  %v2819_v57 = vsel %vm1250_vm3, %v2719_v50, -inf  ;;  %v2816_v58 = vsel %vm1250_vm3, %v2673_v11, -inf }
 0xefa   : > { %2820 = vmax.xlane.f32.xlu0 %v2819_v57  ;;  %2817 = vmax.xlane.f32.xlu1 %v2816_v58 }
 0xefe   : > { %v2764_v48 = vpop.f32.mrb[32].mxu0  ;;  %v2810_v60 = vpop.f32.mrb[28].mxu1 }
 0xeff   : > { %v2765_v61 = vadd.f32 %v2764_v48, %v5608_v1  ;;  %v2811_v49 = vadd.f32 %v2810_v60, %v5608_v1  ;;  %v4065_v63 = vpop.f32.mrb[33].mxu0  ;;  %v4071_v2 = vpop.f32.mrb[29].mxu1 }
 0xf00   : > { %v2767_v6 = vpop.f32.mrb[34].mxu0  ;;  %v2813_v9 = vpop.f32.mrb[30].mxu1 }
 0xf01   : > { %v4066_v10 = vpop.f32.mrb[35].mxu0  ;;  %v4072_v14 = vpop.f32.mrb[31].mxu1  ;;  %v2825_v3 = vsel %vm1250_vm3, %v2811_v49, -inf  ;;  %v2822_v15 = vsel %vm1250_vm3, %v2765_v61, -inf }
 0xf02   : > { %2826 = vmax.xlane.f32.xlu1 %v2825_v3  ;;  %2823 = vmax.xlane.f32.xlu0 %v2822_v15 }
 0xf13   : > { %2482 = vrot.lane.b32.xlu1 %v5747_v5, %s4946_s20 }
 0xf18   : > { %2480 = vrot.lane.b32.xlu0 %v5735_v62, %s4946_s20 }
 0xf87   : > { %v2821_v18 = vpop.xlane.xlu0 %2820  ;;  %v2818_v1 = vpop.xlane.xlu1 %2817 }
 0xf88   : > { %v2829_v19 = vsub.f32 %v2719_v50, %v2821_v18  ;;  %v2828_v20 = vsub.f32 %v2673_v11, %v2818_v1 }
 0xf8a   : > { %v2834_v16 = vmul.f32 1.442695, %v2829_v19  ;;  %v2832_v17 = vmul.f32 1.442695, %v2828_v20 }
 0xf8c   : > { %4380 = vpow2.f32 %v2834_v16 }
 0xf8d   : > { %4382 = vpow2.f32 %v2832_v17 }
 0xf8f   : > { %v2824_v62 = vpop.xlane.xlu0 %2823  ;;  %v2827_v24 = vpop.xlane.xlu1 %2826 }
 0xf90   : > { %v2830_v25 = vsub.f32 %v2765_v61, %v2824_v62  ;;  %v2831_v27 = vsub.f32 %v2811_v49, %v2827_v24 }
 0xf92   : > { %v2836_v28 = vmul.f32 1.442695, %v2830_v25  ;;  %v2838_v29 = vmul.f32 1.442695, %v2831_v27 }
 0xf93   : > { %v2481_v34 = vpop.permute.xlu0 %2480 }
 0xf94   : > { %4384 = vpow2.f32 %v2836_v28 }
 0xf95   : > { %4386 = vpow2.f32 %v2838_v29 }
 0xf96   : > { %v5825_v21 = vpop.eup %4380 }
 0xf97   : > { %v5827_v22 = vpop.eup %4382  ;;  %v2843_v23 = vsel %vm1250_vm3, %v5825_v21, 0.0 }
 0xf98   : > { %2844 = vadd.xlane.f32.xlu1 %v2843_v23  ;;  %v2840_v5 = vsel %vm1250_vm3, %v5827_v22, 0.0 }
 0xf99   : > { %2841 = vadd.xlane.f32.xlu0 %v2840_v5 }
 0xf9e   : > { %v5837_v30 = vpop.eup %4384 }
 0xf9f   : > { %v5839_v31 = vpop.eup %4386  ;;  %v2846_v32 = vsel %vm1250_vm3, %v5837_v30, 0.0 }
 0xfa9   : > { %2484 = vrot.lane.b32.xlu1 %v5745_v4, %s4946_s20  ;;  %v2849_v4 = vsel %vm1250_vm3, %v5839_v31, 0.0 }
 0xfaf   : > { %2486 = vrot.lane.b32.xlu0 %v5754_v8, %s4946_s20  ;;  %v2483_v8 = vpop.permute.xlu1 %2482  ;;  %s4822_s20 = scalar_lea.vmem %s5936_s3, 64 }
 0xfb0   : > { %p4823_p7 = scmp.ne.s32.totalorder %s5936_s3, %s4822_s20 }
 0xfb2   : > { %p4824_p4 = pnand %p4823_p7, %p6064_p9 }
 0xfb4   : > { %p4825_p8 = pneg %p4824_p4 }
 0xfcd   : > { %2847 = vadd.xlane.f32.xlu1 %v2846_v32 }
 0xfce   : > { %2850 = vadd.xlane.f32.xlu0 %v2849_v4 }
0x1025   : > { %v2845_v35 = vpop.xlane.xlu1 %2844 }
0x1026   : > { %v2842_v36 = vpop.xlane.xlu0 %2841  ;;  %4388 = vrcp.f32 %v2845_v35 }
0x1027   : > { %4390 = vrcp.f32 %v2842_v36 }
0x1029   : > { %v2485_v37 = vpop.permute.xlu1 %2484 }
0x102a   : > { %v2492_v38 = vcombine.low %v2481_v34, %v2485_v37  ;;  %v2493_v41 = vcombine.high %v2481_v34, %v2485_v37  ;;  %v2487_v42 = vpop.permute.xlu0 %2486 }
0x102b   : > { %v2508_v7 = vcombine.low %v2483_v8, %v2487_v42  ;;  %v2509_v43 = vcombine.high %v2483_v8, %v2487_v42 }
0x102c   : > { %v2500_v44 = vrot.slane %v2492_v38, %v5548_v26  ;;  %v2507_v45 = vrot.slane %v2493_v41, %v5548_v26 }
0x102d   : > { %v2516_v46 = vrot.slane %v2508_v7, %v5548_v26  ;;  %v2523_v47 = vrot.slane %v2509_v43, %v5548_v26 }
0x102f   : > { %v2524_v13 = vcombine.low %v2500_v44, %v2516_v46  ;;  %v2525_v39 = vcombine.high %v2500_v44, %v2516_v46  ;;  %v2540_v40 = vcombine.low %v2507_v45, %v2523_v47  ;;  %v2541_v12 = vcombine.high %v2507_v45, %v2523_v47 }
0x1030   : > { %v4389_v10 = vpop.eup %4388 }
0x1031   : > { %v2532_v11 = vrot.slane %v2524_v13, %v5551_v33  ;;  %v2539_v50 = vrot.slane %v2525_v39, %v5551_v33  ;;  %v2548_v51 = vrot.slane %v2540_v40, %v5551_v33  ;;  %v2555_v52 = vrot.slane %v2541_v12, %v5551_v33  ;;  %v4391_v15 = vpop.eup %4390 }
0x1032   : > { %v2855_v16 = vmul.f32 %v4389_v10, %v5825_v21  ;;  %v2853_v17 = vmul.f32 %v4391_v15, %v5827_v22 }
0x1033   : > { %v2560_v53 = vcombine.low %v2532_v11, %v2539_v50  ;;  %v3856_v54 = vcombine.high %v2532_v11, %v2539_v50  ;;  %v2576_v55 = vcombine.low %v2548_v51, %v2555_v52  ;;  %v3857_v56 = vcombine.high %v2548_v51, %v2555_v52 }
0x1034   : > { %v2860_v28 = vpack.c.bf16 %v2853_v17, %v2853_v17  ;;  %v2861_v29 = vpack.c.bf16 %v2855_v16, %v2855_v16 }
0x1035   : > { %v2567_v57 = vrot.slane %v2560_v53, %v5548_v26  ;;  %v2575_v58 = vrot.slane %v3856_v54, %v5548_v26  ;;  %v2583_v48 = vrot.slane %v2576_v55, %v5548_v26  ;;  %v2591_v60 = vrot.slane %v3857_v56, %v5548_v26 }
0x1037   : > { %v2592_v61 = vcombine.low %v2567_v57, %v2575_v58  ;;  %v2593_v49 = vcombine.high %v2567_v57, %v2575_v58  ;;  %v2608_v63 = vcombine.low %v2583_v48, %v2591_v60  ;;  %v2609_v2 = vcombine.high %v2583_v48, %v2591_v60 }
0x1039   : > { %v2600_v6 = vrot.slane %v2592_v61, %v5551_v33  ;;  %v2607_v9 = vrot.slane %v2593_v49, %v5551_v33  ;;  %v2616_v14 = vrot.slane %v2608_v63, %v5551_v33  ;;  %v2623_v3 = vrot.slane %v2609_v2, %v5551_v33  ;;  %v4350_v63 = vld [vmem:[#allocation8 + $0x10] sm:$0xff]  }
0x103b   : > { %v2624_v18 = vcombine.low %v2600_v6, %v2616_v14  ;;  %v2625_v1 = vcombine.high %v2600_v6, %v2616_v14  ;;  %v2626_v19 = vcombine.low %v2607_v9, %v2623_v3  ;;  %v2627_v20 = vcombine.high %v2607_v9, %v2623_v3 }
0x103d   : > { %v2628_v23 = vpack.c.bf16 %v2624_v18, %v2624_v18  ;;  %v2629_v5 = vpack.c.bf16 %v2625_v1, %v2625_v1  ;;  %v2630_v25 = vpack.c.bf16 %v2626_v19, %v2626_v19  ;;  %v2631_v27 = vpack.c.bf16 %v2627_v20, %v2627_v20  ;;  %v4351_v1 = vld [vmem:[#allocation8 + $0x18] sm:$0xff]  }
0x103f   : > { %v2868_v62 = vsel %vm1486_vm4, %v2628_v23, 0  ;;  %v2914_v24 = vsel %vm1486_vm4, %v2629_v5, 0  ;;  %v2960_v21 = vsel %vm1486_vm4, %v2630_v25, 0  ;;  %v3006_v22 = vsel %vm1486_vm4, %v2631_v27, 0 }
0x1040   : > { %4074 = vmatpush3.bf16.msra.mxu0 %v2868_v62  ;;  %4080 = vmatpush3.bf16.msra.mxu1 %v2914_v24 }
0x1041   : > { %4085 = vmatprep.subr.bf16.mxu0 %v4937_v0  ;;  %4091 = vmatprep.subr.bf16.mxu1 %v4937_v0 }
0x1043   : > { %4076 = vmatmul.mubr.msk.bf16.vlgmr.msra.gmra.mrb[36].mxu0 %vm1250_vm3, %v2860_v28  ;;  %4082 = vmatmul.mubr.msk.bf16.vlgmr.msra.gmra.mrb[32].mxu1 %vm1250_vm3, %v2861_v29 }
0x1044   : > { %4086 = vmatpush3.bf16.msra.mxu0 %v2960_v21  ;;  %4092 = vmatpush3.bf16.msra.mxu1 %v3006_v22 }
0x1045   : > { %4087 = vmatprep.mubr.msk.bf16.mxu0 %vm4938_vm0, %v4937_v0  ;;  %4093 = vmatprep.mubr.msk.bf16.mxu1 %vm4938_vm0, %v4937_v0 }
0x1046   : > { %4097 = vmatprep.subr.bf16.mxu0 %v4937_v0  ;;  %4105 = vmatprep.subr.bf16.mxu1 %v4937_v0 }
0x105a   : > { %v2848_v32 = vpop.xlane.xlu1 %2847 }
0x105b   : > { %4392 = vrcp.f32 %v2848_v32  ;;  %v2851_v4 = vpop.xlane.xlu0 %2850 }
0x105c   : > { %4394 = vrcp.f32 %v2851_v4 }
0x1065   : > { %v4393_v8 = vpop.eup %4392 }
0x1066   : > { %v4395_v34 = vpop.eup %4394  ;;  %v2857_v35 = vmul.f32 %v4393_v8, %v5837_v30 }
0x1067   : > { %v2859_v36 = vmul.f32 %v4395_v34, %v5839_v31 }
0x1068   : > { %v2862_v37 = vpack.c.bf16 %v2857_v35, %v2857_v35 }
0x1069   : > { %v2863_v38 = vpack.c.bf16 %v2859_v36, %v2859_v36 }
0x106a   : > { %4088 = vmatmul.mubr.msk.bf16.vlgmr.msra.gmra.mrb[40].mxu0 %vm1250_vm3, %v2862_v37 }
0x106b   : > { %4094 = vmatmul.mubr.msk.bf16.vlgmr.msra.gmra.mrb[36].mxu1 %vm1250_vm3, %v2863_v38  ;;  %4101 = vmatprep.mubr.msk.bf16.mxu0 %vm4938_vm0, %v4937_v0  ;;  %v3868_v38 = vld [vmem:[#allocation10 + $0x1] ss:$0 sm:$0xff] }
0x106c   : > { %4109 = vmatprep.mubr.msk.bf16.mxu1 %vm4938_vm0, %v4937_v0  ;;  %4098 = vmatpush3.bf16.msra.mxu0 %v4350_v63 }
0x106d   : > { %4099 = vmatprep.subr.bf16.mxu0 %v4937_v0 }
0x1070   : > { %4100 = vmatpush3.bf16.msra.mxu0 %v4351_v1 }
0x1071   : > { %4113 = vmatprep.subr.bf16.mxu0 %v4937_v0 }
0x1116   : > { %v2904_v41 = vpop.f32.mrb[36].mxu0  ;;  %v2950_v42 = vpop.f32.mrb[32].mxu1 }
0x1117   : > { %v4077_v7 = vpop.f32.mrb[37].mxu0  ;;  %v4083_v43 = vpop.f32.mrb[33].mxu1 }
0x1118   : > { %v2907_v44 = vpop.f32.mrb[38].mxu0  ;;  %v2953_v30 = vpop.f32.mrb[34].mxu1 }
0x1119   : > { %v4078_v45 = vpop.f32.mrb[39].mxu0  ;;  %v4084_v31 = vpop.f32.mrb[35].mxu1 }
0x113d   : > { %v2996_v46 = vpop.f32.mrb[40].mxu0 }
0x113e   : > { %v3048_v47 = vcombine.low %v2904_v41, %v2996_v46  ;;  %v3049_v13 = vcombine.high %v2904_v41, %v2996_v46  ;;  %v3042_v39 = vpop.f32.mrb[36].mxu1  ;;  %v4089_v40 = vpop.f32.mrb[41].mxu0 }
0x113f   : > { %v3064_v12 = vcombine.low %v2950_v42, %v3042_v39  ;;  %v3065_v11 = vcombine.high %v2950_v42, %v3042_v39  ;;  %v4095_v50 = vpop.f32.mrb[37].mxu1  ;;  %v2999_v51 = vpop.f32.mrb[42].mxu0  ;;  %v4352_v40 = vld [vmem:[#allocation14 + $0x10] sm:$0xff]  }
0x1140   : > { %v3056_v52 = vrot.slane %v3048_v47, %v5548_v26  ;;  %v3063_v53 = vrot.slane %v3049_v13, %v5548_v26  ;;  %v3045_v54 = vpop.f32.mrb[38].mxu1  ;;  %v4090_v55 = vpop.f32.mrb[43].mxu0  ;;  %4106 = vmatpush3.bf16.msra.mxu1 %v4352_v40 }
0x1141   : > { %v3072_v56 = vrot.slane %v3064_v12, %v5548_v26  ;;  %v3079_v57 = vrot.slane %v3065_v11, %v5548_v26  ;;  %v4096_v58 = vpop.f32.mrb[39].mxu1  ;;  %v4353_v12 = vld [vmem:[#allocation14 + $0x18] sm:$0xff]   ;;  %4107 = vmatprep.subr.bf16.mxu1 %v4937_v0  ;;  %v4354_v11 = vld [vmem:[#allocation17 + $0x20] sm:$0xff]  }
0x1142   : > { %v3872_v54 = vld [vmem:[#allocation11 + $0x1] ss:$0 sm:$0xff] }
0x1143   : > { %v3080_v48 = vcombine.low %v3056_v52, %v3072_v56  ;;  %v3081_v60 = vcombine.high %v3056_v52, %v3072_v56  ;;  %v3096_v61 = vcombine.low %v3063_v53, %v3079_v57  ;;  %v3097_v49 = vcombine.high %v3063_v53, %v3079_v57  ;;  %v3873_v56 = vld [vmem:[#allocation13 + $0x1] ss:$0 sm:$0xff] }
0x1144   : > { %4108 = vmatpush3.bf16.msra.mxu1 %v4353_v12 }
0x1145   : > { %v3088_v2 = vrot.slane %v3080_v48, %v5551_v33  ;;  %v3095_v6 = vrot.slane %v3081_v60, %v5551_v33  ;;  %v3104_v9 = vrot.slane %v3096_v61, %v5551_v33  ;;  %v3111_v10 = vrot.slane %v3097_v49, %v5551_v33  ;;  %4125 = vmatprep.subr.bf16.mxu1 %v4937_v0  ;;  %v4356_v60 = vld [vmem:[#allocation17 + $0x30] sm:$0xff]   ;;  %v4357_v61 = vld [vmem:[#allocation17 + $0x38] sm:$0xff]  }
0x1146   : > { %v3874_v49 = vld [vmem:[#allocation16 + $0x1] ss:$0 sm:$0xff] }
0x1147   : > { %v3116_v14 = vcombine.low %v3088_v2, %v3095_v6  ;;  %v3866_v3 = vcombine.high %v3088_v2, %v3095_v6  ;;  %v3132_v15 = vcombine.low %v3104_v9, %v3111_v10  ;;  %v3867_v18 = vcombine.high %v3104_v9, %v3111_v10 }
0x1149   : > { %v3123_v19 = vrot.slane %v3116_v14, %v5548_v26  ;;  %v3131_v20 = vrot.slane %v3866_v3, %v5548_v26  ;;  %v3139_v16 = vrot.slane %v3132_v15, %v5548_v26  ;;  %v3147_v17 = vrot.slane %v3867_v18, %v5548_v26  ;;  %v3878_v15 = vld [vmem:[#allocation19 + $0x1] ss:$0 sm:$0xff] }
0x114b   : > { %v3149_v23 = vcombine.high %v3123_v19, %v3131_v20  ;;  %v3165_v5 = vcombine.high %v3139_v16, %v3147_v17  ;;  %v3148_v62 = vcombine.low %v3123_v19, %v3131_v20  ;;  %v3164_v24 = vcombine.low %v3139_v16, %v3147_v17 }
0x114d   : > { %v3163_v25 = vrot.slane %v3149_v23, %v5551_v33  ;;  %v3179_v27 = vrot.slane %v3165_v5, %v5551_v33  ;;  %v3156_v28 = vrot.slane %v3148_v62, %v5551_v33  ;;  %v3172_v29 = vrot.slane %v3164_v24, %v5551_v33 }
0x114f   : > { %v3182_v21 = vcombine.low %v3163_v25, %v3179_v27  ;;  %v3181_v22 = vcombine.high %v3156_v28, %v3172_v29  ;;  %v3183_v32 = vcombine.high %v3163_v25, %v3179_v27  ;;  %v3180_v4 = vcombine.low %v3156_v28, %v3172_v29  ;;  %v4358_v28 = vld [vmem:[#allocation23] sm:$0xff]   ;;  %v4359_v29 = vld [vmem:[#allocation23 + $0x8] sm:$0xff]  }
0x1151   : > { %3189 = vrot.lane.b32.xlu1 %v3182_v21, %s4947_s30  ;;  %3185 = vrot.lane.b32.xlu0 %v3181_v22, %s4948_s1  ;;  %s4826_s30 = sshll.u32 %s4950_s24, 4  ;;  %s4827_s30 = int_to_ptr.vmem [resolvable:$false] %s4826_s30 }
0x1152   : > { %s4828_s1 = scalar_lea.vmem %s4827_s30, 128  ;;  %p4829_p0 = scmp.lt.s32.totalorder %s5936_s3, %s4827_s30 }
0x1153   : > { %p4830_p2 = scmp.lt.s32.totalorder %s4828_s1, %s4822_s20 }
0x1155   : > { %3193 = vrot.lane.b32.xlu1 %v3183_v32, %s4949_s2  ;;  %p4831_p6 = por %p4830_p2, %p4829_p0 }
0x1157   : > { %p4832_p5 = pnand %p4831_p6, %p4825_p8 }
0x11c3   : > { %v3190_v26 = vpop.permute.xlu1 %3189  ;;  %v3186_v8 = vpop.permute.xlu0 %3185 }
0x11c4   : > { %v3196_v34 = vsel %vm1250_vm3, %v3180_v4, %v3186_v8 }
0x11c5   : > { %v3197_v36 = vsel %vm1817_vm5, %v3196_v34, %v3190_v26  ;;  %v3884_v26 = vld [vmem:[#allocation20 + $0x1] ss:$0 sm:$0xff]  ;;  %v3885_v34 = vld [vmem:[#allocation22 + $0x1] ss:$0 sm:$0xff] }
0x11c7   : > { %v3194_v35 = vpop.permute.xlu1 %3193 }
0x11c8   : > { %v3198_v37 = vsel %vm1819_vm6, %v3197_v36, %v3194_v35 }
0x11c9   : > { %v3199_v33 = vpack.c.bf16 %v3198_v37, %v3198_v37 }
0x11cb   : > { %4102 = vmatmul.mubr.msk.bf16.vlgmr.msra.gmra.mrb[44].mxu0 %vm744_vm1, %v3199_v33  ;;  %v3886_v33 = vld [vmem:[#allocation25] ss:$0 sm:$0xff] }
0x11cc   : > { %4121 = vmatprep.mubr.msk.bf16.mxu0 %vm4938_vm0, %v4937_v0  ;;  %4114 = vmatpush3.bf16.msra.mxu0 %v4354_v11 }
0x11cd   : > { %4115 = vmatprep.subr.bf16.mxu0 %v4937_v0 }
0x129e   : > { %v3262_v41 = vpop.f32.mrb[44].mxu0 }
0x129f   : > { %v3263_v42 = vadd.f32 %v3868_v38, %v3262_v41  ;;  %v4103_v7 = vpop.f32.mrb[45].mxu0 }
0x12a0   : > { %v3265_v43 = vpop.f32.mrb[46].mxu0 }
0x12a1   : > { %v4104_v44 = vpop.f32.mrb[47].mxu0  ;;  %v3268_v30 = vadd.f32 %v3263_v42, %v5728_v59  ;;  %v4355_v59 = vld [vmem:[#allocation17 + $0x28] sm:$0xff]  }
0x12a2   : > { %4116 = vmatpush3.bf16.msra.mxu0 %v4355_v59 }
0x12a3   : > { %v3273_v45 = vsel %vm744_vm1, %v3268_v30, 0.0  ;;  %4117 = vmatprep.subr.bf16.mxu0 %v4937_v0 }
0x12a4   : > { %3274 = vadd.xlane.f32.xlu0 %v3273_v45 }
0x12a6   : > { %4118 = vmatpush3.bf16.msra.mxu0 %v4356_v60 }
0x12a7   : > { %4119 = vmatprep.subr.bf16.mxu0 %v4937_v0 }
0x12aa   : > { %4120 = vmatpush3.bf16.msra.mxu0 %v4357_v61 }
0x1331   : > { %v3275_v31 = vpop.xlane.xlu0 %3274 }
0x1332   : > { %v3276_v46 = vmul.f32 0.03125, %v3275_v31 }
0x1334   : > { %v3277_v47 = vsub.f32 %v3268_v30, %v3276_v46 }
0x1336   : > { %v3278_v13 = vmul.f32 %v3277_v47, %v3277_v47 }
0x1338   : > { %v3279_v39 = vsel %vm744_vm1, %v3278_v13, 0.0 }
0x1339   : > { %3280 = vadd.xlane.f32.xlu1 %v3279_v39 }
0x13c6   : > { %v3281_v50 = vpop.xlane.xlu1 %3280 }
0x13c7   : > { %v3282_v51 = vmul.f32 0.03125, %v3281_v50 }
0x13c9   : > { %v3283_v52 = vadd.f32 1e-05, %v3282_v51 }
0x13cb   : > { %4396 = vrsqrt.f32 %v3283_v52 }
0x13d5   : > { %v4397_v53 = vpop.eup %4396 }
0x13d6   : > { %v3285_v55 = vmul.f32 %v4397_v53, %v3277_v47 }
0x13d8   : > { %v3292_v57 = vmul.f32 %v3872_v54, %v3285_v55 }
0x13da   : > { %v3299_v58 = vadd.f32 %v3873_v56, %v3292_v57 }
0x13dc   : > { %v3300_v48 = vpack.c.bf16 %v3299_v58, %v3299_v58 }
0x13de   : > { %4110 = vmatmul.mubr.msk.bf16.vlgmr.msra.gmra.mrb[40].mxu1 %vm744_vm1, %v3300_v48 }
0x13df   : > { %4129 = vmatprep.mubr.msk.bf16.mxu1 %vm4938_vm0, %v4937_v0  ;;  %4126 = vmatpush3.bf16.msra.mxu1 %v4358_v28 }
0x13e0   : > { %4127 = vmatprep.subr.bf16.mxu1 %v4937_v0 }
0x13e3   : > { %4128 = vmatpush3.bf16.msra.mxu1 %v4359_v29 }
0x14b1   : > { %v3363_v63 = vpop.f32.mrb[40].mxu1 }
0x14b2   : > { %v3364_v2 = vadd.f32 %v3874_v49, %v3363_v63  ;;  %v4111_v6 = vpop.f32.mrb[41].mxu1 }
0x14b3   : > { %v3366_v9 = vpop.f32.mrb[42].mxu1 }
0x14b4   : > { %v3369_v10 = vmax.f32 %v3364_v2, 0.0  ;;  %v4112_v14 = vpop.f32.mrb[43].mxu1 }
0x14b6   : > { %v3370_v3 = vpack.c.bf16 %v3369_v10, %v3369_v10 }
0x14b8   : > { %4122 = vmatmul.mubr.msk.bf16.vlgmr.msra.gmra.mrb[48].mxu0 %vm2027_vm7, %v3370_v3 }
0x158b   : > { %v3449_v18 = vpop.f32.mrb[48].mxu0 }
0x158c   : > { %v3450_v1 = vadd.f32 %v3878_v15, %v3449_v18  ;;  %v4123_v19 = vpop.f32.mrb[49].mxu0 }
0x158d   : > { %v3452_v20 = vpop.f32.mrb[50].mxu0 }
0x158e   : > { %v4124_v16 = vpop.f32.mrb[51].mxu0  ;;  %v3455_v17 = vadd.f32 %v3450_v1, %v3299_v58 }
0x1590   : > { %v3460_v23 = vsel %vm744_vm1, %v3455_v17, 0.0 }
0x1591   : > { %3461 = vadd.xlane.f32.xlu0 %v3460_v23 }
0x161e   : > { %v3462_v5 = vpop.xlane.xlu0 %3461 }
0x161f   : > { %v3463_v62 = vmul.f32 0.03125, %v3462_v5 }
0x1621   : > { %v3464_v24 = vsub.f32 %v3455_v17, %v3463_v62 }
0x1623   : > { %v3465_v25 = vmul.f32 %v3464_v24, %v3464_v24 }
0x1625   : > { %v3466_v27 = vsel %vm744_vm1, %v3465_v25, 0.0 }
0x1626   : > { %3467 = vadd.xlane.f32.xlu0 %v3466_v27 }
0x16b3   : > { %v3468_v21 = vpop.xlane.xlu0 %3467 }
0x16b4   : > { %v3469_v22 = vmul.f32 0.03125, %v3468_v21 }
0x16b6   : > { %v3470_v32 = vadd.f32 1e-05, %v3469_v22 }
0x16b8   : > { %4398 = vrsqrt.f32 %v3470_v32 }
0x16c2   : > { %v4399_v4 = vpop.eup %4398 }
0x16c3   : > { %v3472_v8 = vmul.f32 %v4399_v4, %v3464_v24 }
0x16c5   : > { %v3479_v35 = vmul.f32 %v3884_v26, %v3472_v8 }
0x16c7   : > { %v3486_v36 = vadd.f32 %v3885_v34, %v3479_v35 }
0x16c9   : > { %v3487_v37 = vpack.c.bf16 %v3486_v36, %v3486_v36 }
0x16cb   : > { %4130 = vmatmul.mubr.msk.bf16.vlgmr.msra.gmra.mrb[44].mxu1 %vm744_vm1, %v3487_v37 }
0x179e   : > { %v3548_v0 = vpop.f32.mrb[44].mxu1 }
0x179f   : > { %v3549_v38 = vadd.f32 %v3886_v33, %v3548_v0  ;;  %v4131_v41 = vpop.f32.mrb[45].mxu1 }
0x17a0   : > { %v3551_v42 = vpop.f32.mrb[46].mxu1 }
0x17a1   : > { %v3554_v7 = vpack.c.bf16 %v3549_v38, %v3549_v38  ;;  %v4132_v43 = vpop.f32.mrb[47].mxu1 }
0x17a3   : > { %3555 = vst [vmem:[%s710_s23] sm:$0xf] %v3554_v7 }
0x17a4   : > { %4835 = shalt.err (!%p4832_p5)
}
0x17a5   : > { %s4836_s25 = scalar_lea.hbm %s5934_s29, 64  ;;  %s4840_s23 = scalar_lea.hbm %s6063_s27, 128 }
0x17a6   : > { %p4837_p10 = scmp.ne.s32.totalorder %s5934_s29, %s4836_s25  ;;  %p4841_p12 = scmp.lt.u32.totalorder %s5934_s29, %s6063_s27 }
0x17a7   : > { %p4842_p13 = scmp.lt.u32.totalorder %s4840_s23, %s4836_s25  ;;  %p4844_p7 = scmp.lt.u32.totalorder %s4836_s25, %s5934_s29 }
0x17a8   : > { %p4838_p1 = pnand %p4837_p10, %p6064_p9 }
0x17a9   : > { %p4843_p3 = por %p4842_p13, %p4841_p12 }
0x17aa   : > { %p4839_p11 = pneg %p4838_p1 }
0x17ab   : > { %p4845_p4 = por %p4844_p7, %p4843_p3 }
0x17ad   : > { %p4846_p8 = pnand %p4845_p4, %p4839_p11 }
0x17af   : > { %4849 = shalt.err (!%p4846_p8)
}
0x17b0   : > { %4191 = dma.vmem_to_hbm [thread:$0]  (%p6064_p9), %s5936_s3, 64, %s5934_s29, %s3557_s22  }
0x17b1 PF: > { %s6065_s20 = sld [smem:[#allocation36_spill]]  ;;  %p6066_p0 = scmp.ne.s32.totalorder %s6041_s15, 0 }
0x17b2   : > { %p6067_p2 = scmp.ge.s32.totalorder %s4916_s21, 2 }
0x17b4   : > { %p4241_p6 = pnand %p6067_p2, %p6066_p0 }
0x17b7   : > { %s3582_s24 = sand.u32 1, %s6065_s20  }
0x17b8   : > { %s3583_s30 = scalar_lea.sflag [#allocation4], %s3582_s24 }
0x17b9   : > { %4899 = dma.done.wait (!%p4241_p6), %s3583_s30, 64  }
0x17ba   : > { %4901 = vsyncadd (!%p4241_p6), %s3583_s30, 4294967232  ;;  %s6068_s18 = sld [smem:[#allocation37_spill]]  ;;  %s6069_s1 = sld [smem:[#allocation38_spill]] }
0x17bb   : > { %s6070_s25 = smov %s5397_s19  ;;  %p35_p5 = scmp.ge.s32.totalorder %s5386_s28, 4  }
0x17bc   : > { %s6072_s20 = smov %s6070_s25  ;;  %s6073_s21 = smov %s5386_s28 }
0x17bd   :  { %37 = sbr.rel (!%p35_p5) target bundleno = 18 (0x12), region = 193 }
0x17c0   : > { %s6071_s19 = smov %s6069_s1 }
0x17c4   :  { %3588 = vsyncpa [#allocation3], 1 }
0x17c5   :  { %3590 = vsyncpa [#allocation3 + $0x1], 1 }
0x17c6   :  { %3591 = vsyncpa [#allocation6], 1 }
0x17c7   :  { %3592 = vsyncpa [#allocation9], 1 }
0x17c8   :  { %3593 = vsyncpa [#allocation12], 1 }
0x17c9   :  { %3594 = vsyncpa [#allocation15], 1 }
0x17ca   :  { %3595 = vsyncpa [#allocation18], 1 }
0x17cb   :  { %3596 = vsyncpa [#allocation21], 1 }
0x17cc   :  { %3597 = vsyncpa [#allocation24], 1 }
0x17cd   :  { %3598 = vsyncpa [#allocation4], 1 }
0x17ce   :  { %3600 = vsyncpa [#allocation4 + $0x1], 1 }

</bundles_post_ra>
